<compile_context>
chip_gen: v7x
topology: tpu7x:2x2x1
jax: 0.10.0
libtpu: 0.0.40
codegen_flags: <defaults>
</compile_context>

<pallas_src>
import functools

import jax
import jax.numpy as jnp
from jax.experimental import pallas as pl
from jax.experimental.pallas import tpu as pltpu

_BN_EPS = 1e-5


# ----------------------------------------------------------------------------
# Fused Bottleneck kernel (one image x one row-band per grid step)
# ----------------------------------------------------------------------------
def _bottleneck_kernel(x_ref, w1_ref, b1_ref, w2_ref, b2_ref, o_ref, qbuf_ref,
                       *, H, W, band_rows, add):
    """x_ref   : (H*W + 2W, Cin)    bf16  whole image, zero-padded W rows top/bot
       w1_ref  : (Cin, Cmid)        bf16  1x1 weight, BN scale folded in
       b1_ref  : (1, Cmid)          f32   folded BN bias
       w2_ref  : (3, 3*Cmid, Cout)  bf16  3x3 weight, kw taps fused on K, BN folded
       b2_ref  : (1, Cout)          f32
       o_ref   : (band_rows, Cout)  bf16
       qbuf_ref: (band_rows+2W, 3*Cmid) bf16  [kw=0 | kw=1 | kw=2] shifted cv1
    """
    M = H * W
    Mb = band_rows
    L = Mb + 2 * W                       # band + one image row halo each side
    cmid = w1_ref.shape[1]

    band = pl.program_id(1)
    start = pl.multiple_of(band * Mb, Mb & -Mb)     # first output row (flat)

    # ---- cv1: 1x1 conv (BN scale pre-folded) + bias + SiLU over band+halo --
    x_ext = x_ref[pl.ds(start, L), :]               # padded rows start..start+L
    y1 = jnp.dot(x_ext, w1_ref[...], preferred_element_type=jnp.float32)
    y1 = y1 + b1_ref[...]
    y1 = y1 * pl.reciprocal(1.0 + jnp.exp(-y1), approx=True)        # SiLU (EUP)

    # Rows outside the image must be exactly zero: they are cv2's vertical
    # padding (the wrapper's zero x-padding alone is not enough because of the
    # bias + SiLU).  Done in registers -- no scratch zero-fill stores.
    q = jax.lax.broadcasted_iota(jnp.int32, (L, 1), 0)
    g = start - W + q                               # global (unpadded) y1 row
    y1 = jnp.where((g >= 0) & (g < M), y1, 0.0)

    # ---- build the kw-shifted, column-masked bf16 buffer ONCE ---------------
    # Band boundaries are whole image rows (start % W == 0), so the image
    # column of destination row q is simply q % W, and the single roll
    # wrap-around row on each side is always column-masked.
    col = q % W
    left = jnp.where(col != 0, pltpu.roll(y1, 1, axis=0), 0.0)        # y1[g-1]
    right = jnp.where(col != W - 1, pltpu.roll(y1, L - 1, axis=0), 0.0)  # y1[g+1]
    qbuf_ref[:, 0:cmid] = left.astype(jnp.bfloat16)
    qbuf_ref[:, cmid:2 * cmid] = y1.astype(jnp.bfloat16)
    qbuf_ref[:, 2 * cmid:3 * cmid] = right.astype(jnp.bfloat16)

    # ---- cv2: 3 MXU matmuls (one per kh tap), K = 3*Cmid, aligned slices ----
    acc = jnp.dot(qbuf_ref[0:Mb, :], w2_ref[0],
                  preferred_element_type=jnp.float32)
    acc = acc + jnp.dot(qbuf_ref[W:W + Mb, :], w2_ref[1],
                        preferred_element_type=jnp.float32)
    acc = acc + jnp.dot(qbuf_ref[2 * W:2 * W + Mb, :], w2_ref[2],
                        preferred_element_type=jnp.float32)

    y2 = acc + b2_ref[...]
    y2 = y2 * pl.reciprocal(1.0 + jnp.exp(-y2), approx=True)         # SiLU
    if add:
        # residual add in f32 with this band's own (unpadded) input rows
        y2 = y2 + x_ref[pl.ds(start + W, Mb), :].astype(jnp.float32)
    o_ref[...] = y2.astype(o_ref.dtype)


# ----------------------------------------------------------------------------
# Wrapper (channels-last native)
# ----------------------------------------------------------------------------
def bottleneck_forward(params, x_nhwc, add_flag=True, n_bands=None):
    """Fused Bottleneck forward.  x_nhwc: (N, H, W, Cin); returns NHWC bf16."""
    N, H, W, cin = x_nhwc.shape
    cmid = params["w1"].shape[1]
    cout = params["w2"].shape[2]
    M = H * W
    if add_flag and cin != cout:
        raise ValueError("residual add requires in_channels == out_channels")

    if n_bands is None:
        n_bands = 1
        for d in range(1, H + 1):            # bands cover whole image rows
            mb = (H // d) * W
            if H % d == 0 and mb <= 4096 and (mb % 8 == 0 or d == 1):
                n_bands = d
                break
    if H % n_bands != 0:
        raise ValueError("n_bands must divide H")
    Mb = (H // n_bands) * W
    if n_bands > 1 and Mb % 8 != 0:
        raise ValueError("band rows must be a multiple of 8")
    Mp = M + 2 * W

    # bf16 at the HBM boundary + one zero image-row of padding above/below
    # (halo source for every band).  In a full network keep activations
    # bf16/NHWC end-to-end so this fuses into the producer.
    x = x_nhwc.reshape(N, M, cin).astype(jnp.bfloat16)
    x = jnp.pad(x, ((0, 0), (W, W), (0, 0)))

    kernel = functools.partial(_bottleneck_kernel, H=H, W=W, band_rows=Mb,
                               add=add_flag)
    out = pl.pallas_call(
        kernel,
        out_shape=jax.ShapeDtypeStruct((N, M, cout), jnp.bfloat16),
        grid_spec=pltpu.PrefetchScalarGridSpec(
            num_scalar_prefetch=0,
            grid=(N, n_bands),
            in_specs=[
                # whole padded image stays resident across its bands (block
                # index constant along the band axis -> no re-DMA per band)
                pl.BlockSpec((None, Mp, cin), lambda n, b: (n, 0, 0)),
                pl.BlockSpec((cin, cmid), lambda n, b: (0, 0)),
                pl.BlockSpec((1, cmid), lambda n, b: (0, 0)),
                pl.BlockSpec((3, 3 * cmid, cout), lambda n, b: (0, 0, 0)),
                pl.BlockSpec((1, cout), lambda n, b: (0, 0)),
            ],
            out_specs=pl.BlockSpec((None, Mb, cout), lambda n, b: (n, b, 0)),
            scratch_shapes=[pltpu.VMEM((Mb + 2 * W, 3 * cmid), jnp.bfloat16)],
        ),
        compiler_params=pltpu.CompilerParams(
            dimension_semantics=("parallel", "parallel"),
        ),
    )(x, params["w1"], params["b1"], params["w2"], params["b2"])
    return out.reshape(N, H, W, cout)


# ----------------------------------------------------------------------------
# Parameter init: Conv(bias=False) + eval-mode BN folded (scale -> weights)
# ----------------------------------------------------------------------------
def _init_conv_bn_silu(key, cin, cout, k):
    kw_, kg, kb, km, kv = jax.random.split(key, 5)
    fan_in = k * k * cin
    w = jax.random.normal(kw_, (k, k, cin, cout), jnp.float32) * jnp.sqrt(
        2.0 / fan_in)                                        # HWIO
    gamma = 1.0 + 0.05 * jax.random.normal(kg, (cout,), jnp.float32)
    beta = 0.05 * jax.random.normal(kb, (cout,), jnp.float32)
    mean = 0.05 * jax.random.normal(km, (cout,), jnp.float32)
    var = 1.0 + 0.1 * jnp.abs(jax.random.normal(kv, (cout,), jnp.float32))
    scale = gamma / jnp.sqrt(var + _BN_EPS)                  # eval-mode BN
    bias = beta - mean * scale
    return w * scale, bias                                   # fold scale into W


def init_bottleneck(key, cin, cout):
    k1, k2 = jax.random.split(key)
    w1, b1 = _init_conv_bn_silu(k1, cin, cout, 1)            # cv1: 1x1
    w2, b2 = _init_conv_bn_silu(k2, cout, cout, 3)           # cv2: 3x3
    return {
        "w1": w1.reshape(cin, cout).astype(jnp.bfloat16),
        "b1": b1.reshape(1, cout),
        # (kh, 3*Cmid, Cout): kw taps fused along K to match the qbuf layout
        "w2": w2.reshape(3, 3 * cout, cout).astype(jnp.bfloat16),
        "b2": b2.reshape(1, cout),
    }


# ----------------------------------------------------------------------------
# Pure-JAX (XLA) reference using the same folded weights, f32 math
# ----------------------------------------------------------------------------
def bottleneck_reference(params, x_nhwc, add_flag=True):
    x = x_nhwc.astype(jnp.float32)
    w1 = params["w1"].astype(jnp.float32)
    y1 = jnp.einsum("nhwc,cd->nhwd", x, w1,
                    precision=jax.lax.Precision.HIGHEST) + params["b1"][0]
    y1 = y1 * jax.nn.sigmoid(y1)
    cmid = w1.shape[1]
    cout = params["w2"].shape[-1]
    w2 = params["w2"].astype(jnp.float32).reshape(3, 3, cmid, cout)   # HWIO
    y2 = jax.lax.conv_general_dilated(
        y1, w2, window_strides=(1, 1), padding=((1, 1), (1, 1)),
        dimension_numbers=("NHWC", "HWIO", "NHWC"),
        precision=jax.lax.Precision.HIGHEST)
    y2 = y2 + params["b2"][0]
    y2 = y2 * jax.nn.sigmoid(y2)
    return x + y2 if add_flag else y2


if __name__ == "__main__":
    root = jax.random.PRNGKey(0)
    pkey, xkey = jax.random.split(root)

    # Small YOLOv5-like bottleneck: batch=2, 128 channels, 16x16 spatial.
    N, C, H, W = 2, 128, 16, 16
    params = init_bottleneck(pkey, C, C)
    x_nchw = jax.random.normal(xkey, (N, C, H, W), jnp.float32)
    # kernel is channels-last native; convert once at the boundary
    x_nhwc = jnp.transpose(x_nchw, (0, 2, 3, 1))

    for add_flag in (True, False):
        ref = bottleneck_reference(params, x_nhwc, add_flag=add_flag)
        ref_max = float(jnp.max(jnp.abs(ref)))
        for n_bands in (1, 2):                 # exercise single- and multi-band
            fwd = jax.jit(functools.partial(bottleneck_forward,
                                            add_flag=add_flag, n_bands=n_bands))
            out = fwd(params, x_nhwc)
            jax.block_until_ready(out)
            assert out.shape == (N, H, W, C)
            err = float(jnp.max(jnp.abs(out.astype(jnp.float32) - ref)))
            assert err <= 4e-2 * ref_max + 4e-2, (
                f"add={add_flag} bands={n_bands}: "
                f"max|diff|={err:.4f} vs max|ref|={ref_max:.4f}")

    print("KERNEL_OK")
</pallas_src>

<mosaic_0001>
module attributes {stable_mosaic.version = 11 : i64} {
  func.func @_bottleneck_kernel(%arg0: i32, %arg1: i32, %arg2: memref<1x288x128xbf16, #tpu.memory_space<vmem>>, %arg3: memref<128x128xbf16, #tpu.memory_space<vmem>>, %arg4: memref<1x128xf32, #tpu.memory_space<vmem>>, %arg5: memref<3x384x128xbf16, #tpu.memory_space<vmem>>, %arg6: memref<1x128xf32, #tpu.memory_space<vmem>>, %arg7: memref<1x256x128xbf16, #tpu.memory_space<vmem>>, %arg8: memref<288x384xbf16, #tpu.memory_space<vmem>>) attributes {dimension_semantics = [#tpu.dimension_semantics<parallel>, #tpu.dimension_semantics<parallel>], iteration_bounds = array<i64: 2, 1>, scalar_prefetch = 0 : i64, scratch_operands = 1 : i64, tpu.core_type = #tpu.core_type<tc>, window_params = [{transform_indices = @transform_0, window_bounds = array<i64: 1, 288, 128>}, {pipeline_mode = #tpu.pipeline_mode<synchronous>, transform_indices = @transform_1, window_bounds = array<i64: 128, 128>}, {pipeline_mode = #tpu.pipeline_mode<synchronous>, transform_indices = @transform_2, window_bounds = array<i64: 1, 128>}, {pipeline_mode = #tpu.pipeline_mode<synchronous>, transform_indices = @transform_3, window_bounds = array<i64: 3, 384, 128>}, {pipeline_mode = #tpu.pipeline_mode<synchronous>, transform_indices = @transform_4, window_bounds = array<i64: 1, 128>}, {transform_indices = @transform_5, window_bounds = array<i64: 1, 256, 128>}]} {
    %c256_i32 = arith.constant 256 : i32
    %0 = arith.muli %arg1, %c256_i32 : i32
    %1 = tpu.assume_multiple %0, 256 : i32
    %c0 = arith.constant 0 : index
    %2 = arith.index_cast %1 : i32 to index
    %c0_0 = arith.constant 0 : index
    %3 = vector.load %arg2[%c0, %2, %c0_0] : memref<1x288x128xbf16, #tpu.memory_space<vmem>>, vector<1x288x128xbf16>
    %4 = vector.shape_cast %3 : vector<1x288x128xbf16> to vector<288x128xbf16>
    %c0_1 = arith.constant 0 : index
    %c0_2 = arith.constant 0 : index
    %5 = vector.load %arg3[%c0_1, %c0_2] : memref<128x128xbf16, #tpu.memory_space<vmem>>, vector<128x128xbf16>
    %cst = arith.constant dense<0.000000e+00> : vector<288x128xf32>
    %6 = tpu.matmul %4, %5, %cst {dimension_numbers = #tpu.dot_dimension_numbers<[1], [0], [0], [1], [0, 0, 1, 1], [], []>} : vector<288x128xbf16>, vector<128x128xbf16>, vector<288x128xf32> -> vector<288x128xf32>
    %c0_3 = arith.constant 0 : index
    %c0_4 = arith.constant 0 : index
    %7 = vector.load %arg4[%c0_3, %c0_4] : memref<1x128xf32, #tpu.memory_space<vmem>>, vector<1x128xf32>
    %8 = vector.broadcast %7 : vector<1x128xf32> to vector<288x128xf32>
    %9 = arith.addf %6, %8 : vector<288x128xf32>
    %cst_5 = arith.constant 0.000000e+00 : f32
    %10 = vector.broadcast %cst_5 : f32 to vector<288x128xf32>
    %11 = arith.subf %10, %9 : vector<288x128xf32>
    %12 = math.exp %11 : vector<288x128xf32>
    %cst_6 = arith.constant 1.000000e+00 : f32
    %13 = vector.broadcast %cst_6 : f32 to vector<288x128xf32>
    %14 = arith.addf %13, %12 : vector<288x128xf32>
    %15 = tpu.reciprocal %14 {approx = true} : vector<288x128xf32> -> vector<288x128xf32>
    %16 = arith.mulf %9, %15 : vector<288x128xf32>
    %17 = tpu.iota {dimensions = array<i32: 0>} : vector<288x1xi32>
    %c16_i32 = arith.constant 16 : i32
    %18 = arith.subi %1, %c16_i32 : i32
    %19 = vector.broadcast %18 : i32 to vector<288x1xi32>
    %20 = arith.addi %19, %17 : vector<288x1xi32>
    %c0_i32 = arith.constant 0 : i32
    %21 = vector.broadcast %c0_i32 : i32 to vector<288x1xi32>
    %22 = arith.cmpi sge, %20, %21 : vector<288x1xi32>
    %c256_i32_7 = arith.constant 256 : i32
    %23 = vector.broadcast %c256_i32_7 : i32 to vector<288x1xi32>
    %24 = arith.cmpi slt, %20, %23 : vector<288x1xi32>
    %25 = arith.andi %22, %24 : vector<288x1xi1>
    %cst_8 = arith.constant 0.000000e+00 : f32
    %26 = vector.shape_cast %25 : vector<288x1xi1> to vector<288x1xi1>
    %27 = vector.broadcast %26 : vector<288x1xi1> to vector<288x128xi1>
    %28 = vector.broadcast %cst_8 : f32 to vector<288x128xf32>
    %29 = arith.select %27, %16, %28 : vector<288x128xi1>, vector<288x128xf32>
    %c16_i32_9 = arith.constant 16 : i32
    %c0_i32_10 = arith.constant 0 : i32
    %30 = arith.cmpi eq, %c16_i32_9, %c0_i32_10 : i32
    %c1_i32 = arith.constant 1 : i32
    %31 = arith.select %30, %c1_i32, %c16_i32_9 : i32
    %32 = vector.broadcast %31 : i32 to vector<288x1xi32>
    %33 = arith.remsi %17, %32 : vector<288x1xi32>
    %c0_i32_11 = arith.constant 0 : i32
    %34 = vector.broadcast %c0_i32_11 : i32 to vector<288x1xi32>
    %35 = arith.cmpi ne, %33, %34 : vector<288x1xi32>
    %c0_i32_12 = arith.constant 0 : i32
    %36 = vector.broadcast %c0_i32_12 : i32 to vector<288x1xi32>
    %37 = arith.cmpi slt, %33, %36 : vector<288x1xi32>
    %c0_i32_13 = arith.constant 0 : i32
    %38 = arith.cmpi slt, %31, %c0_i32_13 : i32
    %39 = vector.broadcast %38 : i1 to vector<288x1xi1>
    %40 = vector.broadcast %39 : vector<288x1xi1> to vector<288x1xi1>
    %41 = arith.xori %37, %40 : vector<288x1xi1>
    %42 = arith.andi %41, %35 : vector<288x1xi1>
    %43 = vector.broadcast %31 : i32 to vector<288x1xi32>
    %44 = arith.addi %33, %43 : vector<288x1xi32>
    %45 = arith.select %42, %44, %33 : vector<288x1xi1>, vector<288x1xi32>
    %c0_i32_14 = arith.constant 0 : i32
    %46 = vector.broadcast %c0_i32_14 : i32 to vector<288x1xi32>
    %47 = arith.cmpi ne, %45, %46 : vector<288x1xi32>
    %c1_i32_15 = arith.constant 1 : i32
    %48 = tpu.dynamic_rotate %29 by %c1_i32_15 dim 0 : vector<288x128xf32>, i32 -> vector<288x128xf32>
    %cst_16 = arith.constant 0.000000e+00 : f32
    %49 = vector.shape_cast %47 : vector<288x1xi1> to vector<288x1xi1>
    %50 = vector.broadcast %49 : vector<288x1xi1> to vector<288x128xi1>
    %51 = vector.broadcast %cst_16 : f32 to vector<288x128xf32>
    %52 = arith.select %50, %48, %51 : vector<288x128xi1>, vector<288x128xf32>
    %c15_i32 = arith.constant 15 : i32
    %53 = vector.broadcast %c15_i32 : i32 to vector<288x1xi32>
    %54 = arith.cmpi ne, %45, %53 : vector<288x1xi32>
    %c287_i32 = arith.constant 287 : i32
    %55 = tpu.dynamic_rotate %29 by %c287_i32 dim 0 : vector<288x128xf32>, i32 -> vector<288x128xf32>
    %cst_17 = arith.constant 0.000000e+00 : f32
    %56 = vector.shape_cast %54 : vector<288x1xi1> to vector<288x1xi1>
    %57 = vector.broadcast %56 : vector<288x1xi1> to vector<288x128xi1>
    %58 = vector.broadcast %cst_17 : f32 to vector<288x128xf32>
    %59 = arith.select %57, %55, %58 : vector<288x128xi1>, vector<288x128xf32>
    %60 = arith.truncf %52 : vector<288x128xf32> to vector<288x128xbf16>
    %c0_18 = arith.constant 0 : index
    %c0_19 = arith.constant 0 : index
    %61 = vector.load %arg8[%c0_18, %c0_19] : memref<288x384xbf16, #tpu.memory_space<vmem>>, vector<288x128xbf16>
    tpu.vector_store %arg8[%c0_18, %c0_19], %60 {strides = array<i32>} : memref<288x384xbf16, #tpu.memory_space<vmem>>, vector<288x128xbf16>,
    %62 = arith.truncf %29 : vector<288x128xf32> to vector<288x128xbf16>
    %c0_20 = arith.constant 0 : index
    %c128 = arith.constant 128 : index
    %63 = vector.load %arg8[%c0_20, %c128] : memref<288x384xbf16, #tpu.memory_space<vmem>>, vector<288x128xbf16>
    tpu.vector_store %arg8[%c0_20, %c128], %62 {strides = array<i32>} : memref<288x384xbf16, #tpu.memory_space<vmem>>, vector<288x128xbf16>,
    %64 = arith.truncf %59 : vector<288x128xf32> to vector<288x128xbf16>
    %c0_21 = arith.constant 0 : index
    %c256 = arith.constant 256 : index
    %65 = vector.load %arg8[%c0_21, %c256] : memref<288x384xbf16, #tpu.memory_space<vmem>>, vector<288x128xbf16>
    tpu.vector_store %arg8[%c0_21, %c256], %64 {strides = array<i32>} : memref<288x384xbf16, #tpu.memory_space<vmem>>, vector<288x128xbf16>,
    %c0_22 = arith.constant 0 : index
    %c0_23 = arith.constant 0 : index
    %66 = vector.load %arg8[%c0_22, %c0_23] : memref<288x384xbf16, #tpu.memory_space<vmem>>, vector<256x384xbf16>
    %c0_24 = arith.constant 0 : index
    %c0_25 = arith.constant 0 : index
    %c0_26 = arith.constant 0 : index
    %67 = vector.load %arg5[%c0_24, %c0_25, %c0_26] : memref<3x384x128xbf16, #tpu.memory_space<vmem>>, vector<1x384x128xbf16>
    %68 = vector.shape_cast %67 : vector<1x384x128xbf16> to vector<384x128xbf16>
    %cst_27 = arith.constant dense<0.000000e+00> : vector<256x128xf32>
    %69 = tpu.matmul %66, %68, %cst_27 {dimension_numbers = #tpu.dot_dimension_numbers<[1], [0], [0], [1], [0, 0, 1, 1], [], []>} : vector<256x384xbf16>, vector<384x128xbf16>, vector<256x128xf32> -> vector<256x128xf32>
    %c16 = arith.constant 16 : index
    %c0_28 = arith.constant 0 : index
    %70 = vector.load %arg8[%c16, %c0_28] : memref<288x384xbf16, #tpu.memory_space<vmem>>, vector<256x384xbf16>
    %c1 = arith.constant 1 : index
    %c0_29 = arith.constant 0 : index
    %c0_30 = arith.constant 0 : index
    %71 = vector.load %arg5[%c1, %c0_29, %c0_30] : memref<3x384x128xbf16, #tpu.memory_space<vmem>>, vector<1x384x128xbf16>
    %72 = vector.shape_cast %71 : vector<1x384x128xbf16> to vector<384x128xbf16>
    %cst_31 = arith.constant dense<0.000000e+00> : vector<256x128xf32>
    %73 = tpu.matmul %70, %72, %cst_31 {dimension_numbers = #tpu.dot_dimension_numbers<[1], [0], [0], [1], [0, 0, 1, 1], [], []>} : vector<256x384xbf16>, vector<384x128xbf16>, vector<256x128xf32> -> vector<256x128xf32>
    %74 = arith.addf %69, %73 : vector<256x128xf32>
    %c32 = arith.constant 32 : index
    %c0_32 = arith.constant 0 : index
    %75 = vector.load %arg8[%c32, %c0_32] : memref<288x384xbf16, #tpu.memory_space<vmem>>, vector<256x384xbf16>
    %c2 = arith.constant 2 : index
    %c0_33 = arith.constant 0 : index
    %c0_34 = arith.constant 0 : index
    %76 = vector.load %arg5[%c2, %c0_33, %c0_34] : memref<3x384x128xbf16, #tpu.memory_space<vmem>>, vector<1x384x128xbf16>
    %77 = vector.shape_cast %76 : vector<1x384x128xbf16> to vector<384x128xbf16>
    %cst_35 = arith.constant dense<0.000000e+00> : vector<256x128xf32>
    %78 = tpu.matmul %75, %77, %cst_35 {dimension_numbers = #tpu.dot_dimension_numbers<[1], [0], [0], [1], [0, 0, 1, 1], [], []>} : vector<256x384xbf16>, vector<384x128xbf16>, vector<256x128xf32> -> vector<256x128xf32>
    %79 = arith.addf %74, %78 : vector<256x128xf32>
    %c0_36 = arith.constant 0 : index
    %c0_37 = arith.constant 0 : index
    %80 = vector.load %arg6[%c0_36, %c0_37] : memref<1x128xf32, #tpu.memory_space<vmem>>, vector<1x128xf32>
    %81 = vector.broadcast %80 : vector<1x128xf32> to vector<256x128xf32>
    %82 = arith.addf %79, %81 : vector<256x128xf32>
    %cst_38 = arith.constant 0.000000e+00 : f32
    %83 = vector.broadcast %cst_38 : f32 to vector<256x128xf32>
    %84 = arith.subf %83, %82 : vector<256x128xf32>
    %85 = math.exp %84 : vector<256x128xf32>
    %cst_39 = arith.constant 1.000000e+00 : f32
    %86 = vector.broadcast %cst_39 : f32 to vector<256x128xf32>
    %87 = arith.addf %86, %85 : vector<256x128xf32>
    %88 = tpu.reciprocal %87 {approx = true} : vector<256x128xf32> -> vector<256x128xf32>
    %89 = arith.mulf %82, %88 : vector<256x128xf32>
    %c16_i32_40 = arith.constant 16 : i32
    %90 = arith.addi %1, %c16_i32_40 : i32
    %c0_41 = arith.constant 0 : index
    %91 = arith.index_cast %90 : i32 to index
    %c0_42 = arith.constant 0 : index
    %92 = vector.load %arg2[%c0_41, %91, %c0_42] : memref<1x288x128xbf16, #tpu.memory_space<vmem>>, vector<1x256x128xbf16>
    %93 = vector.shape_cast %92 : vector<1x256x128xbf16> to vector<256x128xbf16>
    %94 = arith.extf %93 : vector<256x128xbf16> to vector<256x128xf32>
    %95 = arith.addf %89, %94 : vector<256x128xf32>
    %96 = arith.truncf %95 : vector<256x128xf32> to vector<256x128xbf16>
    %c0_43 = arith.constant 0 : index
    %c0_44 = arith.constant 0 : index
    %c0_45 = arith.constant 0 : index
    %97 = vector.load %arg7[%c0_43, %c0_44, %c0_45] : memref<1x256x128xbf16, #tpu.memory_space<vmem>>, vector<1x256x128xbf16>
    %98 = vector.shape_cast %97 : vector<1x256x128xbf16> to vector<256x128xbf16>
    %99 = vector.shape_cast %96 : vector<256x128xbf16> to vector<1x256x128xbf16>
    tpu.vector_store %arg7[%c0_43, %c0_44, %c0_45], %99 {strides = array<i32>} : memref<1x256x128xbf16, #tpu.memory_space<vmem>>, vector<1x256x128xbf16>,
    return
  }
  func.func @transform_0(%arg0: i32, %arg1: i32) -> (i32, i32, i32) {
    %c0_i32 = arith.constant 0 : i32
    %c0_i32_0 = arith.constant 0 : i32
    %c0_i32_1 = arith.constant 0 : i32
    return %arg0, %c0_i32, %c0_i32_0 : i32, i32, i32
  }
  func.func @transform_1(%arg0: i32, %arg1: i32) -> (i32, i32) {
    %c0_i32 = arith.constant 0 : i32
    %c0_i32_0 = arith.constant 0 : i32
    %c0_i32_1 = arith.constant 0 : i32
    return %c0_i32, %c0_i32_0 : i32, i32
  }
  func.func @transform_2(%arg0: i32, %arg1: i32) -> (i32, i32) {
    %c0_i32 = arith.constant 0 : i32
    %c0_i32_0 = arith.constant 0 : i32
    %c0_i32_1 = arith.constant 0 : i32
    return %c0_i32, %c0_i32_0 : i32, i32
  }
  func.func @transform_3(%arg0: i32, %arg1: i32) -> (i32, i32, i32) {
    %c0_i32 = arith.constant 0 : i32
    %c0_i32_0 = arith.constant 0 : i32
    %c0_i32_1 = arith.constant 0 : i32
    %c0_i32_2 = arith.constant 0 : i32
    return %c0_i32, %c0_i32_0, %c0_i32_1 : i32, i32, i32
  }
  func.func @transform_4(%arg0: i32, %arg1: i32) -> (i32, i32) {
    %c0_i32 = arith.constant 0 : i32
    %c0_i32_0 = arith.constant 0 : i32
    %c0_i32_1 = arith.constant 0 : i32
    return %c0_i32, %c0_i32_0 : i32, i32
  }
  func.func @transform_5(%arg0: i32, %arg1: i32) -> (i32, i32, i32) {
    %c0_i32 = arith.constant 0 : i32
    %c0_i32_0 = arith.constant 0 : i32
    return %arg0, %arg1, %c0_i32 : i32, i32, i32
  }
}

</mosaic_0001>

<bundles_post_ra>
// kernel: bottleneck_forward.1
= control target key start
LH: loop header
LB: loop body
LE: loop exit
PB: predicated region body
PF: predicated region fallthrough
CT: control target
= control target key end

     0   :  { %10 = vsyncpa [#allocation4], 0  ;;  %s8846_s0 = inlined_call_operand.vmem [shape: bf16[2,288,128], index: 0, kind: input, shape index: {}]   ;;  %s8847_s1 = inlined_call_operand.vmem [shape: bf16[128,128], index: 1, kind: input, shape index: {}]   ;;  %s8848_s2 = inlined_call_operand.vmem [shape: f32[1,128], index: 2, kind: input, shape index: {}]   ;;  %s8849_s3 = inlined_call_operand.vmem [shape: bf16[3,384,128], index: 3, kind: input, shape index: {}]   ;;  %s8850_s4 = inlined_call_operand.vmem [shape: f32[1,128], index: 4, kind: input, shape index: {}]   ;;  %s8851_s5 = inlined_call_operand.hbm [shape: bf16[2,256,128], index: 5, kind: output, shape index: {}]  }
   0x1   :  { %12 = vsyncpa [#allocation4 + $0x1], 0  ;;  %s6466_s18 = smov 0   ;;  %s6468_s19 = smov 0  }
   0x2   :  { %s6470_s20 = smov 0   ;;  %s6472_s21 = smov 0  }
   0x3   :  { %s6474_s22 = smov 0   ;;  %s6476_s23 = smov 0  }
   0x4 LB: > { %s4377_s24 = sadd.s32 4294967295, %s6428_s23   ;;  %s4378_s25 = sadd.s32 4294967294, %s6428_s23   ;;  %s6428_s23 = sphi %s6476_s23, %s18_s23   ;;  %s6424_s22 = sphi %s6474_s22, %s9341_s22   ;;  %s6420_s21 = sphi %s6472_s21, %s9340_s21   ;;  %s6416_s20 = sphi %s6470_s20, %s9339_s20   ;;  %s6412_s19 = sphi %s6468_s19, %s9338_s19   ;;  %s6408_s18 = sphi %s6466_s18, %s9337_s18  }
   0x5   : > { %s30_s26 = sadd.s32 1, %s6424_s22  ;;  %s149_s27 = sadd.s32 1, %s6416_s20 }
   0x6   : > { %p32_p0 = scmp.ge.s32.totalorder %s30_s26, 2  ;;  %p159_p1 = scmp.ne.s32.totalorder %s6416_s20, %s6412_s19 }
   0x7   : > { %p160_p2 = scmp.eq.s32.totalorder %s4377_s24, 1  ;;  %p165_p3 = scmp.ne.s32.totalorder %s6412_s19, %s6408_s18 }
   0x8   : > { %s9343_s26 = smov (%p32_p0, %s30_s26), 0  ;;  %p166_p5 = scmp.eq.s32.totalorder %s4378_s25, 1 }
   0x9   : > { %p6506_p4 = por %p160_p2, %p159_p1  ;;  %s144_s29 = ssub.s32 %s6424_s22, %s9343_s26 }
   0xa   : > { %p4381_p6 = scmp.ge.s32.totalorder %s6428_s23, 1  ;;  %p147_p7 = scmp.eq.s32.totalorder %s144_s29, 0 }
   0xb   : > { %p6513_p8 = por %p166_p5, %p165_p3  ;;  %p204_p9 = scmp.lt.s32.totalorder %s6428_s23, 3 }
   0xc   : > { %s6519_s6 = scalar_select %p147_p7, %s6416_s20, %s149_s27  }
   0xd   : > { %p205_p10 = pnand %p4381_p6, %p204_p9 }
   0xf   : > { %208 = sbr.rel (%p205_p10) target bundleno = 958 (0x3be), region = 40 }
  0x16   : > { %v5996_v0 = vld [vmem:[%s8847_s1] sm:$0xff]   ;;  %p232_p11 = scmp.lt.s32.totalorder %s6420_s21, 1  ;;  %v5997_v1 = vld [vmem:[%s8847_s1 + $0x8] sm:$0xff]   ;;  %v5998_v2 = vld [vmem:[%s8847_s1 + $0x10] sm:$0xff]   ;;  %v852_v51 = vlaneseq  ;;  %vm8887_vm2 = vmmov 1   ;;  %s229_s7 = sand.u32 1, %s6412_s19  }
  0x17   : > { %5579 = vmatprep.subr.bf16.mxu1 %v5996_v0  ;;  %v5999_v3 = vld [vmem:[%s8847_s1 + $0x18] sm:$0xff]   ;;  %v6000_v5 = vld [vmem:[%s8847_s1 + $0x20] sm:$0xff]   ;;  %v6001_v6 = vld [vmem:[%s8847_s1 + $0x28] sm:$0xff]   ;;  %s8622_s8 = sshll.u32 %s229_s7, 7  ;;  %s6433_s15 = smov [#allocation3]  }
  0x18   : > { %s233_s11 = scalar_select %p232_p11, %s6420_s21, 1  ;;  %5580 = vmatpush3.bf16.msra.mxu1 %v5996_v0  ;;  %v6002_v7 = vld [vmem:[%s8847_s1 + $0x30] sm:$0xff]   ;;  %v6003_v8 = vld [vmem:[%s8847_s1 + $0x38] sm:$0xff]   ;;  %v6022_v26 = vld [vmem:[%s8849_s3 + $0x100] sm:$0xff]   ;;  %v6656_v55 = vshrl.u32 %v852_v51, 7 }
  0x19   : > { %5581 = vmatprep.subr.bf16.mxu1 %v5997_v1  ;;  %v6023_v27 = vld [vmem:[%s8849_s3 + $0xc0] sm:$0xff]   ;;  %v6024_v28 = vld [vmem:[%s8849_s3 + $0x108] sm:$0xff]   ;;  %v6026_v30 = vld [vmem:[%s8849_s3 + $0x110] sm:$0xff]   ;;  %s8642_s9 = scalar_lea.vmem [#allocation3], %s8622_s8  ;;  %s6354_s16 = sshll.u32 %s6433_s15, 4  ;;  %s6355_s16 = int_to_ptr.vmem [resolvable:$false] %s6354_s16 }
  0x1a   : > { %s5935_s14 = smul.u32 144, %s233_s11  ;;  %v6025_v29 = vld [vmem:[%s8849_s3 + $0xc8] sm:$0xff]   ;;  %v6027_v31 = vld [vmem:[%s8849_s3 + $0x140] sm:$0xff]   ;;  %v6028_v32 = vld [vmem:[%s8849_s3 + $0xd0] sm:$0xff]   ;;  %v6666_v62 = vadd.s32 16, %v6656_v55  ;;  %v6669_v63 = vadd.s32 24, %v6656_v55 }
  0x1b   : > { %5631 = vmatprep.subr.bf16.mxu0 %v6027_v31  ;;  %v6029_v33 = vld [vmem:[%s8849_s3 + $0x118] sm:$0xff]   ;;  %v6030_v34 = vld [vmem:[%s8849_s3 + $0x148] sm:$0xff]   ;;  %v6032_v36 = vld [vmem:[%s8849_s3 + $0x120] sm:$0xff]   ;;  %vm8879_vm0 = vcmp.lt.s32.totalorder %v6656_v55, 1  ;;  %vm8882_vm5 = vcmp.lt.s32.totalorder %v6656_v55, 7  ;;  %s4300_s10 = sshll.u32 %s8642_s9, 4  ;;  %s8794_s10 = int_to_ptr.vmem [resolvable:$true] %s4300_s10 }
  0x1c   : > { %s6535_s17 = scalar_lea.vmem %s8846_s0, %s5935_s14  ;;  %5582 = vmatpush3.bf16.msra.mxu1 %v5997_v1  ;;  %5632 = vmatpush3.bf16.msra.mxu0 %v6027_v31  ;;  %v6031_v35 = vld [vmem:[%s8849_s3 + $0xd8] sm:$0xff]   ;;  %v6033_v37 = vld [vmem:[%s8849_s3 + $0x150] sm:$0xff]   ;;  %v6034_v38 = vld [vmem:[%s8849_s3 + $0xe0] sm:$0xff]   ;;  %s6350_s14 = scalar_lea.vmem %s8794_s10, 2048 }
  0x1d   : > { %5583 = vmatprep.subr.bf16.mxu1 %v5998_v2  ;;  %v6004_v4 = vld [vmem:[%s6535_s17] sm:$0xff]   ;;  %v6005_v9 = vld [vmem:[%s6535_s17 + $0x8] sm:$0xff]   ;;  %v6006_v10 = vld [vmem:[%s6535_s17 + $0x10] sm:$0xff]   ;;  %5633 = vmatprep.subr.bf16.mxu0 %v6030_v34  ;;  %p6351_p12 = scmp.ne.s32.totalorder %s8794_s10, %s6350_s14  ;;  %s6356_s24 = scalar_lea.vmem %s6355_s16, 4096 }
  0x1e   : > { %5595 = vmatprep.mubr.bf16.mxu1 %v6004_v4  ;;  %v6007_v11 = vld [vmem:[%s6535_s17 + $0x18] sm:$0xff]   ;;  %v6008_v12 = vld [vmem:[%s6535_s17 + $0x20] sm:$0xff]   ;;  %v6009_v13 = vld [vmem:[%s6535_s17 + $0x28] sm:$0xff]   ;;  %p6357_p1 = scmp.lt.s32.totalorder %s8794_s10, %s6355_s16  ;;  %p6358_p2 = scmp.lt.s32.totalorder %s6356_s24, %s6350_s14 }
  0x1f   : > { %v6010_v14 = vld [vmem:[%s6535_s17 + $0x30] sm:$0xff]   ;;  %v6011_v15 = vld [vmem:[%s6535_s17 + $0x38] sm:$0xff]   ;;  %v6012_v16 = vld [vmem:[%s6535_s17 + $0x40] sm:$0xff]   ;;  %p6352_p13 = pnand %p6351_p12, %p6506_p4 }
  0x20   : > { %5584 = vmatpush3.bf16.msra.mxu1 %v5998_v2  ;;  %v6013_v17 = vld [vmem:[%s6535_s17 + $0x48] sm:$0xff]   ;;  %v6014_v18 = vld [vmem:[%s6535_s17 + $0x50] sm:$0xff]   ;;  %v6015_v19 = vld [vmem:[%s6535_s17 + $0x58] sm:$0xff]   ;;  %5634 = vmatpush3.bf16.msra.mxu0 %v6030_v34  ;;  %v6673_v2 = vadd.s32 32, %v6656_v55  ;;  %p6359_p3 = por %p6358_p2, %p6357_p1 }
  0x21   : > { %5585 = vmatprep.subr.bf16.mxu1 %v5999_v3  ;;  %v6016_v20 = vld [vmem:[%s6535_s17 + $0x60] sm:$0xff]   ;;  %v6017_v21 = vld [vmem:[%s6535_s17 + $0x68] sm:$0xff]   ;;  %v6018_v22 = vld [vmem:[%s6535_s17 + $0x70] sm:$0xff]   ;;  %5635 = vmatprep.subr.bf16.mxu0 %v6033_v37  ;;  %p6353_p0 = pneg %p6352_p13 }
  0x22   : > { %v6019_v23 = vld [vmem:[%s6535_s17 + $0x78] sm:$0xff]   ;;  %v6020_v24 = vld [vmem:[%s6535_s17 + $0x80] sm:$0xff]   ;;  %v6021_v25 = vld [vmem:[%s6535_s17 + $0x88] sm:$0xff]  }
  0x23   : > { %v6035_v39 = vld [vmem:[%s8849_s3 + $0x128] sm:$0xff]   ;;  %v6036_v40 = vld [vmem:[%s8849_s3 + $0x158] sm:$0xff]   ;;  %v6038_v42 = vld [vmem:[%s8849_s3 + $0x130] sm:$0xff]   ;;  %p6360_p5 = pnand %p6359_p3, %p6353_p0 }
  0x24   : > { %5586 = vmatpush3.bf16.msra.mxu1 %v5999_v3  ;;  %5636 = vmatpush3.bf16.msra.mxu0 %v6033_v37  ;;  %v6037_v41 = vld [vmem:[%s8849_s3 + $0xe8] sm:$0xff]   ;;  %v6039_v43 = vld [vmem:[%s8849_s3 + $0x160] sm:$0xff]   ;;  %v6040_v44 = vld [vmem:[%s8849_s3 + $0xf0] sm:$0xff]   ;;  %v6676_v3 = vadd.s32 40, %v6656_v55 }
  0x25   : > { %5587 = vmatprep.subr.bf16.mxu1 %v6000_v5  ;;  %5637 = vmatprep.subr.bf16.mxu0 %v6036_v40  ;;  %v6041_v45 = vld [vmem:[%s8849_s3 + $0x138] sm:$0xff]   ;;  %v6042_v46 = vld [vmem:[%s8849_s3 + $0x168] sm:$0xff]   ;;  %v6044_v48 = vld [vmem:[%s8849_s3 + $0x170] sm:$0xff]  }
  0x26   : > { %v6043_v47 = vld [vmem:[%s8849_s3 + $0xf8] sm:$0xff]   ;;  %v6645_v50 = vld [vmem:[%s8849_s3 + $0x80] sm:$0xff]  }
  0x27   : > { %v6045_v49 = vld [vmem:[%s8849_s3 + $0x178] sm:$0xff]   ;;  %v6651_v52 = vld [vmem:[%s8848_s2] ss:$0 sm:$0xff] }
  0x28   : > { %5588 = vmatpush3.bf16.msra.mxu1 %v6000_v5  ;;  %5638 = vmatpush3.bf16.msra.mxu0 %v6036_v40  ;;  %v6054_v53 = vld [vmem:[%s8849_s3 + $0x40] sm:$0xff]   ;;  %v6679_v5 = vadd.s32 56, %v6656_v55 }
  0x29   : > { %5589 = vmatprep.subr.bf16.mxu1 %v6001_v6  ;;  %5639 = vmatprep.subr.bf16.mxu0 %v6039_v43 }
  0x2c   : > { %5590 = vmatpush3.bf16.msra.mxu1 %v6001_v6  ;;  %5640 = vmatpush3.bf16.msra.mxu0 %v6039_v43  ;;  %v8852_v6 = vmov 0.0  }
  0x2d   : > { %5591 = vmatprep.subr.bf16.mxu1 %v6002_v7  ;;  %5641 = vmatprep.subr.bf16.mxu0 %v6042_v46 }
  0x30   : > { %5592 = vmatpush3.bf16.msra.mxu1 %v6002_v7  ;;  %5642 = vmatpush3.bf16.msra.mxu0 %v6042_v46  ;;  %v6682_v7 = vrot.slane %v8852_v6, 7 }
  0x31   : > { %5593 = vmatprep.subr.bf16.mxu1 %v6003_v8  ;;  %5643 = vmatprep.subr.bf16.mxu0 %v6044_v48 }
  0x32   : > { %8960 = vst [vmem:[#allocation6_spill] sm:$0xff] %v6682_v7 }
  0x34   : > { %5594 = vmatpush3.bf16.msra.mxu1 %v6003_v8  ;;  %5644 = vmatpush3.bf16.msra.mxu0 %v6044_v48  ;;  %v6740_v48 = vadd.s32 152, %v6656_v55 }
  0x35   : > { %5171 = vmatprep.subr.bf16.mxu1 %v6022_v26  ;;  %5645 = vmatprep.subr.bf16.mxu0 %v6045_v49 }
  0x37   : > { %5596 = vmatmul.mubr.bf16.vlgmr.msra.gmra.mrb[0].mxu1 %v6005_v9  ;;  %v1161_v9 = vand.u32 15, %v6666_v62 }
  0x38   : > { %5599 = vmatprep.mubr.bf16.mxu1 %v6006_v10  ;;  %5172 = vmatpush3.bf16.msra.mxu1 %v6023_v27  ;;  %v6716_v27 = vadd.s32 104, %v6656_v55 }
  0x39   : > { %5173 = vmatprep.subr.bf16.mxu1 %v6024_v28  ;;  %5646 = vmatpush3.bf16.msra.mxu0 %v6045_v49  ;;  %v6719_v28 = vadd.s32 120, %v6656_v55  ;;  %vm6805_vm1 = vcmp.ne.s32.totalorder %v1161_v9, 0 }
  0x3a   : > { %5679 = vmatprep.subr.bf16.mxu0 %v6645_v50  ;;  %vm6862_vm3 = vmpackc.low %vm8887_vm2, %vm6805_vm1 }
  0x3c   : > { %5174 = vmatpush3.bf16.msra.mxu1 %v6025_v29 }
  0x3d   : > { %5175 = vmatprep.subr.bf16.mxu1 %v6026_v30 }
  0x3f   : > { %5600 = vmatmul.mubr.bf16.gmra.mrb[4].mxu1 %v6007_v11 }
  0x40   : > { %5603 = vmatprep.mubr.bf16.mxu1 %v6008_v12  ;;  %5176 = vmatpush3.bf16.msra.mxu1 %v6028_v32  ;;  %v6724_v32 = vadd.s32 80, %v6656_v55 }
  0x41   : > { %5177 = vmatprep.subr.bf16.mxu1 %v6029_v33 }
  0x44   : > { %5178 = vmatpush3.bf16.msra.mxu1 %v6031_v35 }
  0x45   : > { %5179 = vmatprep.subr.bf16.mxu1 %v6032_v36 }
  0x47   : > { %5604 = vmatmul.mubr.bf16.gmra.mrb[8].mxu1 %v6009_v13 }
  0x48   : > { %5607 = vmatprep.mubr.bf16.mxu1 %v6010_v14  ;;  %5180 = vmatpush3.bf16.msra.mxu1 %v6034_v38  ;;  %v6691_v14 = vadd.s32 48, %v6656_v55 }
  0x49   : > { %5181 = vmatprep.subr.bf16.mxu1 %v6035_v39  ;;  %v6731_v39 = vadd.s32 136, %v6656_v55 }
  0x4c   : > { %5182 = vmatpush3.bf16.msra.mxu1 %v6037_v41 }
  0x4d   : > { %5183 = vmatprep.subr.bf16.mxu1 %v6038_v42 }
  0x4f   : > { %5608 = vmatmul.mubr.bf16.gmra.mrb[12].mxu1 %v6011_v15 }
  0x50   : > { %5611 = vmatprep.mubr.bf16.mxu1 %v6012_v16  ;;  %5184 = vmatpush3.bf16.msra.mxu1 %v6040_v44 }
  0x51   : > { %5185 = vmatprep.subr.bf16.mxu1 %v6041_v45 }
  0x54   : > { %5186 = vmatpush3.bf16.msra.mxu1 %v6043_v47 }
  0x55   : > { %5307 = vmatprep.subr.bf16.mxu1 %v6054_v53 }
  0x57   : > { %5612 = vmatmul.mubr.bf16.gmra.mrb[16].mxu1 %v6013_v17 }
  0x58   : > { %5615 = vmatprep.mubr.bf16.mxu1 %v6014_v18  ;;  %v6698_v18 = vadd.s32 72, %v6656_v55 }
  0x5f   : > { %5616 = vmatmul.mubr.bf16.gmra.mrb[20].mxu1 %v6015_v19  ;;  %v6701_v19 = vadd.s32 88, %v6656_v55 }
  0x60   : > { %5619 = vmatprep.mubr.bf16.mxu1 %v6016_v20 }
  0x67   : > { %5620 = vmatmul.mubr.bf16.gmra.mrb[24].mxu1 %v6017_v21 }
  0x68   : > { %5623 = vmatprep.mubr.bf16.mxu1 %v6018_v22 }
  0x6f   : > { %5624 = vmatmul.mubr.bf16.gmra.mrb[28].mxu1 %v6019_v23 }
  0x70   : > { %5627 = vmatprep.mubr.bf16.mxu1 %v6020_v24  ;;  %v6709_v24 = vadd.s32 64, %v6656_v55 }
  0x77   : > { %5628 = vmatmul.mubr.bf16.gmra.mrb[32].mxu1 %v6021_v25 }
 0x10a   : > { %v5597_v54 = vpop.f32.mrb[0].mxu1 }
 0x10b   : > { %v6659_v56 = vadd.f32 %v5597_v54, %v6651_v52  ;;  %v493_v57 = vpop.f32.mrb[1].mxu1  ;;  %v6746_v54 = vadd.s32 96, %v6656_v55 }
 0x10c   : > { %v5598_v58 = vpop.f32.mrb[2].mxu1 }
 0x10d   : > { %v638_v59 = vsub.f32 0.0, %v6659_v56  ;;  %v6663_v60 = vadd.f32 %v5598_v58, %v6651_v52  ;;  %v496_v61 = vpop.f32.mrb[3].mxu1 }
 0x10f   : > { %v676_v0 = vmul.f32 1.442695, %v638_v59  ;;  %v639_v1 = vsub.f32 0.0, %v6663_v60 }
 0x111   : > { %6094 = vpow2.f32 %v676_v0  ;;  %v678_v4 = vmul.f32 1.442695, %v639_v1  ;;  %v6754_v1 = vadd.s32 168, %v6656_v55 }
 0x112   : > { %v5601_v8 = vpop.f32.mrb[4].mxu1 }
 0x113   : > { %6096 = vpow2.f32 %v678_v4  ;;  %v6687_v11 = vadd.f32 %v5601_v8, %v6651_v52  ;;  %v509_v12 = vpop.f32.mrb[5].mxu1 }
 0x114   : > { %v6694_v15 = vadd.f32 %v6651_v52, %v509_v12  ;;  %v5602_v16 = vpop.f32.mrb[6].mxu1 }
 0x115   : > { %v642_v20 = vsub.f32 0.0, %v6687_v11  ;;  %v6705_v21 = vadd.f32 %v5602_v16, %v6651_v52  ;;  %v512_v22 = vpop.f32.mrb[7].mxu1 }
 0x116   : > { %v640_v25 = vsub.f32 0.0, %v6694_v15  ;;  %v6713_v26 = vadd.f32 %v6651_v52, %v512_v22 }
 0x117   : > { %v684_v29 = vmul.f32 1.442695, %v642_v20  ;;  %v643_v30 = vsub.f32 0.0, %v6705_v21 }
 0x118   : > { %v680_v33 = vmul.f32 1.442695, %v640_v25  ;;  %v641_v34 = vsub.f32 0.0, %v6713_v26  ;;  %v6763_v25 = vadd.s32 184, %v6656_v55 }
 0x119   : > { %6098 = vpow2.f32 %v684_v29  ;;  %v686_v37 = vmul.f32 1.442695, %v643_v30 }
 0x11a   : > { %6100 = vpow2.f32 %v680_v33  ;;  %v682_v40 = vmul.f32 1.442695, %v641_v34  ;;  %v5605_v41 = vpop.f32.mrb[8].mxu1  ;;  %8961 = vst [vmem:[#allocation7_spill] sm:$0xff] %v6763_v25  ;;  %v6796_v33 = vadd.s32 248, %v6656_v55 }
 0x11b   : > { %v6095_v44 = vpop.eup %6094  ;;  %6102 = vpow2.f32 %v686_v37  ;;  %v6736_v45 = vadd.f32 %v5605_v41, %v6651_v52  ;;  %v525_v46 = vpop.f32.mrb[9].mxu1 }
 0x11c   : > { %v746_v49 = vadd.f32 1.0, %v6095_v44  ;;  %6104 = vpow2.f32 %v682_v40  ;;  %v6743_v51 = vadd.f32 %v6651_v52, %v525_v46  ;;  %v5606_v53 = vpop.f32.mrb[10].mxu1  ;;  %v6769_v40 = vadd.s32 112, %v6656_v55  ;;  %8967 = vst [vmem:[#allocation13_spill] sm:$0xff] %v6796_v33 }
 0x11d   : > { %v6097_v57 = vpop.eup %6096  ;;  %v646_v58 = vsub.f32 0.0, %v6736_v45  ;;  %v6750_v59 = vadd.f32 %v5606_v53, %v6651_v52  ;;  %v528_v61 = vpop.f32.mrb[11].mxu1  ;;  %v6773_v46 = vadd.s32 200, %v6656_v55 }
 0x11e   : > { %6106 = vrcp.f32 %v746_v49  ;;  %v747_v4 = vadd.f32 1.0, %v6097_v57  ;;  %v644_v8 = vsub.f32 0.0, %v6743_v51  ;;  %v6758_v12 = vadd.f32 %v6651_v52, %v528_v61  ;;  %8962 = vst [vmem:[#allocation8_spill] sm:$0xff] %v6769_v40 }
 0x11f   : > { %v692_v16 = vmul.f32 1.442695, %v646_v58  ;;  %v647_v20 = vsub.f32 0.0, %v6750_v59  ;;  %8963 = vst [vmem:[#allocation9_spill] sm:$0xff] %v6773_v46  ;;  %v6776_v49 = vadd.s32 216, %v6656_v55  ;;  %v6083_v46 = vld [vmem:[%s8849_s3 + $0x38] sm:$0xff]  }
 0x120   : > { %6108 = vrcp.f32 %v747_v4  ;;  %v688_v29 = vmul.f32 1.442695, %v644_v8  ;;  %v645_v30 = vsub.f32 0.0, %v6758_v12  ;;  %v6783_v4 = vadd.s32 128, %v6656_v55 }
 0x121   : > { %6110 = vpow2.f32 %v692_v16  ;;  %v694_v34 = vmul.f32 1.442695, %v647_v20  ;;  %8964 = vst [vmem:[#allocation10_spill] sm:$0xff] %v6776_v49 }
 0x122   : > { %6112 = vpow2.f32 %v688_v29  ;;  %v690_v41 = vmul.f32 1.442695, %v645_v30  ;;  %v5609_v44 = vpop.f32.mrb[12].mxu1  ;;  %8965 = vst [vmem:[#allocation11_spill] sm:$0xff] %v6783_v4  ;;  %v6789_v30 = vadd.s32 232, %v6656_v55 }
 0x123   : > { %v6099_v53 = vpop.eup %6098  ;;  %6114 = vpow2.f32 %v694_v34  ;;  %v6779_v57 = vadd.f32 %v5609_v44, %v6651_v52  ;;  %v541_v58 = vpop.f32.mrb[13].mxu1 }
 0x124   : > { %v6101_v8 = vpop.eup %6100  ;;  %v750_v16 = vadd.f32 1.0, %v6099_v53  ;;  %6116 = vpow2.f32 %v690_v41  ;;  %v6786_v20 = vadd.f32 %v6651_v52, %v541_v58  ;;  %v5610_v29 = vpop.f32.mrb[14].mxu1  ;;  %8966 = vst [vmem:[#allocation12_spill] sm:$0xff] %v6789_v30 }
 0x125   : > { %v6103_v34 = vpop.eup %6102  ;;  %v748_v6 = vadd.f32 1.0, %v6101_v8  ;;  %v650_v44 = vsub.f32 0.0, %v6779_v57  ;;  %v6793_v37 = vadd.f32 %v5610_v29, %v6651_v52  ;;  %v544_v61 = vpop.f32.mrb[15].mxu1  ;;  %v6873_v29 = vadd.s32 264, %v6656_v55 }
 0x126   : > { %v6105_v53 = vpop.eup %6104  ;;  %6118 = vrcp.f32 %v750_v16  ;;  %v751_v41 = vadd.f32 1.0, %v6103_v34  ;;  %v648_v58 = vsub.f32 0.0, %v6786_v20  ;;  %v6800_v22 = vadd.f32 %v6651_v52, %v544_v61 }
 0x127   : > { %6120 = vrcp.f32 %v748_v6  ;;  %v749_v0 = vadd.f32 1.0, %v6105_v53  ;;  %v700_v8 = vmul.f32 1.442695, %v650_v44  ;;  %v651_v47 = vsub.f32 0.0, %v6793_v37  ;;  %8977 = vst [vmem:[#allocation19_spill] sm:$0xff] %v6873_v29 }
 0x128   : > { %v6107_v43 = vpop.eup %6106  ;;  %6122 = vrcp.f32 %v751_v41  ;;  %v696_v16 = vmul.f32 1.442695, %v648_v58  ;;  %v649_v34 = vsub.f32 0.0, %v6800_v22  ;;  %v6817_v41 = vadd.s32 144, %v6656_v55 }
 0x129   : > { %v6812_v61 = vmul.f32 %v6107_v43, %v6659_v56  ;;  %6124 = vrcp.f32 %v749_v0  ;;  %v702_v6 = vmul.f32 1.442695, %v651_v47 }
 0x12a   : > { %v6109_v53 = vpop.eup %6108  ;;  %6126 = vpow2.f32 %v700_v8  ;;  %v698_v62 = vmul.f32 1.442695, %v649_v34  ;;  %v5613_v9 = vpop.f32.mrb[16].mxu1  ;;  %8971 = vst [vmem:[#allocation15_spill] sm:$0xff] %v6817_v41 }
 0x12b   : > { %8970 = vst [vmem:[#allocation14_spill] sm:$0xff] %v6812_v61  ;;  %v6111_v58 = vpop.eup %6110  ;;  %v1613_v36 = vrot.slane %v6812_v61, 7  ;;  %v6821_v42 = vmul.f32 %v6109_v53, %v6663_v60  ;;  %6128 = vpow2.f32 %v696_v16  ;;  %v6824_v56 = vadd.f32 %v5613_v9, %v6651_v52  ;;  %v557_v43 = vpop.f32.mrb[17].mxu1 }
 0x12c   : > { %v6113_v47 = vpop.eup %6112  ;;  %v754_v0 = vadd.f32 1.0, %v6111_v58  ;;  %6130 = vpow2.f32 %v702_v6  ;;  %v6827_v8 = vadd.f32 %v6651_v52, %v557_v43  ;;  %v5614_v34 = vpop.f32.mrb[18].mxu1 }
 0x12d   : > { %v6115_v44 = vpop.eup %6114  ;;  %v1681_v60 = vsel %vm8879_vm0, %v6682_v7, %v1613_v36  ;;  %v8853_v16 = vrot.slane %v6821_v42, 7  ;;  %v752_v53 = vadd.f32 1.0, %v6113_v47  ;;  %6132 = vpow2.f32 %v698_v62  ;;  %v560_v9 = vpop.f32.mrb[19].mxu1 }
 0x12e   : > { %v6117_v35 = vpop.eup %6116  ;;  %6134 = vrcp.f32 %v754_v0  ;;  %v755_v58 = vadd.f32 1.0, %v6115_v44  ;;  %v654_v6 = vsub.f32 0.0, %v6824_v56  ;;  %v652_v43 = vsub.f32 0.0, %v6827_v8 }
 0x12f   : > { %v1680_v38 = vsel %vm8879_vm0, %v1613_v36, %v8853_v16  ;;  %6136 = vrcp.f32 %v752_v53  ;;  %v753_v31 = vadd.f32 1.0, %v6117_v35  ;;  %v6841_v23 = vadd.f32 %v5614_v34, %v6651_v52 }
 0x130   : > { %v6119_v47 = vpop.eup %6118  ;;  %v6843_v62 = vpack.c.bf16 %v1680_v38, %v1681_v60  ;;  %6138 = vrcp.f32 %v755_v58  ;;  %v708_v0 = vmul.f32 1.442695, %v654_v6  ;;  %v704_v44 = vmul.f32 1.442695, %v652_v43  ;;  %v6060_v6 = vld [vmem:[%s8849_s3 + $0x48] sm:$0xff]  }
 0x131   : > { %v6121_v17 = vpop.eup %6120  ;;  %v6846_v13 = vmul.f32 %v6119_v47, %v6687_v11  ;;  %6140 = vrcp.f32 %v753_v31  ;;  %v655_v10 = vsub.f32 0.0, %v6841_v23  ;;  %v6850_v36 = vadd.f32 %v6651_v52, %v560_v9 }
 0x132   : > { %8972 = vst [vmem:[#allocation16_spill] sm:$0xff] %v6843_v62  ;;  %v6123_v35 = vpop.eup %6122  ;;  %v6853_v34 = vmul.f32 %v6121_v17, %v6694_v15  ;;  %6142 = vpow2.f32 %v708_v0  ;;  %v6857_v38 = vpack.c.bf16 %v6821_v42, %v6812_v61  ;;  %v5617_v60 = vpop.f32.mrb[20].mxu1  ;;  %v8974_v11 = vmov 0  ;;  %v6055_v15 = vld [vmem:[%s8849_s3] sm:$0xff]  }
 0x133   : > { %v8975_v11 = vsel %vm6862_vm3, 4294967295, %v8974_v11  ;;  %v6125_v17 = vpop.eup %6124  ;;  %6144 = vpow2.f32 %v704_v44  ;;  %v573_v53 = vpop.f32.mrb[21].mxu1  ;;  %v710_v0 = vmul.f32 1.442695, %v655_v10  ;;  %v653_v31 = vsub.f32 0.0, %v6850_v36 }
 0x134   : > { %8973 = vst [vmem:[#allocation17_spill] sm:$0xff] %v6857_v38  ;;  %8976 = vst [vmem:[#allocation18_spill] sm:$0xff] %v8975_v11  ;;  %v6127_v43 = vpop.eup %6126  ;;  %2441 = vmatprep.mubr.bf16.mxu1 %v6857_v38  ;;  %v5618_v44 = vpop.f32.mrb[22].mxu1  ;;  %v6884_v7 = vmul.f32 %v6123_v35, %v6705_v21  ;;  %v6887_v41 = vadd.f32 %v5617_v60, %v6651_v52  ;;  %v6894_v16 = vmul.f32 %v6125_v17, %v6713_v26  ;;  %v6061_v60 = vld [vmem:[%s8849_s3 + $0x8] sm:$0xff]  }
 0x135   : > { %v6129_v9 = vpop.eup %6128  ;;  %v758_v29 = vadd.f32 1.0, %v6127_v43  ;;  %4859 = vmatmul.mubr.msk.bf16.vlgmr.msra.gmra.mrb[36].mxu1 %vm6862_vm3, %v6843_v62  ;;  %v576_v10 = vpop.f32.mrb[23].mxu1  ;;  %6146 = vpow2.f32 %v710_v0  ;;  %v8978_v21 = vand.u32 15, %v6669_v63  ;;  %v706_v38 = vmul.f32 1.442695, %v653_v31  ;;  %v6066_v63 = vld [vmem:[%s8849_s3 + $0x50] sm:$0xff]  }
 0x136   : > { %v6131_v47 = vpop.eup %6130  ;;  %v756_v33 = vadd.f32 1.0, %v6129_v9  ;;  %5308 = vmatpush3.bf16.msra.mxu1 %v6055_v15  ;;  %v658_v26 = vsub.f32 0.0, %v6887_v41  ;;  %v6911_v9 = vadd.f32 %v6651_v52, %v573_v53  ;;  %v6914_v0 = vadd.f32 %v5618_v44, %v6651_v52  ;;  %v6067_v44 = vld [vmem:[%s8849_s3 + $0x10] sm:$0xff]  }
 0x137   : > { %vm6898_vm4 = vcmp.ne.s32.totalorder %v8978_v21, 15  ;;  %v6133_v43 = vpop.eup %6132  ;;  %6148 = vrcp.f32 %v758_v29  ;;  %v759_v58 = vadd.f32 1.0, %v6131_v47  ;;  %5309 = vmatprep.subr.bf16.mxu1 %v6060_v6  ;;  %vm9106_vm3 = vcmp.lt.s32.totalorder %v6656_v55, 7 }
 0x138   : > { %v6135_v17 = vpop.eup %6134  ;;  %6150 = vrcp.f32 %v756_v33  ;;  %v757_v15 = vadd.f32 1.0, %v6133_v43  ;;  %v716_v6 = vmul.f32 1.442695, %v658_v26  ;;  %v656_v33 = vsub.f32 0.0, %v6911_v9  ;;  %vm6997_vm8 = vmpackc.low %vm6898_vm4, %vm8887_vm2 }
 0x139   : > { %v6137_v29 = vpop.eup %6136  ;;  %v6918_v47 = vmul.f32 %v6135_v17, %v6736_v45  ;;  %6152 = vrcp.f32 %v759_v58  ;;  %v659_v53 = vsub.f32 0.0, %v6914_v0  ;;  %v6070_v17 = vld [vmem:[%s8849_s3 + $0x58] sm:$0xff]   ;;  %v8981_v45 = vand.u32 15, %v6673_v2 }
 0x13a   : > { %v6139_v21 = vpop.eup %6138  ;;  %v6921_v11 = vmul.f32 %v6137_v29, %v6743_v51  ;;  %6154 = vrcp.f32 %v757_v15  ;;  %v5621_v43 = vpop.f32.mrb[24].mxu1  ;;  %5310 = vmatpush3.bf16.msra.mxu1 %v6061_v60  ;;  %v6931_v51 = vadd.f32 %v6651_v52, %v576_v10  ;;  %v712_v4 = vmul.f32 1.442695, %v656_v33 }
 0x13b   : > { %v6141_v31 = vpop.eup %6140  ;;  %6156 = vpow2.f32 %v706_v38  ;;  %v589_v26 = vpop.f32.mrb[25].mxu1  ;;  %5311 = vmatprep.subr.bf16.mxu1 %v6066_v63  ;;  %vm6941_vm6 = vcmp.ne.s32.totalorder %v8981_v45, 0  ;;  %v6949_v30 = vmul.f32 %v6139_v21, %v6750_v59  ;;  %v8984_v29 = vand.u32 15, %v6676_v3  ;;  %v6071_v59 = vld [vmem:[%s8849_s3 + $0x18] sm:$0xff]  }
 0x13c   : > { %v6143_v60 = vpop.eup %6142  ;;  %6158 = vpow2.f32 %v716_v6  ;;  %v6945_v10 = vpop.f32.mrb[26].mxu1  ;;  %v6961_v62 = vmul.f32 %v6141_v31, %v6758_v12  ;;  %v718_v58 = vmul.f32 1.442695, %v659_v53  ;;  %v657_v3 = vsub.f32 0.0, %v6931_v51  ;;  %v6073_v12 = vld [vmem:[%s8849_s3 + $0x60] sm:$0xff]   ;;  %vm7066_vm11 = vmpackc.low %vm8887_vm2, %vm6941_vm6  ;;  %v6047_v6 = vld [vmem:[%s8849_s3 + $0x88] sm:$0xff]  }
 0x13d   : > { %v6145_v63 = vpop.eup %6144  ;;  %v762_v15 = vadd.f32 1.0, %v6143_v60  ;;  %vm6953_vm7 = vcmp.ne.s32.totalorder %v8984_v29, 15  ;;  %v6957_v2 = vpop.f32.mrb[27].mxu1  ;;  %v6969_v21 = vpack.c.bf16 %v6894_v16, %v6853_v34  ;;  %v8864_v33 = vrot.slane %v6853_v34, 1 }
 0x13e   : > { %v760_v49 = vadd.f32 1.0, %v6145_v63  ;;  %5312 = vmatpush3.bf16.msra.mxu1 %v6067_v44  ;;  %v8988_v53 = vrot.slane %v6821_v42, 1  ;;  %v8989_v44 = vrot.slane %v6812_v61, 1  ;;  %v6985_v29 = vadd.f32 %v6651_v52, %v589_v26  ;;  %vm7091_vm12 = vmpackc.low %vm6953_vm7, %vm8887_vm2 }
 0x13f   : > { %6160 = vrcp.f32 %v762_v15  ;;  %8987 = vst [vmem:[#allocation20_spill] sm:$0xff] %v6969_v21  ;;  %5313 = vmatprep.subr.bf16.mxu1 %v6070_v17  ;;  %v6147_v31 = vpop.eup %6146  ;;  %v6982_v15 = vadd.f32 %v5621_v43, %v6651_v52  ;;  %v714_v45 = vmul.f32 1.442695, %v657_v3  ;;  %2449 = vmatprep.mubr.bf16.mxu1 %v6969_v21  ;;  %v8992_v43 = vmov 0 }
 0x140   : > { %6162 = vrcp.f32 %v760_v49  ;;  %v1897_v60 = vsel %vm8882_vm5, %v8989_v44, %v8988_v53  ;;  %v763_v63 = vadd.f32 1.0, %v6147_v31  ;;  %v8991_v49 = vmov %v8988_v53 }
 0x141   : > { %8990 = vst [vmem:[#allocation21_spill] sm:$0xff] %v6982_v15  ;;  %v6149_v17 = vpop.eup %6148  ;;  %6164 = vpow2.f32 %v712_v4  ;;  %v1896_v61 = vsel %vm8882_vm5, %v8991_v49, %v8864_v33  ;;  %v8993_v43 = vsel %vm6997_vm8, 4294967295, %v8992_v43  ;;  %v662_v31 = vsub.f32 0.0, %v6982_v15  ;;  %v6075_v49 = vld [vmem:[%s8849_s3 + $0x20] sm:$0xff]  }
 0x142   : > { %8994 = vst [vmem:[#allocation22_spill] sm:$0xff] %v8993_v43  ;;  %v6151_v26 = vpop.eup %6150  ;;  %v7002_v4 = vmul.f32 %v6149_v17, %v6779_v57  ;;  %6166 = vpow2.f32 %v718_v58  ;;  %v7004_v3 = vpack.c.bf16 %v1896_v61, %v1897_v60  ;;  %v8996_v53 = vand.u32 15, %v6679_v5  ;;  %v7013_v35 = vpop.f32.mrb[28].mxu1  ;;  %5314 = vmatpush3.bf16.msra.mxu1 %v6071_v59  ;;  %v6076_v59 = vld [vmem:[%s8849_s3 + $0x68] sm:$0xff]  }
 0x143   : > { %v6153_v57 = vpop.eup %6152  ;;  %v7019_v58 = vmul.f32 %v6151_v26, %v6786_v20  ;;  %6168 = vrcp.f32 %v763_v63  ;;  %v660_v61 = vsub.f32 0.0, %v6985_v29  ;;  %v8999_v5 = vrot.slane %v6894_v16, 7  ;;  %5315 = vmatprep.subr.bf16.mxu1 %v6073_v12 }
 0x144   : > { %8995 = vst [vmem:[#allocation23_spill] sm:$0xff] %v7004_v3  ;;  %vm7009_vm9 = vcmp.ne.s32.totalorder %v8996_v53, 15  ;;  %v9000_v60 = vrot.slane %v6853_v34, 7  ;;  %v7028_v53 = vpop.f32.mrb[29].mxu1  ;;  %v6155_v33 = vpop.eup %6154  ;;  %6170 = vpow2.f32 %v714_v45  ;;  %5647 = vmatprep.mubr.msk.bf16.mxu0 %vm6997_vm8, %v7004_v3  ;;  %v724_v40 = vmul.f32 1.442695, %v662_v31 }
 0x145   : > { %v7048_v45 = vmul.f32 %v6153_v57, %v6793_v37  ;;  %v720_v3 = vmul.f32 1.442695, %v660_v61  ;;  %v9001_v15 = vand.u32 15, %v6691_v14  ;;  %v6077_v31 = vld [vmem:[%s8849_s3 + $0x28] sm:$0xff]   ;;  %v7061_v26 = vmul.f32 %v6155_v33, %v6800_v22  ;;  %vm7166_vm14 = vmpackc.low %vm7009_vm9, %vm8887_vm2 }
 0x146   : > { %v1678_v17 = vsel %vm8879_vm0, %v9000_v60, %v8999_v5  ;;  %v7039_v5 = vpop.f32.mrb[30].mxu1  ;;  %v6157_v60 = vpop.eup %6156  ;;  %5316 = vmatpush3.bf16.msra.mxu1 %v6075_v49  ;;  %6172 = vpow2.f32 %v724_v40  ;;  %v9004_v14 = vmov 0  ;;  %v9008_v49 = vrot.slane %v6821_v42, 7 }
 0x147   : > { %v7044_v20 = vpop.f32.mrb[31].mxu1  ;;  %v6159_v63 = vpop.eup %6158  ;;  %v761_v43 = vadd.f32 1.0, %v6157_v60  ;;  %vm7052_vm10 = vcmp.ne.s32.totalorder %v9001_v15, 0  ;;  %v9005_v14 = vsel %vm7066_vm11, 4294967295, %v9004_v14  ;;  %5317 = vmatprep.subr.bf16.mxu1 %v6076_v59  ;;  %v9007_v15 = vrot.slane %v6853_v34, 7 }
 0x148   : > { %v766_v37 = vadd.f32 1.0, %v6159_v63  ;;  %9006 = vst [vmem:[#allocation24_spill] sm:$0xff] %v9005_v14  ;;  %v9009_v22 = vrot.slane %v6846_v13, 1  ;;  %v9010_v40 = vrot.slane %v6894_v16, 1  ;;  %v9012_v61 = vrot.slane %v6853_v34, 1  ;;  %vm7225_vm4 = vmpackc.low %vm8887_vm2, %vm7052_vm10 }
 0x149   : > { %6174 = vrcp.f32 %v761_v43  ;;  %v1679_v57 = vsel %vm8879_vm0, %v9008_v49, %v9007_v15  ;;  %v9013_v42 = vmov 0  ;;  %v9016_v59 = vand.u32 15, %v6698_v18  ;;  %v6161_v60 = vpop.eup %6160  ;;  %v6079_v18 = vld [vmem:[%s8849_s3 + $0x70] sm:$0xff]  }
 0x14a   : > { %v1894_v38 = vsel %vm8882_vm5, %v9010_v40, %v9009_v22  ;;  %v9011_v33 = vmov %v9010_v40  ;;  %v9014_v42 = vsel %vm7091_vm12, 4294967295, %v9013_v42  ;;  %6176 = vrcp.f32 %v766_v37  ;;  %v6163_v22 = vpop.eup %6162  ;;  %v5629_v37 = vpop.f32.mrb[32].mxu1  ;;  %5318 = vmatpush3.bf16.msra.mxu1 %v6077_v31 }
 0x14b   : > { %v1895_v43 = vsel %vm8882_vm5, %v9012_v61, %v9011_v33  ;;  %9015 = vst [vmem:[#allocation25_spill] sm:$0xff] %v9014_v42  ;;  %vm7097_vm13 = vcmp.ne.s32.totalorder %v9016_v59, 15  ;;  %v7101_v15 = vpack.c.bf16 %v1678_v17, %v1679_v57  ;;  %v7107_v49 = vadd.f32 %v6945_v10, %v6651_v52  ;;  %v6081_v57 = vld [vmem:[%s8849_s3 + $0x30] sm:$0xff]   ;;  %v6082_v37 = vld [vmem:[%s8849_s3 + $0x78] sm:$0xff]   ;;  %5319 = vmatprep.subr.bf16.mxu1 %v6079_v18 }
 0x14c   : > { %v7103_v34 = vpack.c.bf16 %v1894_v38, %v1895_v43  ;;  %v7116_v40 = vmul.f32 %v6161_v60, %v6824_v56  ;;  %6178 = vpow2.f32 %v720_v3  ;;  %v7120_v17 = vpack.c.bf16 %v6884_v7, %v6846_v13  ;;  %v6165_v38 = vpop.eup %6164  ;;  %v7149_v60 = vpop.f32.mrb[33].mxu1  ;;  %vm7256_vm7 = vmpackc.low %vm7097_vm13, %vm8887_vm2 }
 0x14d   : > { %9019 = vst [vmem:[#allocation26_spill] sm:$0xff] %v7101_v15  ;;  %v7124_v10 = vadd.f32 %v6651_v52, %v6957_v2  ;;  %4862 = vmatmul.mubr.msk.bf16.gmra.mrb[40].mxu1 %vm7066_vm11, %v7101_v15  ;;  %v663_v56 = vsub.f32 0.0, %v7107_v49  ;;  %v9021_v2 = vrot.slane %v6921_v11, 1  ;;  %v9022_v3 = vrot.slane %v6884_v7, 1  ;;  %v6167_v33 = vpop.eup %6166 }
 0x14e   : > { %9020 = vst [vmem:[#allocation27_spill] sm:$0xff] %v7120_v17  ;;  %5648 = vmatmul.mubr.msk.bf16.vlgmr.msra.gmra.mrb[0].mxu0 %vm7091_vm12, %v7103_v34  ;;  %v9024_v43 = vrot.slane %v6846_v13, 1  ;;  %v764_v12 = vadd.f32 1.0, %v6165_v38  ;;  %2457 = vmatprep.mubr.bf16.mxu1 %v7120_v17  ;;  %v7161_v14 = vmul.f32 %v6163_v22, %v6827_v8  ;;  %v767_v15 = vadd.f32 1.0, %v6167_v33  ;;  %v6048_v8 = vld [vmem:[%s8849_s3 + $0x90] sm:$0xff]  }
 0x14f   : > { %v1892_v31 = vsel %vm8882_vm5, %v9022_v3, %v9021_v2  ;;  %v9023_v61 = vmov %v9022_v3  ;;  %5680 = vmatpush3.bf16.msra.mxu0 %v6645_v50  ;;  %v661_v2 = vsub.f32 0.0, %v7124_v10  ;;  %v5630_v3 = vpop.f32.mrb[34].mxu1  ;;  %v726_v42 = vmul.f32 1.442695, %v663_v56  ;;  %5320 = vmatpush3.bf16.msra.mxu1 %v6081_v57 }
 0x150   : > { %v1893_v59 = vsel %vm8882_vm5, %v9024_v43, %v9023_v61  ;;  %v6169_v61 = vpop.eup %6168  ;;  %v1841_v43 = vrot.slane %v7061_v26, 1  ;;  %v9025_v38 = vmov 0  ;;  %5681 = vmatprep.subr.bf16.mxu0 %v6047_v6  ;;  %v9027_v50 = vand.u32 15, %v6701_v19  ;;  %v7179_v22 = vpop.f32.mrb[35].mxu1  ;;  %5321 = vmatprep.subr.bf16.mxu1 %v6082_v37 }
 0x151   : > { %v9026_v38 = vsel %vm7166_vm14, 4294967295, %v9025_v38  ;;  %v6171_v33 = vpop.eup %6170  ;;  %6180 = vrcp.f32 %v764_v12  ;;  %v722_v56 = vmul.f32 1.442695, %v661_v2  ;;  %v7182_v21 = vpack.c.bf16 %v1892_v31, %v1893_v59 }
 0x152   : > { %vm7172_vm15 = vcmp.ne.s32.totalorder %v9027_v50, 15  ;;  %v9030_v19 = vand.u32 15, %v6709_v24  ;;  %6182 = vrcp.f32 %v767_v15  ;;  %v765_v18 = vadd.f32 1.0, %v6171_v33 }
 0x153   : > { %v7195_v44 = vadd.f32 %v7013_v35, %v6651_v52  ;;  %v7199_v12 = vadd.f32 %v6651_v52, %v7028_v53  ;;  %v7203_v31 = vmul.f32 %v6169_v61, %v6841_v23  ;;  %6184 = vpow2.f32 %v726_v42  ;;  %5651 = vmatprep.mubr.msk.bf16.mxu0 %vm7166_vm14, %v7182_v21  ;;  %5682 = vmatpush3.bf16.msra.mxu0 %v6047_v6  ;;  %v6173_v53 = vpop.eup %6172  ;;  %v6049_v6 = vld [vmem:[%s8849_s3 + $0x98] sm:$0xff]   ;;  %vm7314_vm10 = vmpackc.low %vm7172_vm15, %vm8887_vm2 }
 0x154   : > { %vm7186_vm1 = vcmp.ne.s32.totalorder %v9030_v19, 0  ;;  %v9033_v15 = vrot.slane %v6884_v7, 7  ;;  %v9034_v35 = vrot.slane %v6846_v13, 7  ;;  %6186 = vrcp.f32 %v765_v18  ;;  %5683 = vmatprep.subr.bf16.mxu0 %v6048_v8  ;;  %v6175_v33 = vpop.eup %6174  ;;  %5322 = vmatpush3.bf16.msra.mxu1 %v6083_v46 }
 0x155   : > { %v666_v59 = vsub.f32 0.0, %v7195_v44  ;;  %v664_v23 = vsub.f32 0.0, %v7199_v12  ;;  %v9036_v37 = vrot.slane %v6894_v16, 7  ;;  %v9037_v61 = vmov 0  ;;  %vm7348_vm15 = vmpackc.low %vm8887_vm2, %vm7186_vm1 }
 0x156   : > { %v1676_v57 = vsel %vm8879_vm0, %v9034_v35, %v9033_v15  ;;  %v9035_v42 = vmov %v9034_v35  ;;  %v9038_v61 = vsel %vm7225_vm4, 4294967295, %v9037_v61  ;;  %v770_v19 = vadd.f32 1.0, %v6173_v53 }
 0x157   : > { %v1677_v2 = vsel %vm8879_vm0, %v9036_v37, %v9035_v42  ;;  %9039 = vst [vmem:[#allocation28_spill] sm:$0xff] %v9038_v61  ;;  %6188 = vpow2.f32 %v722_v56  ;;  %v9041_v16 = vrot.slane %v6918_v47, 1  ;;  %v9042_v18 = vrot.slane %v6961_v62, 1  ;;  %v6177_v42 = vpop.eup %6176  ;;  %5684 = vmatpush3.bf16.msra.mxu0 %v6048_v8 }
 0x158   : > { %v7232_v13 = vpack.c.bf16 %v1676_v57, %v1677_v2  ;;  %v9043_v15 = vand.u32 15, %v6716_v27  ;;  %v732_v56 = vmul.f32 1.442695, %v666_v59  ;;  %v728_v57 = vmul.f32 1.442695, %v664_v23  ;;  %v6179_v46 = vpop.eup %6178  ;;  %5685 = vmatprep.subr.bf16.mxu0 %v6049_v6 }
 0x159   : > { %v1890_v25 = vsel %vm8882_vm5, %v9042_v18, %v9041_v16  ;;  %v9046_v37 = vmov %v9042_v18  ;;  %v9047_v2 = vrot.slane %v6921_v11, 1  ;;  %v9048_v27 = vmov 0 }
 0x15a   : > { %9040 = vst [vmem:[#allocation29_spill] sm:$0xff] %v7232_v13  ;;  %vm7242_vm6 = vcmp.ne.s32.totalorder %v9043_v15, 15  ;;  %v9049_v27 = vsel %vm7256_vm7, 4294967295, %v9048_v27  ;;  %6190 = vrcp.f32 %v770_v19  ;;  %4865 = vmatmul.mubr.msk.bf16.gmra.mrb[44].mxu1 %vm7225_vm4, %v7232_v13  ;;  %v7268_v23 = vadd.f32 %v7039_v5, %v6651_v52  ;;  %v6050_v19 = vld [vmem:[%s8849_s3 + $0xa0] sm:$0xff]  }
 0x15b   : > { %v1891_v24 = vsel %vm8882_vm5, %v9047_v2, %v9046_v37  ;;  %v7272_v18 = vmul.f32 %v6175_v33, %v6850_v36  ;;  %v768_v15 = vadd.f32 1.0, %v6179_v46  ;;  %6192 = vpow2.f32 %v732_v56  ;;  %5686 = vmatpush3.bf16.msra.mxu0 %v6049_v6 }
 0x15c   : > { %v7264_v59 = vpack.c.bf16 %v1890_v25, %v1891_v24  ;;  %v7279_v25 = vmul.f32 %v6177_v42, %v6887_v41  ;;  %6194 = vpow2.f32 %v728_v57  ;;  %v667_v36 = vsub.f32 0.0, %v7268_v23  ;;  %v6181_v57 = vpop.eup %6180  ;;  %5687 = vmatprep.subr.bf16.mxu0 %v6050_v19 }
 0x15d   : > { %v9050_v5 = vand.u32 15, %v6719_v28  ;;  %6196 = vrcp.f32 %v768_v15  ;;  %v7293_v33 = vpack.c.bf16 %v6961_v62, %v6921_v11  ;;  %v7297_v41 = vadd.f32 %v6651_v52, %v7044_v20  ;;  %v6183_v3 = vpop.eup %6182 }
 0x15e   : > { %5652 = vmatmul.mubr.msk.bf16.gmra.mrb[4].mxu0 %vm7256_vm7, %v7264_v59  ;;  %v9054_v42 = vrot.slane %v7019_v58, 1  ;;  %v9055_v56 = vrot.slane %v6949_v30, 1  ;;  %v734_v37 = vmul.f32 1.442695, %v667_v36  ;;  %v9057_v46 = vmov %v9041_v16 }
 0x15f   : > { %vm7287_vm9 = vcmp.ne.s32.totalorder %v9050_v5, 15  ;;  %9053 = vst [vmem:[#allocation30_spill] sm:$0xff] %v7293_v33  ;;  %v9058_v20 = vmov 0  ;;  %v7320_v5 = vadd.f32 %v6651_v52, %v7149_v60  ;;  %v9060_v36 = vrot.slane %v6961_v62, 7  ;;  %2465 = vmatprep.mubr.bf16.mxu1 %v7293_v33  ;;  %5688 = vmatpush3.bf16.msra.mxu0 %v6050_v19  ;;  %v9151_v33 = vld [vmem:[#allocation9_spill] sm:$0xff] }
 0x160   : > { %v1888_v28 = vsel %vm8882_vm5, %v9055_v56, %v9054_v42  ;;  %v9056_v2 = vmov %v9055_v56  ;;  %v9059_v20 = vsel %vm7314_vm10, 4294967295, %v9058_v20  ;;  %v9061_v42 = vrot.slane %v6921_v11, 7 }
 0x161   : > { %v1889_v15 = vsel %vm8882_vm5, %v9057_v46, %v9056_v2  ;;  %v9062_v2 = vand.u32 15, %v6724_v32  ;;  %v665_v60 = vsub.f32 0.0, %v7297_v41  ;;  %v9067_v6 = vmov 0  ;;  %v6053_v46 = vld [vmem:[%s8849_s3 + $0xb8] sm:$0xff]  }
 0x162   : > { %v1674_v56 = vsel %vm8879_vm0, %v9061_v42, %v9060_v36  ;;  %v7337_v53 = vpack.c.bf16 %v1888_v28, %v1889_v15  ;;  %v9065_v24 = vmov %v9061_v42  ;;  %v9066_v36 = vrot.slane %v6884_v7, 7  ;;  %v6051_v28 = vld [vmem:[%s8849_s3 + $0xa8] sm:$0xff]   ;;  %v6185_v15 = vpop.eup %6184 }
 0x163   : > { %vm7330_vm13 = vcmp.ne.s32.totalorder %v9062_v2, 0  ;;  %v9068_v6 = vsel %vm7348_vm15, 4294967295, %v9067_v6  ;;  %v7356_v11 = vmul.f32 %v6181_v57, %v6911_v9  ;;  %6198 = vpow2.f32 %v734_v37  ;;  %v6187_v2 = vpop.eup %6186  ;;  %5689 = vmatprep.subr.bf16.mxu0 %v6051_v28 }
 0x164   : > { %v1675_v32 = vsel %vm8879_vm0, %v9066_v36, %v9065_v24  ;;  %9069 = vst [vmem:[#allocation31_spill] sm:$0xff] %v9068_v6  ;;  %v668_v7 = vsub.f32 0.0, %v7320_v5  ;;  %v9071_v50 = vand.u32 15, %v6731_v39  ;;  %v7369_v63 = vmul.f32 %v6183_v3, %v6914_v0  ;;  %5655 = vmatprep.mubr.msk.bf16.mxu0 %vm7314_vm10, %v7337_v53  ;;  %v6189_v37 = vpop.eup %6188  ;;  %5690 = vmatpush3.bf16.msra.mxu0 %v6051_v28  ;;  %v6056_v39 = vld [vmem:[%s8849_s3 + $0x1c0] sm:$0xff]  }
 0x165   : > { %v7359_v24 = vpack.c.bf16 %v1674_v56, %v1675_v32  ;;  %v771_v16 = vadd.f32 1.0, %v6185_v15  ;;  %v730_v9 = vmul.f32 1.442695, %v665_v60  ;;  %v9074_v57 = vand.u32 15, %v6740_v48  ;;  %v6191_v19 = vpop.eup %6190 }
 0x166   : > { %vm7363_vm1 = vcmp.ne.s32.totalorder %v9071_v50, 15  ;;  %v7383_v0 = vmul.f32 %v6187_v2, %v6931_v51  ;;  %v736_v3 = vmul.f32 1.442695, %v668_v7  ;;  %v769_v48 = vadd.f32 1.0, %v6189_v37  ;;  %v6193_v37 = vpop.eup %6192 }
 0x167   : > { %9070 = vst [vmem:[#allocation32_spill] sm:$0xff] %v7359_v24  ;;  %vm7376_vm0 = vcmp.ne.s32.totalorder %v9074_v57, 15  ;;  %4868 = vmatmul.mubr.msk.bf16.gmra.mrb[48].mxu1 %vm7348_vm15, %v7359_v24  ;;  %6200 = vrcp.f32 %v771_v16  ;;  %v9077_v60 = vrot.slane %v7002_v4, 1  ;;  %v9078_v51 = vrot.slane %v7019_v58, 1  ;;  %vm7403_vm15 = vmpackc.low %vm7242_vm6, %vm8887_vm2  ;;  %v6195_v56 = vpop.eup %6194 }
 0x168   : > { %v9079_v16 = vmov 0  ;;  %6202 = vpow2.f32 %v730_v9  ;;  %v774_v9 = vadd.f32 1.0, %v6193_v37  ;;  %v9085_v50 = vrot.slane %v7002_v4, 1  ;;  %v6197_v37 = vpop.eup %6196 }
 0x169   : > { %v1886_v15 = vsel %vm8882_vm5, %v1841_v43, %v9077_v60  ;;  %v1887_v7 = vsel %vm8882_vm5, %v9078_v51, %v1841_v43  ;;  %v9080_v16 = vsel %vm7403_vm15, 4294967295, %v9079_v16  ;;  %v6052_v43 = vld [vmem:[%s8849_s3 + $0xb0] sm:$0xff]   ;;  %6204 = vrcp.f32 %v769_v48 }
 0x16a   : > { %v7409_v57 = vpack.c.bf16 %v1886_v15, %v1887_v7  ;;  %v7417_v60 = vpack.c.bf16 %v6949_v30, %v6918_v47  ;;  %v7421_v51 = vadd.f32 %v6651_v52, %v7179_v22  ;;  %6206 = vpow2.f32 %v736_v3  ;;  %5691 = vmatprep.subr.bf16.mxu0 %v6052_v43 }
 0x16b   : > { %v9082_v15 = vrot.slane %v7161_v14, 1  ;;  %v9083_v7 = vrot.slane %v7048_v45, 1  ;;  %v9086_v22 = vand.u32 15, %v6746_v54  ;;  %v1851_v32 = vrot.slane %v7369_v63, 1  ;;  %5692 = vmatpush3.bf16.msra.mxu0 %v6052_v43 }
 0x16c   : > { %9081 = vst [vmem:[#allocation33_spill] sm:$0xff] %v7417_v60  ;;  %5656 = vmatmul.mubr.msk.bf16.gmra.mrb[8].mxu0 %vm7403_vm15, %v7409_v57  ;;  %v1849_v2 = vrot.slane %v7383_v0, 1  ;;  %v772_v36 = vadd.f32 1.0, %v6195_v56  ;;  %2473 = vmatprep.mubr.bf16.mxu1 %v7417_v60  ;;  %v7456_v54 = vmul.f32 %v6197_v37, %v6985_v29  ;;  %6208 = vrcp.f32 %v774_v9 }
 0x16d   : > { %v1884_v48 = vsel %vm8882_vm5, %v9083_v7, %v9082_v15  ;;  %v9084_v35 = vmov %v9083_v7  ;;  %vm7440_vm6 = vcmp.ne.s32.totalorder %v9086_v22, 0  ;;  %v669_v15 = vsub.f32 0.0, %v7421_v51  ;;  %5693 = vmatprep.subr.bf16.mxu0 %v6053_v46 }
 0x16e   : > { %v1885_v52 = vsel %vm8882_vm5, %v9085_v50, %v9084_v35  ;;  %vm7451_vm5 = vmpackc.low %vm7287_vm9, %vm8887_vm2  ;;  %v9089_v50 = vmov 0  ;;  %v9091_v56 = vrot.slane %v6949_v30, 7  ;;  %v9092_v7 = vrot.slane %v6918_v47, 7  ;;  %v9107_v47 = vld [vmem:[#allocation7_spill] sm:$0xff] }
 0x16f   : > { %v9090_v50 = vsel %vm7451_vm5, 4294967295, %v9089_v50  ;;  %v7458_v35 = vpack.c.bf16 %v1884_v48, %v1885_v52  ;;  %vm9093_vm4 = vcmp.lt.s32.totalorder %v6656_v55, 1  ;;  %v9094_v8 = vand.u32 15, %v6754_v1  ;;  %5694 = vmatpush3.bf16.msra.mxu0 %v6053_v46 }
 0x170   : > { %v1672_v22 = vsel %vm9093_vm4, %v9092_v7, %v9091_v56  ;;  %6210 = vrcp.f32 %v772_v36  ;;  %v738_v29 = vmul.f32 1.442695, %v669_v15  ;;  %v9097_v28 = vmov %v9092_v7  ;;  %vm9099_vm2 = vmmov %vm9093_vm4  ;;  %v6199_v56 = vpop.eup %6198  ;;  %v9111_v7 = vld [vmem:[#allocation21_spill] sm:$0xff]  ;;  %5443 = vmatprep.subr.bf16.mxu0 %v6056_v39  ;;  %v9161_v39 = vld [vmem:[#allocation10_spill] sm:$0xff] }
 0x171   : > { %vm7468_vm9 = vcmp.ne.s32.totalorder %v9094_v8, 15  ;;  %v9098_v9 = vrot.slane %v6961_v62, 7  ;;  %vm9100_vm11 = vmmov 1   ;;  %v9101_v52 = vmov 0  ;;  %5659 = vmatprep.mubr.msk.bf16.mxu0 %vm7451_vm5, %v7458_v35 }
 0x172   : > { %vm7481_vm4 = vmpackc.low %vm9100_vm11, %vm7330_vm13  ;;  %v9104_v1 = vrot.slane %v7116_v40, 1  ;;  %v9105_v37 = vrot.slane %v7272_v18, 1  ;;  %v9108_v15 = vand.u32 15, %v9107_v47  ;;  %v7501_v8 = vmul.f32 %v6191_v19, %v9111_v7 }
 0x173   : > { %v1673_v48 = vsel %vm9099_vm2, %v9098_v9, %v9097_v28  ;;  %v9102_v52 = vsel %vm7481_vm4, 4294967295, %v9101_v52  ;;  %vm9115_vm2 = vmmov %vm9106_vm3  ;;  %6212 = vpow2.f32 %v738_v29  ;;  %v9116_v19 = vmov 0 }
 0x174   : > { %9103 = vst [vmem:[#allocation34_spill] sm:$0xff] %v9102_v52  ;;  %v1882_v36 = vsel %vm9106_vm3, %v9105_v37, %v9104_v1  ;;  %vm7493_vm15 = vcmp.ne.s32.totalorder %v9108_v15, 15  ;;  %v7507_v9 = vpack.c.bf16 %v1672_v22, %v1673_v48  ;;  %v9113_v1 = vmov %v9105_v37  ;;  %vm7518_vm3 = vmpackc.low %vm7363_vm1, %vm9100_vm11 }
 0x175   : > { %v9114_v37 = vrot.slane %v7161_v14, 1  ;;  %v775_v15 = vadd.f32 1.0, %v6199_v56  ;;  %v9117_v19 = vsel %vm7518_vm3, 4294967295, %v9116_v19  ;;  %v7526_v22 = vpack.c.bf16 %v7061_v26, %v7019_v58  ;;  %vm9121_vm13 = vmmov %vm9115_vm2 }
 0x176   : > { %9112 = vst [vmem:[#allocation7_spill] sm:$0xff] %v7507_v9  ;;  %4871 = vmatmul.mubr.msk.bf16.gmra.mrb[52].mxu1 %vm7481_vm4, %v7507_v9  ;;  %v9119_v29 = vrot.slane %v7356_v11, 1  ;;  %v9120_v48 = vrot.slane %v7203_v31, 1  ;;  %vm9124_vm1 = vmmov %vm9115_vm2  ;;  %v9125_v43 = vmov 0  ;;  %v9131_v28 = vrot.slane %v6949_v30, 7 }
 0x177   : > { %v1883_v47 = vsel %vm9115_vm2, %v9114_v37, %v9113_v1  ;;  %9118 = vst [vmem:[#allocation21_spill] sm:$0xff] %v7526_v22  ;;  %vm7546_vm2 = vmpackc.low %vm7376_vm0, %vm9100_vm11  ;;  %v9127_v37 = vrot.slane %v7061_v26, 7  ;;  %6214 = vrcp.f32 %v775_v15  ;;  %2481 = vmatprep.mubr.bf16.mxu1 %v7526_v22  ;;  %vm9135_vm0 = vcmp.lt.s32.totalorder %v6656_v55, 7 }
 0x178   : > { %v7522_v7 = vpack.c.bf16 %v1882_v36, %v1883_v47  ;;  %v1880_v42 = vsel %vm9121_vm13, %v9120_v48, %v9119_v29  ;;  %v9122_v56 = vmov %v9120_v48  ;;  %v9123_v36 = vrot.slane %v7116_v40, 1 }
 0x179   : > { %v9126_v43 = vsel %vm7546_vm2, 4294967295, %v9125_v43  ;;  %v9128_v47 = vrot.slane %v7019_v58, 7  ;;  %vm9129_vm13 = vcmp.lt.s32.totalorder %v6656_v55, 1  ;;  %v9136_v15 = vrot.slane %v7356_v11, 1 }
 0x17a   : > { %v1881_v1 = vsel %vm9124_vm1, %v9123_v36, %v9122_v56  ;;  %vm9132_vm1 = vmmov %vm9129_vm13  ;;  %v6201_v36 = vpop.eup %6200  ;;  %5660 = vmatmul.mubr.msk.bf16.gmra.mrb[12].mxu0 %vm7518_vm3, %v7522_v7  ;;  %v1854_v6 = vrot.slane %v7501_v8, 1  ;;  %v9155_v46 = vmov 0  ;;  %vm9160_vm4 = vcmp.lt.s32.totalorder %v6656_v55, 1 }
 0x17b   : > { %v1670_v29 = vsel %vm9129_vm13, %v9128_v47, %v9127_v37  ;;  %v9130_v48 = vmov %v9128_v47  ;;  %v7566_v52 = vpack.c.bf16 %v1880_v42, %v1881_v1  ;;  %v9134_v37 = vrot.slane %v7279_v25, 1  ;;  %v6203_v58 = vpop.eup %6202  ;;  %vm9137_vm13 = vmmov %vm9135_vm0 }
 0x17c   : > { %v1671_v56 = vsel %vm9132_vm1, %v9131_v28, %v9130_v48  ;;  %v7575_v28 = vmul.f32 %v6201_v36, %v7107_v49  ;;  %v1879_v42 = vsel %vm9137_vm13, %v9136_v15, %v1849_v2  ;;  %v7586_v1 = vpack.c.bf16 %v7048_v45, %v7002_v4  ;;  %vm9140_vm1 = vmmov %vm9135_vm0  ;;  %v9141_v49 = vld [vmem:[#allocation8_spill] sm:$0xff]  ;;  %v6205_v36 = vpop.eup %6204 }
 0x17d   : > { %v7568_v9 = vpack.c.bf16 %v1670_v29, %v1671_v56  ;;  %v1878_v30 = vsel %vm9135_vm0, %v1849_v2, %v9134_v37  ;;  %v9139_v47 = vrot.slane %v7456_v54, 1  ;;  %v9142_v48 = vand.u32 15, %v9141_v49  ;;  %5663 = vmatprep.mubr.msk.bf16.mxu0 %vm7546_vm2, %v7566_v52  ;;  %vm9146_vm13 = vmmov %vm9140_vm1 }
 0x17e   : > { %9138 = vst [vmem:[#allocation36_spill] sm:$0xff] %v7586_v1  ;;  %v773_v37 = vadd.f32 1.0, %v6203_v58  ;;  %v7601_v2 = vpack.c.bf16 %v1878_v30, %v1879_v42  ;;  %v9145_v15 = vrot.slane %v7279_v25, 1  ;;  %v9148_v49 = vrot.slane %v7002_v4, 7  ;;  %v6207_v58 = vpop.eup %6206 }
 0x17f   : > { %9133 = vst [vmem:[#allocation35_spill] sm:$0xff] %v7568_v9  ;;  %v1876_v29 = vsel %vm9140_vm1, %v1851_v32, %v9139_v47  ;;  %vm7594_vm0 = vcmp.ne.s32.totalorder %v9142_v48, 0  ;;  %v9147_v47 = vrot.slane %v7048_v45, 7  ;;  %vm9149_vm1 = vcmp.lt.s32.totalorder %v6656_v55, 1 }
 0x180   : > { %v1877_v22 = vsel %vm9146_vm13, %v9145_v15, %v1851_v32  ;;  %v1855_v24 = vrot.slane %v7575_v28, 1  ;;  %v7616_v30 = vmul.f32 %v6205_v36, %v7124_v10  ;;  %v9152_v32 = vand.u32 15, %v9151_v33 }
 0x181   : > { %v1668_v48 = vsel %vm9149_vm1, %v9148_v49, %v9147_v47  ;;  %v7618_v42 = vpack.c.bf16 %v1876_v29, %v1877_v22  ;;  %6216 = vrcp.f32 %v773_v37  ;;  %v776_v47 = vadd.f32 1.0, %v6207_v58  ;;  %vm7629_vm1 = vmpackc.low %vm9100_vm11, %vm7440_vm6  ;;  %v6209_v37 = vpop.eup %6208 }
 0x182   : > { %vm7622_vm13 = vcmp.ne.s32.totalorder %v9152_v32, 15  ;;  %v9156_v46 = vsel %vm7629_vm1, 4294967295, %v9155_v46  ;;  %v9158_v10 = vmov %v9148_v49  ;;  %v9159_v22 = vrot.slane %v7061_v26, 7  ;;  %v6211_v32 = vpop.eup %6210  ;;  %4874 = vmatmul.mubr.msk.bf16.gmra.mrb[56].mxu1 %vm7629_vm1, %v7568_v9 }
 0x183   : > { %9150 = vst [vmem:[#allocation8_spill] sm:$0xff] %v7618_v42  ;;  %9157 = vst [vmem:[#allocation9_spill] sm:$0xff] %v9156_v46  ;;  %v7641_v29 = vpack.c.bf16 %v7272_v18, %v7161_v14  ;;  %v9162_v36 = vand.u32 15, %v9161_v39  ;;  %v1632_v49 = vrot.slane %v7383_v0, 7  ;;  %v1853_v4 = vrot.slane %v7616_v30, 1  ;;  %2489 = vmatprep.mubr.bf16.mxu1 %v7586_v1 }
 0x184   : > { %v1669_v33 = vsel %vm9160_vm4, %v9159_v22, %v9158_v10  ;;  %vm9165_vm6 = vcmp.lt.s32.totalorder %v6656_v55, 7  ;;  %v1637_v10 = vrot.slane %v7501_v8, 7  ;;  %6218 = vrcp.f32 %v776_v47  ;;  %vm7659_vm4 = vmpackc.low %vm7468_vm9, %vm9100_vm11 }
 0x185   : > { %vm7645_vm2 = vcmp.ne.s32.totalorder %v9162_v36, 15  ;;  %v7651_v58 = vpack.c.bf16 %v1668_v48, %v1669_v33  ;;  %v1873_v26 = vsel %vm9165_vm6, %v1854_v6, %v1855_v24  ;;  %v9166_v22 = vmov 0  ;;  %vm7684_vm9 = vmpackc.low %vm7493_vm15, %vm9100_vm11  ;;  %5664 = vmatmul.mubr.msk.bf16.gmra.mrb[16].mxu0 %vm7659_vm4, %v7601_v2 }
 0x186   : > { %v9167_v22 = vsel %vm7659_vm4, 4294967295, %v9166_v22  ;;  %v9168_v39 = vrot.slane %v7272_v18, 7  ;;  %v9169_v36 = vrot.slane %v7161_v14, 7  ;;  %vm9170_vm3 = vcmp.lt.s32.totalorder %v6656_v55, 1  ;;  %5667 = vmatprep.mubr.msk.bf16.mxu0 %vm7684_vm9, %v7618_v42 }
 0x187   : > { %v9172_v61 = vrot.slane %v7048_v45, 7  ;;  %vm9173_vm6 = vmmov %vm9170_vm3  ;;  %v7676_v60 = vmul.f32 %v6211_v32, %v7199_v12  ;;  %v9174_v13 = vmov 0  ;;  %v9178_v14 = vrot.slane %v7456_v54, 1  ;;  %v6213_v32 = vpop.eup %6212 }
 0x188   : > { %v1666_v48 = vsel %vm9170_vm3, %v9169_v36, %v9168_v39  ;;  %v9171_v33 = vmov %v9169_v36  ;;  %v9175_v13 = vsel %vm7684_vm9, 4294967295, %v9174_v13  ;;  %vm9177_vm3 = vcmp.lt.s32.totalorder %v6656_v55, 7  ;;  %v6215_v1 = vpop.eup %6214 }
 0x189   : > { %v1667_v47 = vsel %vm9173_vm6, %v9172_v61, %v9171_v33  ;;  %9176 = vst [vmem:[#allocation10_spill] sm:$0xff] %v9175_v13  ;;  %v1874_v45 = vsel %vm9177_vm3, %v1853_v4, %v1854_v6  ;;  %vm9179_vm6 = vmmov %vm9177_vm3  ;;  %v1635_v39 = vrot.slane %v7456_v54, 7  ;;  %v7698_v36 = vmul.f32 %v6209_v37, %v7195_v44  ;;  %v9226_v37 = vld [vmem:[#allocation15_spill] sm:$0xff] }
 0x18a   : > { %v1875_v12 = vsel %vm9179_vm6, %v9178_v14, %v1853_v4  ;;  %v7694_v61 = vpack.c.bf16 %v1666_v48, %v1667_v47  ;;  %v7705_v6 = vpack.c.bf16 %v7203_v31, %v7116_v40  ;;  %v1638_v33 = vrot.slane %v7575_v28, 7  ;;  %v9180_v47 = vld [vmem:[#allocation11_spill] sm:$0xff] }
 0x18b   : > { %v7701_v62 = vpack.c.bf16 %v1874_v45, %v1875_v12  ;;  %v1856_v4 = vrot.slane %v7676_v60, 1  ;;  %v777_v48 = vadd.f32 1.0, %v6213_v32  ;;  %v9181_v44 = vand.u32 15, %v9180_v47 }
 0x18c   : > { %v9184_v45 = vrot.slane %v7203_v31, 7  ;;  %v9185_v14 = vrot.slane %v7116_v40, 7  ;;  %vm9186_vm3 = vcmp.lt.s32.totalorder %v6656_v55, 1  ;;  %v1636_v32 = vrot.slane %v7616_v30, 7 }
 0x18d   : > { %vm7714_vm15 = vcmp.ne.s32.totalorder %v9181_v44, 0  ;;  %v9188_v44 = vrot.slane %v7272_v18, 7  ;;  %vm9189_vm6 = vmmov %vm9186_vm3  ;;  %v7736_v9 = vpack.c.bf16 %v7383_v0, %v7356_v11  ;;  %v7743_v17 = vmul.f32 %v6215_v1, %v7268_v23  ;;  %v9192_v18 = vld [vmem:[#allocation12_spill] sm:$0xff] }
 0x18e   : > { %v1664_v12 = vsel %vm9186_vm3, %v9185_v14, %v9184_v45  ;;  %v9187_v47 = vmov %v9185_v14  ;;  %v9190_v45 = vrot.slane %v7356_v11, 7  ;;  %6220 = vrcp.f32 %v777_v48  ;;  %v6217_v11 = vpop.eup %6216 }
 0x18f   : > { %v1665_v46 = vsel %vm9189_vm6, %v9188_v44, %v9187_v47  ;;  %vm9191_vm1 = vcmp.lt.s32.totalorder %v6656_v55, 7  ;;  %v9193_v13 = vand.u32 15, %v9192_v18  ;;  %v1858_v44 = vrot.slane %v7698_v36, 1  ;;  %vm7759_vm6 = vmpackc.low %vm9100_vm11, %vm7594_vm0  ;;  %v9234_v47 = vld [vmem:[#allocation19_spill] sm:$0xff] }
 0x190   : > { %v1662_v14 = vsel %vm9186_vm3, %v9190_v45, %v1632_v49  ;;  %v1872_v40 = vsel %vm9191_vm1, %v1855_v24, %v1856_v4  ;;  %v7753_v0 = vpack.c.bf16 %v1664_v12, %v1665_v46  ;;  %v9196_v23 = vmov 0  ;;  %v9198_v24 = vld [vmem:[#allocation13_spill] sm:$0xff]  ;;  %vm9206_vm0 = vmmov %vm9186_vm3  ;;  %4877 = vmatmul.mubr.msk.bf16.gmra.mrb[60].mxu1 %vm7759_vm6, %v7651_v58 }
 0x191   : > { %vm7749_vm9 = vcmp.ne.s32.totalorder %v9193_v13, 15  ;;  %v9197_v23 = vsel %vm7759_vm6, 4294967295, %v9196_v23  ;;  %v7763_v1 = vpack.c.bf16 %v1872_v40, %v1873_v26  ;;  %v9199_v48 = vand.u32 15, %v9198_v24  ;;  %vm9211_vm4 = vmmov %vm9206_vm0  ;;  %2497 = vmatprep.mubr.bf16.mxu1 %v7641_v29 }
 0x192   : > { %v9202_v46 = vmov %v9190_v45  ;;  %v9203_v12 = vrot.slane %v7203_v31, 7  ;;  %v7779_v45 = vpack.c.bf16 %v7369_v63, %v7279_v25  ;;  %v1639_v26 = vrot.slane %v7676_v60, 7  ;;  %vm9212_vm5 = vmmov %vm9206_vm0 }
 0x193   : > { %vm7767_vm1 = vcmp.ne.s32.totalorder %v9199_v48, 15  ;;  %v1859_v40 = vrot.slane %v7743_v17, 1  ;;  %v9204_v24 = vrot.slane %v7369_v63, 7  ;;  %v9205_v48 = vrot.slane %v7279_v25, 7  ;;  %vm9224_vm6 = vmmov %vm9206_vm0 }
 0x194   : > { %v1663_v56 = vsel %vm9186_vm3, %v9203_v12, %v9202_v46  ;;  %vm7794_vm3 = vmpackc.low %vm7622_vm13, %vm9100_vm11  ;;  %v9207_v46 = vmov 0  ;;  %v845_v42 = vmul.f32 %v6217_v11, %v7297_v41  ;;  %v9214_v25 = vmov 0 }
 0x195   : > { %v7783_v18 = vpack.c.bf16 %v1662_v14, %v1663_v56  ;;  %v1660_v31 = vsel %vm9206_vm0, %v9205_v48, %v9204_v24  ;;  %v9208_v46 = vsel %vm7794_vm3, 4294967295, %v9207_v46  ;;  %v9210_v12 = vmov %v9205_v48  ;;  %vm7819_vm13 = vmpackc.low %vm7645_vm2, %vm9100_vm11  ;;  %5668 = vmatmul.mubr.msk.bf16.gmra.mrb[20].mxu0 %vm7794_vm3, %v7701_v62 }
 0x196   : > { %9209 = vst [vmem:[#allocation11_spill] sm:$0xff] %v9208_v46  ;;  %v1661_v14 = vsel %vm9211_vm4, %v1632_v49, %v9210_v12  ;;  %v7804_v56 = vpack.c.bf16 %v7616_v30, %v7456_v54  ;;  %v1658_v24 = vsel %vm9212_vm5, %v1635_v39, %v1636_v32  ;;  %v9213_v48 = vrot.slane %v7369_v63, 7  ;;  %v6219_v49 = vpop.eup %6218  ;;  %vm9218_vm2 = vmmov %vm9206_vm0  ;;  %5671 = vmatprep.mubr.msk.bf16.mxu0 %vm7819_vm13, %v7763_v1  ;;  %v9275_v46 = vld [vmem:[#allocation17_spill] sm:$0xff] }
 0x197   : > { %v9215_v25 = vsel %vm7819_vm13, 4294967295, %v9214_v25  ;;  %vm9217_vm5 = vcmp.lt.s32.totalorder %v6656_v55, 7  ;;  %v7825_v63 = vpack.c.bf16 %v1660_v31, %v1661_v14  ;;  %v1642_v41 = vrot.slane %v7743_v17, 7  ;;  %vm9219_vm4 = vmmov %vm9206_vm0 }
 0x198   : > { %v1659_v15 = vsel %vm9206_vm0, %v9213_v48, %v1635_v39  ;;  %9216 = vst [vmem:[#allocation12_spill] sm:$0xff] %v9215_v25  ;;  %v1869_v54 = vsel %vm9217_vm5, %v1858_v44, %v1859_v40  ;;  %v7833_v39 = vpack.c.bf16 %v7575_v28, %v7501_v8  ;;  %v1656_v3 = vsel %vm9218_vm2, %v1637_v10, %v1638_v33  ;;  %vm9220_vm2 = vmmov %vm9217_vm5  ;;  %v9278_v25 = vld [vmem:[#allocation16_spill] sm:$0xff] }
 0x199   : > { %v7827_v30 = vpack.c.bf16 %v1658_v24, %v1659_v15  ;;  %v1657_v11 = vsel %vm9219_vm4, %v1636_v32, %v1637_v10  ;;  %v1640_v12 = vrot.slane %v845_v42, 7  ;;  %v1857_v31 = vrot.slane %v845_v42, 1  ;;  %vm7865_vm4 = vmpackc.low %vm9100_vm11, %vm7714_vm15 }
 0x19a   : > { %v848_v14 = vmul.f32 %v6219_v49, %v7320_v5  ;;  %v7843_v24 = vpack.c.bf16 %v1656_v3, %v1657_v11  ;;  %v1641_v48 = vrot.slane %v7698_v36, 7  ;;  %v7850_v8 = vpack.c.bf16 %v845_v42, %v7676_v60  ;;  %vm9227_vm15 = vmmov %vm9206_vm0  ;;  %4880 = vmatmul.mubr.msk.bf16.gmra.mrb[64].mxu1 %vm7865_vm4, %v7694_v61 }
 0x19b   : > { %v1655_v28 = vsel %vm9206_vm0, %v1638_v33, %v1639_v26  ;;  %v7856_v5 = vpack.c.bf16 %v7743_v17, %v7698_v36  ;;  %v1870_v15 = vsel %vm9217_vm5, %v1857_v31, %v1858_v44  ;;  %v1871_v49 = vsel %vm9220_vm2, %v1856_v4, %v1857_v31  ;;  %v6221_v44 = vpop.eup %6220  ;;  %vm9225_vm5 = vmmov %vm9220_vm2  ;;  %2505 = vmatprep.mubr.bf16.mxu1 %v7705_v6 }
 0x19c   : > { %v1643_v10 = vrot.slane %v848_v14, 7  ;;  %v1860_v32 = vrot.slane %v848_v14, 1  ;;  %v9221_v42 = vmov 0  ;;  %v7869_v60 = vpack.c.bf16 %v1870_v15, %v1871_v49  ;;  %vm7889_vm2 = vmpackc.low %vm7749_vm9, %vm9100_vm11 }
 0x19d   : > { %v9222_v42 = vsel %vm7865_vm4, 4294967295, %v9221_v42  ;;  %v854_v17 = vadd.s32 8, %v6656_v55  ;;  %v1654_v36 = vsel %vm9206_vm0, %v1639_v26, %v1640_v12  ;;  %v1652_v33 = vsel %vm9224_vm6, %v1641_v48, %v1642_v41  ;;  %vm7903_vm6 = vmpackc.low %vm7767_vm1, %vm9100_vm11 }
 0x19e   : > { %9223 = vst [vmem:[#allocation13_spill] sm:$0xff] %v7869_v60  ;;  %v1868_v4 = vsel %vm9225_vm5, %v1859_v40, %v1860_v32  ;;  %v1273_v3 = vand.u32 15, %v9226_v37  ;;  %v7879_v11 = vpack.c.bf16 %v1654_v36, %v1655_v28  ;;  %v1653_v31 = vsel %vm9227_vm15, %v1640_v12, %v1641_v48  ;;  %vm9237_vm9 = vmmov %vm9206_vm0  ;;  %5672 = vmatmul.mubr.msk.bf16.gmra.mrb[24].mxu0 %vm7889_vm2, %v7869_v60 }
 0x19f   : > { %v7884_v15 = vmul.f32 %v6221_v44, %v7421_v51  ;;  %v9228_v26 = vmov 0  ;;  %v7893_v49 = vpack.c.bf16 %v1868_v4, %v1869_v54  ;;  %v7895_v40 = vpack.c.bf16 %v1652_v33, %v1653_v31  ;;  %vm9238_vm0 = vmmov %vm9225_vm5 }
 0x1a0   : > { %v9229_v26 = vsel %vm7889_vm2, 4294967295, %v9228_v26  ;;  %v9231_v51 = vmov 0  ;;  %v1378_v12 = vand.u32 15, %v9234_v47  ;;  %v9235_v48 = vmov 0.0   ;;  %vm9239_vm5 = vmmov %vm9238_vm0  ;;  %v9244_v47 = vld [vmem:[#allocation14_spill] sm:$0xff] }
 0x1a1   : > { %9230 = vst [vmem:[#allocation15_spill] sm:$0xff] %v9229_v26  ;;  %v9232_v51 = vsel %vm7903_vm6, 4294967295, %v9231_v51  ;;  %v7909_v28 = vrot.slane %v9235_v48, 1  ;;  %v1651_v54 = vsel %vm9237_vm9, %v1642_v41, %v1643_v10  ;;  %v8944_v36 = vrot.slane %v7884_v15, 7  ;;  %5675 = vmatprep.mubr.msk.bf16.mxu0 %vm7903_vm6, %v7893_v49  ;;  %vm9240_vm15 = vmmov %vm9237_vm9  ;;  %v6087_v26 = vld [vmem:[%s8849_s3 + $0x208] sm:$0xff]  }
 0x1a2   : > { %9233 = vst [vmem:[#allocation37_spill] sm:$0xff] %v9232_v51  ;;  %v1861_v33 = vrot.slane %v7884_v15, 1  ;;  %v1154_v44 = vand.u32 15, %v854_v17  ;;  %v7917_v13 = vpack.c.bf16 %v7884_v15, %v848_v14  ;;  %vm1593_vm1 = vcmp.ne.s32.totalorder %v1273_v3, 0 }
 0x1a3   : > { %9236 = vst [vmem:[#allocation19_spill] sm:$0xff] %v7909_v28  ;;  %v873_v4 = vadd.s32 160, %v6656_v55  ;;  %v1650_v14 = vsel %vm9240_vm15, %v1643_v10, %v8944_v36  ;;  %vm1825_vm9 = vcmp.ne.s32.totalorder %v1378_v12, 15  ;;  %vm7940_vm4 = vmpackc.low %vm9100_vm11, %vm1593_vm1  ;;  %v9245_v48 = vrot.slane %v9244_v47, 1  ;;  %v6065_v47 = vld [vmem:[%s8849_s3 + $0x198] sm:$0xff]  }
 0x1a4   : > { %v1866_v41 = vsel %vm9238_vm0, %v1861_v33, %v7909_v28  ;;  %v1867_v17 = vsel %vm9239_vm5, %v1860_v32, %v1861_v33  ;;  %v7937_v3 = vpack.c.bf16 %v1650_v14, %v1651_v54  ;;  %vm1793_vm6 = vcmp.ne.s32.totalorder %v1154_v44, 15  ;;  %vm7950_vm5 = vmpackc.low %vm1825_vm9, %vm9100_vm11  ;;  %4883 = vmatmul.mubr.msk.bf16.gmra.mrb[68].mxu1 %vm7940_vm4, %v7753_v0  ;;  %v9251_v14 = vld [vmem:[#allocation23_spill] sm:$0xff] }
 0x1a5   : > { %v7935_v37 = vpack.c.bf16 %v1866_v41, %v1867_v17  ;;  %v1898_v32 = vsel %vm9238_vm0, %v7909_v28, %v9245_v48  ;;  %v1287_v33 = vand.u32 15, %v873_v4  ;;  %v9246_v10 = vmov 0  ;;  %vm5001_vm1 = vmpackc.low %vm1793_vm6, %vm9100_vm11  ;;  %2513 = vmatprep.mubr.bf16.mxu1 %v7736_v9  ;;  %v6057_v41 = vld [vmem:[%s8849_s3 + $0x180] sm:$0xff]   ;;  %v6058_v17 = vld [vmem:[%s8849_s3 + $0x1c8] sm:$0xff]  }
 0x1a6   : > { %v9247_v10 = vsel %vm7950_vm5, 4294967295, %v9246_v10  ;;  %v5002_v12 = vpack.c.bf16 %v1898_v32, %v7909_v28  ;;  %v875_v54 = vadd.s32 176, %v6656_v55  ;;  %v877_v48 = vadd.s32 192, %v6656_v55 }
 0x1a7   : > { %9241 = vst [vmem:[#allocation38_spill] sm:$0xff] %v7935_v37  ;;  %9248 = vst [vmem:[#allocation14_spill] sm:$0xff] %v9247_v10  ;;  %5676 = vmatmul.mubr.msk.bf16.gmra.mrb[28].mxu0 %vm7950_vm5, %v7935_v37  ;;  %vm1595_vm15 = vcmp.ne.s32.totalorder %v1287_v33, 0  ;;  %v6059_v33 = vld [vmem:[%s8849_s3 + $0x188] sm:$0xff]   ;;  %v8952_v10 = vmov 0.0|0.0   ;;  %v9303_v36 = vmov 0.0|0.0  }
 0x1a8   : > { %5695 = vmatprep.mubr.msk.bf16.mxu0 %vm5001_vm1, %v5002_v12  ;;  %vm7965_vm9 = vmpackc.low %vm9100_vm11, %vm1595_vm15  ;;  %v1301_v4 = vand.u32 15, %v875_v54  ;;  %v6062_v12 = vld [vmem:[%s8849_s3 + $0x1d0] sm:$0xff]  }
 0x1aa   : > { %vm1597_vm6 = vcmp.ne.s32.totalorder %v1301_v4, 0  ;;  %v1315_v4 = vand.u32 15, %v877_v48  ;;  %v6068_v48 = vld [vmem:[%s8849_s3 + $0x1e0] sm:$0xff]  }
 0x1ab   : > { %vm7993_vm0 = vmpackc.low %vm9100_vm11, %vm1597_vm6  ;;  %vm9258_vm6 = vnez %v9080_v16 }
 0x1ac   : > { %4886 = vmatmul.mubr.msk.bf16.gmra.mrb[72].mxu1 %vm7965_vm9, %v7783_v18 }
 0x1ad   : > { %2521 = vmatprep.mubr.bf16.mxu1 %v7779_v45 }
 0x1af   : > { %5696 = vmatmul.mubr.msk.bf16.vlgmr.msra.gmra.mrb[0].mxu0 %vm6997_vm8, %v9251_v14  ;;  %vm1599_vm8 = vcmp.ne.s32.totalorder %v1315_v4, 0  ;;  %v879_v14 = vadd.s32 208, %v6656_v55  ;;  %v6069_v4 = vld [vmem:[%s8849_s3 + $0x1a0] sm:$0xff]  }
 0x1b0   : > { %5444 = vmatpush3.bf16.msra.mxu0 %v6057_v41  ;;  %5699 = vmatprep.mubr.msk.bf16.mxu0 %vm7091_vm12, %v7103_v34  ;;  %v6063_v41 = vld [vmem:[%s8849_s3 + $0x190] sm:$0xff]   ;;  %vm8021_vm1 = vmpackc.low %vm9100_vm11, %vm1599_vm8 }
 0x1b1   : > { %5445 = vmatprep.subr.bf16.mxu0 %v6058_v17  ;;  %v6064_v17 = vld [vmem:[%s8849_s3 + $0x1d8] sm:$0xff]  }
 0x1b4   : > { %5446 = vmatpush3.bf16.msra.mxu0 %v6059_v33  ;;  %4889 = vmatmul.mubr.msk.bf16.gmra.mrb[76].mxu1 %vm7993_vm0, %v7825_v63 }
 0x1b5   : > { %5447 = vmatprep.subr.bf16.mxu0 %v6062_v12  ;;  %2529 = vmatprep.mubr.bf16.mxu1 %v7804_v56  ;;  %v1329_v12 = vand.u32 15, %v879_v14  ;;  %v6074_v14 = vld [vmem:[%s8849_s3 + $0x1a8] sm:$0xff]  }
 0x1b7   : > { %5700 = vmatmul.mubr.msk.bf16.gmra.mrb[4].mxu0 %vm7166_vm14, %v7182_v21  ;;  %vm1601_vm15 = vcmp.ne.s32.totalorder %v1329_v12, 0 }
 0x1b8   : > { %5703 = vmatprep.mubr.msk.bf16.mxu0 %vm7256_vm7, %v7264_v59  ;;  %5448 = vmatpush3.bf16.msra.mxu0 %v6063_v41  ;;  %v6072_v41 = vld [vmem:[%s8849_s3 + $0x1e8] sm:$0xff]   ;;  %vm8049_vm8 = vmpackc.low %vm9100_vm11, %vm1601_vm15  ;;  %vm9261_vm15 = vnez %v9090_v50 }
 0x1b9   : > { %5449 = vmatprep.subr.bf16.mxu0 %v6064_v17  ;;  %v881_v17 = vadd.s32 224, %v6656_v55 }
 0x1bb   : > { %v1343_v12 = vand.u32 15, %v881_v17  ;;  %v883_v17 = vadd.s32 240, %v6656_v55 }
 0x1bc   : > { %5450 = vmatpush3.bf16.msra.mxu0 %v6065_v47  ;;  %4892 = vmatmul.mubr.msk.bf16.gmra.mrb[80].mxu1 %vm8021_vm1, %v7827_v30  ;;  %v6078_v47 = vld [vmem:[%s8849_s3 + $0x1f0] sm:$0xff]  }
 0x1bd   : > { %5451 = vmatprep.subr.bf16.mxu0 %v6068_v48  ;;  %2537 = vmatprep.mubr.bf16.mxu1 %v7833_v39  ;;  %vm1603_vm5 = vcmp.ne.s32.totalorder %v1343_v12, 0  ;;  %v1357_v12 = vand.u32 15, %v883_v17  ;;  %v887_v48 = vadd.s32 272, %v6656_v55 }
 0x1bf   : > { %5704 = vmatmul.mubr.msk.bf16.gmra.mrb[8].mxu0 %vm7314_vm10, %v7337_v53  ;;  %vm8077_vm10 = vmpackc.low %vm9100_vm11, %vm1603_vm5  ;;  %vm9266_vm5 = vnez %v9167_v22 }
 0x1c0   : > { %5707 = vmatprep.mubr.msk.bf16.mxu0 %vm9258_vm6, %v7409_v57  ;;  %5452 = vmatpush3.bf16.msra.mxu0 %v6069_v4  ;;  %v6080_v4 = vld [vmem:[%s8849_s3 + $0x1b0] sm:$0xff]   ;;  %vm9262_vm6 = vnez %v9117_v19 }
 0x1c1   : > { %5453 = vmatprep.subr.bf16.mxu0 %v6072_v41  ;;  %v6084_v41 = vld [vmem:[%s8849_s3 + $0x1f8] sm:$0xff]  }
 0x1c4   : > { %5454 = vmatpush3.bf16.msra.mxu0 %v6074_v14  ;;  %4895 = vmatmul.mubr.msk.bf16.gmra.mrb[84].mxu1 %vm8049_vm8, %v7843_v24  ;;  %v6085_v14 = vld [vmem:[%s8849_s3 + $0x1b8] sm:$0xff]  }
 0x1c5   : > { %5455 = vmatprep.subr.bf16.mxu0 %v6078_v47  ;;  %2545 = vmatprep.mubr.bf16.mxu1 %v7850_v8  ;;  %v6086_v47 = vld [vmem:[%s8849_s3 + $0x200] sm:$0xff]  }
 0x1c7   : > { %5708 = vmatmul.mubr.msk.bf16.gmra.mrb[12].mxu0 %vm9261_vm15, %v7458_v35  ;;  %vm1605_vm15 = vcmp.ne.s32.totalorder %v1357_v12, 0  ;;  %v9270_v12 = vld [vmem:[#allocation10_spill] sm:$0xff] }
 0x1c8   : > { %5711 = vmatprep.mubr.msk.bf16.mxu0 %vm9262_vm6, %v7522_v7  ;;  %5456 = vmatpush3.bf16.msra.mxu0 %v6080_v4  ;;  %vm9265_vm6 = vnez %v9126_v43  ;;  %v885_v4 = vadd.s32 256, %v6656_v55  ;;  %vm8093_vm7 = vmpackc.low %vm9100_vm11, %vm1605_vm15 }
 0x1c9   : > { %5457 = vmatprep.subr.bf16.mxu0 %v6084_v41 }
 0x1ca   : > { %v1371_v17 = vand.u32 15, %v885_v4  ;;  %v1147_v4 = vand.u32 15, %v6656_v55 }
 0x1cc   : > { %5458 = vmatpush3.bf16.msra.mxu0 %v6085_v14  ;;  %4898 = vmatmul.mubr.msk.bf16.gmra.mrb[88].mxu1 %vm8077_vm10, %v7879_v11  ;;  %v9269_v14 = vld [vmem:[#allocation8_spill] sm:$0xff]  ;;  %vm1607_vm14 = vcmp.ne.s32.totalorder %v1371_v17, 0  ;;  %v9274_v17 = vld [vmem:[#allocation6_spill] sm:$0xff] }
 0x1cd   : > { %5727 = vmatprep.subr.bf16.mxu0 %v6086_v47  ;;  %2553 = vmatprep.mubr.bf16.mxu1 %v7856_v5  ;;  %vm8108_vm15 = vmpackc.low %vm9100_vm11, %vm1607_vm14  ;;  %v4954_v37 = vpack.c.bf16 %v9274_v17, %v9274_v17 }
 0x1cf   : > { %5712 = vmatmul.mubr.msk.bf16.gmra.mrb[16].mxu0 %vm9265_vm6, %v7566_v52  ;;  %vm9271_vm6 = vnez %v9270_v12 }
 0x1d0   : > { %5715 = vmatprep.mubr.msk.bf16.mxu0 %vm9266_vm5, %v7601_v2 }
 0x1d4   : > { %4901 = vmatmul.mubr.msk.bf16.gmra.mrb[92].mxu1 %vm8093_vm7, %v7895_v40 }
 0x1d5   : > { %2561 = vmatprep.mubr.bf16.mxu1 %v7917_v13 }
 0x1d7   : > { %5716 = vmatmul.mubr.msk.bf16.gmra.mrb[20].mxu0 %vm9271_vm6, %v9269_v14  ;;  %vm1575_vm6 = vcmp.ne.s32.totalorder %v1147_v4, 0  ;;  %v9279_v4 = vld [vmem:[#allocation18_spill] sm:$0xff] }
 0x1d8   : > { %5719 = vmatprep.mubr.msk.bf16.mxu0 %vm7794_vm3, %v7701_v62  ;;  %vm4953_vm14 = vmpackc.low %vm9100_vm11, %vm1575_vm6  ;;  %vm9276_vm3 = vnez %v9232_v51  ;;  %v6088_v51 = vld [vmem:[%s8849_s3 + $0x210] sm:$0xff]  }
 0x1dc   : > { %4904 = vmatmul.mubr.msk.bf16.gmra.mrb[96].mxu1 %vm8108_vm15, %v7937_v3 }
 0x1dd   : > { %2907 = vmatprep.mubr.bf16.mxu1 %v8952_v10  ;;  %v9277_v10 = vld [vmem:[#allocation20_spill] sm:$0xff] }
 0x1df   : > { %5720 = vmatmul.mubr.msk.bf16.gmra.mrb[24].mxu0 %vm7819_vm13, %v7763_v1  ;;  %vm9280_vm13 = vnez %v9279_v4  ;;  %v9288_v4 = vld [vmem:[#allocation30_spill] sm:$0xff] }
 0x1e0   : > { %5723 = vmatprep.mubr.msk.bf16.mxu0 %vm7889_vm2, %v7869_v60  ;;  %v9281_v60 = vld [vmem:[#allocation26_spill] sm:$0xff] }
 0x1e4   : > { %4955 = vmatmul.mubr.msk.bf16.vlgmr.msra.gmra.mrb[100].mxu1 %vm4953_vm14, %v4954_v37  ;;  %v9282_v37 = vld [vmem:[#allocation24_spill] sm:$0xff] }
 0x1e5   : > { %2915 = vmatprep.mubr.bf16.mxu1 %v9275_v46  ;;  %vm9283_vm6 = vnez %v9282_v37  ;;  %v9284_v46 = vld [vmem:[#allocation27_spill] sm:$0xff]  ;;  %v9289_v37 = vld [vmem:[#allocation32_spill] sm:$0xff] }
 0x1e7   : > { %5724 = vmatmul.mubr.msk.bf16.gmra.mrb[28].mxu0 %vm9276_vm3, %v7893_v49 }
 0x1e8   : > { %3470 = vmatprep.mubr.bf16.mxu0 %v9277_v10 }
 0x1ec   : > { %4958 = vmatmul.mubr.msk.bf16.gmra.mrb[104].mxu1 %vm9280_vm13, %v9278_v25  ;;  %v6089_v25 = vld [vmem:[%s8849_s3 + $0x218] sm:$0xff]  }
 0x1ed   : > { %2923 = vmatprep.mubr.bf16.mxu1 %v9277_v10  ;;  %v9285_v10 = vld [vmem:[#allocation29_spill] sm:$0xff] }
 0x1ef   : > { %5051 = vmatmul.mubr.msk.bf16.vlgmr.msra.gmra.mrb[32].mxu0 %vm9283_vm6, %v9281_v60 }
 0x1f0   : > { %5728 = vmatpush3.bf16.msra.mxu0 %v6086_v47  ;;  %3478 = vmatprep.mubr.bf16.mxu0 %v9284_v46  ;;  %v9286_v47 = vld [vmem:[#allocation28_spill] sm:$0xff] }
 0x1f1   : > { %5729 = vmatprep.subr.bf16.mxu0 %v6087_v26  ;;  %vm9287_vm13 = vnez %v9286_v47  ;;  %v9293_v47 = vld [vmem:[#allocation7_spill] sm:$0xff] }
 0x1f4   : > { %5730 = vmatpush3.bf16.msra.mxu0 %v6087_v26  ;;  %4961 = vmatmul.mubr.msk.bf16.gmra.mrb[108].mxu1 %vm9283_vm6, %v9281_v60  ;;  %v6090_v26 = vld [vmem:[%s8849_s3 + $0x220] sm:$0xff]   ;;  %v6091_v60 = vld [vmem:[%s8849_s3 + $0x228] sm:$0xff]  }
 0x1f5   : > { %5731 = vmatprep.subr.bf16.mxu0 %v6088_v51  ;;  %2931 = vmatprep.mubr.bf16.mxu1 %v9284_v46  ;;  %v9290_v46 = vld [vmem:[#allocation31_spill] sm:$0xff] }
 0x1f6   : > { %vm9291_vm14 = vnez %v9290_v46  ;;  %v9300_v46 = vld [vmem:[#allocation36_spill] sm:$0xff] }
 0x1f7   : > { %5054 = vmatmul.mubr.msk.bf16.gmra.mrb[36].mxu0 %vm9287_vm13, %v9285_v10 }
 0x1f8   : > { %3486 = vmatprep.mubr.bf16.mxu0 %v9288_v4  ;;  %5732 = vmatpush3.bf16.msra.mxu0 %v6088_v51  ;;  %v9292_v51 = vld [vmem:[#allocation33_spill] sm:$0xff] }
 0x1f9   : > { %5733 = vmatprep.subr.bf16.mxu0 %v6089_v25 }
 0x1fc   : > { %5734 = vmatpush3.bf16.msra.mxu0 %v6089_v25  ;;  %4964 = vmatmul.mubr.msk.bf16.gmra.mrb[112].mxu1 %vm9287_vm13, %v9285_v10  ;;  %v6092_v25 = vld [vmem:[%s8849_s3 + $0x230] sm:$0xff]   ;;  %v6093_v10 = vld [vmem:[%s8849_s3 + $0x238] sm:$0xff]  }
 0x1fd   : > { %5735 = vmatprep.subr.bf16.mxu0 %v6090_v26  ;;  %2939 = vmatprep.mubr.bf16.mxu1 %v9288_v4  ;;  %v9294_v4 = vld [vmem:[#allocation34_spill] sm:$0xff] }
 0x1fe   : > { %vm9295_vm6 = vnez %v9294_v4 }
 0x1ff   : > { %5057 = vmatmul.mubr.msk.bf16.gmra.mrb[40].mxu0 %vm9291_vm14, %v9289_v37 }
 0x200   : > { %3494 = vmatprep.mubr.bf16.mxu0 %v9292_v51  ;;  %5736 = vmatpush3.bf16.msra.mxu0 %v6090_v26  ;;  %v9296_v26 = vld [vmem:[#allocation21_spill] sm:$0xff] }
 0x201   : > { %5737 = vmatprep.subr.bf16.mxu0 %v6091_v60 }
 0x204   : > { %5738 = vmatpush3.bf16.msra.mxu0 %v6091_v60  ;;  %4967 = vmatmul.mubr.msk.bf16.gmra.mrb[116].mxu1 %vm9291_vm14, %v9289_v37  ;;  %v9297_v60 = vld [vmem:[#allocation35_spill] sm:$0xff]  ;;  %v9298_v37 = vld [vmem:[#allocation9_spill] sm:$0xff]  ;;  %vm9301_vm14 = vnez %v9197_v23 }
 0x205   : > { %5739 = vmatprep.subr.bf16.mxu0 %v6092_v25  ;;  %2947 = vmatprep.mubr.bf16.mxu1 %v9292_v51  ;;  %vm9299_vm13 = vnez %v9298_v37 }
 0x207   : > { %5060 = vmatmul.mubr.msk.bf16.gmra.mrb[44].mxu0 %vm9295_vm6, %v9293_v47 }
 0x208   : > { %3502 = vmatprep.mubr.bf16.mxu0 %v9296_v26  ;;  %5740 = vmatpush3.bf16.msra.mxu0 %v6092_v25  ;;  %v5187_v23 = vpop.f32.mrb[36].mxu1 }
 0x209   : > { %5741 = vmatprep.subr.bf16.mxu0 %v6093_v10 }
 0x20c   : > { %5742 = vmatpush3.bf16.msra.mxu0 %v6093_v10  ;;  %4970 = vmatmul.mubr.msk.bf16.gmra.mrb[120].mxu1 %vm9295_vm6, %v9293_v47  ;;  %vm9302_vm6 = vnez %v9222_v42 }
 0x20d   : > { %2955 = vmatprep.mubr.bf16.mxu1 %v9296_v26 }
 0x20f   : > { %5063 = vmatmul.mubr.msk.bf16.gmra.mrb[48].mxu0 %vm9299_vm13, %v9297_v60 }
 0x210   : > { %3510 = vmatprep.mubr.bf16.mxu0 %v9300_v46 }
 0x214   : > { %4973 = vmatmul.mubr.msk.bf16.gmra.mrb[124].mxu1 %vm9299_vm13, %v9297_v60  ;;  %vm9312_vm13 = vnez %v9126_v43 }
 0x215   : > { %2963 = vmatprep.mubr.bf16.mxu1 %v9300_v46 }
 0x217   : > { %5066 = vmatmul.mubr.msk.bf16.gmra.mrb[52].mxu0 %vm9301_vm14, %v7651_v58 }
 0x218   : > { %3518 = vmatprep.mubr.bf16.mxu0 %v7641_v29 }
 0x21c   : > { %4976 = vmatmul.mubr.msk.bf16.gmra.mrb[128].mxu1 %vm9301_vm14, %v7651_v58  ;;  %vm9313_vm14 = vnez %v9270_v12 }
 0x21d   : > { %2971 = vmatprep.mubr.bf16.mxu1 %v7641_v29  ;;  %v5188_v29 = vpop.f32.mrb[37].mxu1 }
 0x21e   : > { %v8216_v58 = vadd.f32 %v5188_v29, %v5187_v23  ;;  %v5190_v51 = vpop.f32.mrb[38].mxu1 }
 0x21f   : > { %5069 = vmatmul.mubr.msk.bf16.gmra.mrb[56].mxu0 %vm9302_vm6, %v7694_v61  ;;  %v5191_v25 = vpop.f32.mrb[39].mxu1 }
 0x220   : > { %3526 = vmatprep.mubr.bf16.mxu0 %v7705_v6  ;;  %v8218_v10 = vadd.f32 %v5191_v25, %v5190_v51  ;;  %v9304_v25 = vrot.slane %v7884_v15, 7 }
 0x224   : > { %4979 = vmatmul.mubr.msk.bf16.gmra.mrb[132].mxu1 %vm9302_vm6, %v7694_v61 }
 0x225   : > { %2979 = vmatprep.mubr.bf16.mxu1 %v7705_v6 }
 0x227   : > { %5072 = vmatmul.mubr.msk.bf16.gmra.mrb[60].mxu0 %vm7940_vm4, %v7753_v0 }
 0x228   : > { %3534 = vmatprep.mubr.bf16.mxu0 %v7736_v9 }
 0x22c   : > { %4982 = vmatmul.mubr.msk.bf16.gmra.mrb[136].mxu1 %vm7940_vm4, %v7753_v0  ;;  %vm9305_vm4 = vcmp.lt.s32.totalorder %v6656_v55, 1 }
 0x22d   : > { %2987 = vmatprep.mubr.bf16.mxu1 %v7736_v9  ;;  %v5193_v9 = vpop.f32.mrb[40].mxu1  ;;  %v1649_v41 = vsel %vm9305_vm4, %v9304_v25, %v9274_v17 }
 0x22e   : > { %v5194_v61 = vpop.f32.mrb[41].mxu1  ;;  %v5095_v28 = vpack.c.bf16 %v9274_v17, %v1649_v41 }
 0x22f   : > { %5075 = vmatmul.mubr.msk.bf16.gmra.mrb[64].mxu0 %vm7965_vm9, %v7783_v18  ;;  %v8243_v6 = vadd.f32 %v5194_v61, %v5193_v9  ;;  %v5196_v0 = vpop.f32.mrb[42].mxu1 }
 0x230   : > { %3542 = vmatprep.mubr.bf16.mxu0 %v7779_v45 }
 0x234   : > { %4985 = vmatmul.mubr.msk.bf16.gmra.mrb[140].mxu1 %vm7965_vm9, %v7783_v18  ;;  %vm9306_vm9 = vnez %v9026_v38 }
 0x235   : > { %2995 = vmatprep.mubr.bf16.mxu1 %v7779_v45  ;;  %v5197_v45 = vpop.f32.mrb[43].mxu1 }
 0x236   : > { %v8246_v18 = vadd.f32 %v5197_v45, %v5196_v0 }
 0x237   : > { %5078 = vmatmul.mubr.msk.bf16.gmra.mrb[68].mxu0 %vm7993_vm0, %v7825_v63 }
 0x238   : > { %3550 = vmatprep.mubr.bf16.mxu0 %v7804_v56 }
 0x23c   : > { %4988 = vmatmul.mubr.msk.bf16.gmra.mrb[144].mxu1 %vm7993_vm0, %v7825_v63  ;;  %vm9307_vm0 = vnez %v9049_v27 }
 0x23d   : > { %3003 = vmatprep.mubr.bf16.mxu1 %v7804_v56  ;;  %v5199_v56 = vpop.f32.mrb[44].mxu1 }
 0x23e   : > { %v5200_v63 = vpop.f32.mrb[45].mxu1 }
 0x23f   : > { %5081 = vmatmul.mubr.msk.bf16.gmra.mrb[72].mxu0 %vm8021_vm1, %v7827_v30  ;;  %v8256_v42 = vadd.f32 %v5200_v63, %v5199_v56  ;;  %v5202_v31 = vpop.f32.mrb[46].mxu1 }
 0x240   : > { %3558 = vmatprep.mubr.bf16.mxu0 %v7833_v39  ;;  %v5203_v44 = vpop.f32.mrb[47].mxu1 }
 0x241   : > { %v8258_v54 = vadd.f32 %v5203_v44, %v5202_v31 }
 0x244   : > { %4991 = vmatmul.mubr.msk.bf16.gmra.mrb[148].mxu1 %vm8021_vm1, %v7827_v30  ;;  %v5205_v30 = vpop.f32.mrb[48].mxu1  ;;  %vm9309_vm1 = vnez %v9080_v16 }
 0x245   : > { %3011 = vmatprep.mubr.bf16.mxu1 %v7833_v39  ;;  %v5206_v39 = vpop.f32.mrb[49].mxu1 }
 0x246   : > { %v8268_v33 = vadd.f32 %v5206_v39, %v5205_v30  ;;  %v5208_v47 = vpop.f32.mrb[50].mxu1 }
 0x247   : > { %5084 = vmatmul.mubr.msk.bf16.gmra.mrb[76].mxu0 %vm8049_vm8, %v7843_v24  ;;  %v5209_v4 = vpop.f32.mrb[51].mxu1 }
 0x248   : > { %3566 = vmatprep.mubr.bf16.mxu0 %v7850_v8  ;;  %v8270_v26 = vadd.f32 %v5209_v4, %v5208_v47 }
 0x24c   : > { %4994 = vmatmul.mubr.msk.bf16.gmra.mrb[152].mxu1 %vm8049_vm8, %v7843_v24  ;;  %v5211_v24 = vpop.f32.mrb[52].mxu1  ;;  %vm9310_vm8 = vnez %v9090_v50 }
 0x24d   : > { %3019 = vmatprep.mubr.bf16.mxu1 %v7850_v8  ;;  %v5212_v8 = vpop.f32.mrb[53].mxu1 }
 0x24e   : > { %v8281_v60 = vadd.f32 %v5212_v8, %v5211_v24  ;;  %v5214_v37 = vpop.f32.mrb[54].mxu1 }
 0x24f   : > { %5087 = vmatmul.mubr.msk.bf16.gmra.mrb[80].mxu0 %vm8077_vm10, %v7879_v11  ;;  %v5215_v46 = vpop.f32.mrb[55].mxu1 }
 0x250   : > { %3574 = vmatprep.mubr.bf16.mxu0 %v7856_v5  ;;  %v8283_v23 = vadd.f32 %v5215_v46, %v5214_v37 }
 0x254   : > { %4997 = vmatmul.mubr.msk.bf16.gmra.mrb[156].mxu1 %vm8077_vm10, %v7879_v11 }
 0x255   : > { %3027 = vmatprep.mubr.bf16.mxu1 %v7856_v5  ;;  %v1385_v5 = vand.u32 15, %v887_v48  ;;  %v5217_v11 = vpop.f32.mrb[56].mxu1  ;;  %v9314_v48 = vld [vmem:[#allocation11_spill] sm:$0xff] }
 0x256   : > { %vm9315_vm6 = vnez %v9314_v48 }
 0x257   : > { %5090 = vmatmul.mubr.msk.bf16.gmra.mrb[84].mxu0 %vm8093_vm7, %v7895_v40  ;;  %vm1609_vm10 = vcmp.ne.s32.totalorder %v1385_v5, 0  ;;  %v9316_v5 = vld [vmem:[#allocation12_spill] sm:$0xff] }
 0x258   : > { %3582 = vmatprep.mubr.bf16.mxu0 %v7917_v13  ;;  %v5218_v13 = vpop.f32.mrb[57].mxu1 }
 0x259   : > { %v8292_v29 = vadd.f32 %v5218_v13, %v5217_v11  ;;  %v5220_v51 = vpop.f32.mrb[58].mxu1  ;;  %v9318_v11 = vld [vmem:[#allocation13_spill] sm:$0xff] }
 0x25c   : > { %5000 = vmatmul.mubr.msk.bf16.gmra.mrb[160].mxu1 %vm8093_vm7, %v7895_v40  ;;  %v5221_v40 = vpop.f32.mrb[59].mxu1  ;;  %vm5094_vm7 = vmpackc.low %vm9100_vm11, %vm1609_vm10 }
 0x25d   : > { %v8299_v9 = vadd.f32 %v5221_v40, %v5220_v51 }
 0x25f   : > { %5093 = vmatmul.mubr.msk.bf16.gmra.mrb[88].mxu0 %vm8108_vm15, %v7937_v3  ;;  %vm9311_vm15 = vnez %v9117_v19 }
 0x260   : > { %3590 = vmatprep.mubr.bf16.mxu0 %v9303_v36 }
 0x263   : > { %v5223_v3 = vpop.f32.mrb[60].mxu1 }
 0x264   : > { %v5224_v61 = vpop.f32.mrb[61].mxu1 }
 0x265   : > { %v8306_v0 = vadd.f32 %v5224_v61, %v5223_v3  ;;  %v5226_v15 = vpop.f32.mrb[62].mxu1  ;;  %v9322_v3 = vld [vmem:[#allocation14_spill] sm:$0xff] }
 0x266   : > { %v5227_v45 = vpop.f32.mrb[63].mxu1  ;;  %vm9323_vm10 = vnez %v9322_v3 }
 0x267   : > { %5096 = vmatmul.mubr.msk.bf16.gmra.mrb[92].mxu0 %vm5094_vm7, %v5095_v28  ;;  %v8308_v56 = vadd.f32 %v5227_v45, %v5226_v15 }
 0x268   : > { %5743 = vmatprep.mubr.msk.bf16.mxu0 %vm7091_vm12, %v7103_v34  ;;  %vm9308_vm12 = vnez %v9059_v20 }
 0x26d   : > { %v5229_v17 = vpop.f32.mrb[64].mxu1 }
 0x26e   : > { %v5230_v63 = vpop.f32.mrb[65].mxu1 }
 0x26f   : > { %5744 = vmatmul.mubr.msk.bf16.vlgmr.msra.gmra.mrb[0].mxu0 %vm9306_vm9, %v7182_v21  ;;  %v8316_v32 = vadd.f32 %v5230_v63, %v5229_v17  ;;  %v5232_v34 = vpop.f32.mrb[66].mxu1  ;;  %v9324_v63 = vld [vmem:[#allocation19_spill] sm:$0xff] }
 0x270   : > { %5747 = vmatprep.mubr.msk.bf16.mxu0 %vm9307_vm0, %v7264_v59  ;;  %v5233_v31 = vpop.f32.mrb[67].mxu1 }
 0x271   : > { %v8318_v44 = vadd.f32 %v5233_v31, %v5232_v34  ;;  %v5143_v34 = vpack.c.bf16 %v9324_v63, %v9324_v63 }
 0x277   : > { %5748 = vmatmul.mubr.msk.bf16.gmra.mrb[4].mxu0 %vm9308_vm12, %v7337_v53  ;;  %v5235_v21 = vpop.f32.mrb[68].mxu1 }
 0x278   : > { %5751 = vmatprep.mubr.msk.bf16.mxu0 %vm9309_vm1, %v7409_v57  ;;  %v5236_v38 = vpop.f32.mrb[69].mxu1 }
 0x279   : > { %v8326_v27 = vadd.f32 %v5236_v38, %v5235_v21  ;;  %v5238_v59 = vpop.f32.mrb[70].mxu1 }
 0x27a   : > { %v5239_v30 = vpop.f32.mrb[71].mxu1 }
 0x27b   : > { %v8328_v39 = vadd.f32 %v5239_v30, %v5238_v59 }
 0x27f   : > { %5752 = vmatmul.mubr.msk.bf16.gmra.mrb[8].mxu0 %vm9310_vm8, %v7458_v35  ;;  %v5241_v53 = vpop.f32.mrb[72].mxu1 }
 0x280   : > { %5755 = vmatprep.mubr.msk.bf16.mxu0 %vm9311_vm15, %v7522_v7  ;;  %v5242_v20 = vpop.f32.mrb[73].mxu1 }
 0x281   : > { %v8336_v16 = vadd.f32 %v5242_v20, %v5241_v53  ;;  %v5244_v57 = vpop.f32.mrb[74].mxu1 }
 0x282   : > { %v5245_v47 = vpop.f32.mrb[75].mxu1 }
 0x283   : > { %v8338_v4 = vadd.f32 %v5245_v47, %v5244_v57 }
 0x287   : > { %5756 = vmatmul.mubr.msk.bf16.gmra.mrb[12].mxu0 %vm9312_vm13, %v7566_v52  ;;  %v5247_v50 = vpop.f32.mrb[76].mxu1 }
 0x288   : > { %5759 = vmatprep.mubr.msk.bf16.mxu0 %vm9266_vm5, %v7601_v2  ;;  %v5248_v35 = vpop.f32.mrb[77].mxu1  ;;  %vm9317_vm5 = vnez %v9316_v5 }
 0x289   : > { %v8346_v19 = vadd.f32 %v5248_v35, %v5247_v50  ;;  %v5250_v7 = vpop.f32.mrb[78].mxu1 }
 0x28a   : > { %v5251_v24 = vpop.f32.mrb[79].mxu1 }
 0x28b   : > { %v8348_v8 = vadd.f32 %v5251_v24, %v5250_v7 }
 0x28f   : > { %5760 = vmatmul.mubr.msk.bf16.gmra.mrb[16].mxu0 %vm9313_vm14, %v9269_v14  ;;  %v5253_v52 = vpop.f32.mrb[80].mxu1 }
 0x290   : > { %5763 = vmatprep.mubr.msk.bf16.mxu0 %vm9315_vm6, %v7701_v62  ;;  %v5254_v43 = vpop.f32.mrb[81].mxu1  ;;  %v888_v62 = vadd.s32 280, %v6656_v55 }
 0x291   : > { %v8356_v22 = vadd.f32 %v5254_v43, %v5253_v52  ;;  %v5256_v2 = vpop.f32.mrb[82].mxu1 }
 0x292   : > { %v5257_v37 = vpop.f32.mrb[83].mxu1  ;;  %v1392_v40 = vand.u32 15, %v888_v62 }
 0x293   : > { %v8358_v46 = vadd.f32 %v5257_v37, %v5256_v2 }
 0x297   : > { %5764 = vmatmul.mubr.msk.bf16.gmra.mrb[20].mxu0 %vm9317_vm5, %v7763_v1  ;;  %v5259_v14 = vpop.f32.mrb[84].mxu1  ;;  %v9321_v1 = vld [vmem:[#allocation38_spill] sm:$0xff] }
 0x298   : > { %5767 = vmatprep.mubr.msk.bf16.mxu0 %vm7889_vm2, %v9318_v11  ;;  %v5260_v12 = vpop.f32.mrb[85].mxu1  ;;  %vm1827_vm2 = vcmp.ne.s32.totalorder %v1392_v40, 15 }
 0x299   : > { %v8367_v13 = vadd.f32 %v5260_v12, %v5259_v14  ;;  %v5262_v51 = vpop.f32.mrb[86].mxu1  ;;  %vm5142_vm4 = vmpackc.low %vm1827_vm2, %vm9100_vm11 }
 0x29a   : > { %v5263_v25 = vpop.f32.mrb[87].mxu1 }
 0x29b   : > { %v8369_v41 = vadd.f32 %v5263_v25, %v5262_v51 }
 0x29f   : > { %5768 = vmatmul.mubr.msk.bf16.gmra.mrb[24].mxu0 %vm9276_vm3, %v7893_v49  ;;  %v5265_v61 = vpop.f32.mrb[88].mxu1 }
 0x2a0   : > { %5771 = vmatprep.mubr.msk.bf16.mxu0 %vm9323_vm10, %v9321_v1  ;;  %v5266_v15 = vpop.f32.mrb[89].mxu1 }
 0x2a1   : > { %v8377_v45 = vadd.f32 %v5266_v15, %v5265_v61  ;;  %v5268_v55 = vpop.f32.mrb[90].mxu1 }
 0x2a2   : > { %v5269_v17 = vpop.f32.mrb[91].mxu1 }
 0x2a3   : > { %v8381_v31 = vadd.f32 %v5269_v17, %v5268_v55 }
 0x2a7   : > { %5772 = vmatmul.mubr.msk.bf16.gmra.mrb[28].mxu0 %vm5142_vm4, %v5143_v34  ;;  %v5271_v49 = vpop.f32.mrb[92].mxu1 }
 0x2a8   : > { %v5272_v21 = vpop.f32.mrb[93].mxu1 }
 0x2a9   : > { %v8384_v38 = vadd.f32 %v5272_v21, %v5271_v49  ;;  %v5274_v59 = vpop.f32.mrb[94].mxu1 }
 0x2aa   : > { %v5275_v30 = vpop.f32.mrb[95].mxu1 }
 0x2ab   : > { %v8386_v53 = vadd.f32 %v5275_v30, %v5274_v59 }
 0x2af   : > { %v5277_v20 = vpop.f32.mrb[96].mxu1 }
 0x2b0   : > { %v5278_v57 = vpop.f32.mrb[97].mxu1 }
 0x2b1   : > { %v8388_v47 = vadd.f32 %v5278_v57, %v5277_v20  ;;  %v5280_v50 = vpop.f32.mrb[98].mxu1 }
 0x2b2   : > { %v5281_v35 = vpop.f32.mrb[99].mxu1 }
 0x2b3   : > { %v8390_v7 = vadd.f32 %v5281_v35, %v5280_v50 }
 0x2b7   : > { %v5323_v24 = vpop.f32.mrb[100].mxu1 }
 0x2b8   : > { %v5324_v48 = vpop.f32.mrb[101].mxu1 }
 0x2b9   : > { %v5325_v52 = vadd.f32 %v5324_v48, %v5323_v24  ;;  %v5326_v43 = vpop.f32.mrb[102].mxu1 }
 0x2ba   : > { %v5327_v2 = vpop.f32.mrb[103].mxu1 }
 0x2bb   : > { %v5778_v37 = vadd.f32 %v5325_v52, %v8216_v58  ;;  %v5328_v5 = vadd.f32 %v5327_v2, %v5326_v43 }
 0x2bd   : > { %v5784_v11 = vadd.f32 %v5328_v5, %v8218_v10 }
 0x2bf   : > { %v5329_v36 = vpop.f32.mrb[104].mxu1 }
 0x2c0   : > { %v5330_v14 = vpop.f32.mrb[105].mxu1 }
 0x2c1   : > { %v5331_v62 = vadd.f32 %v5330_v14, %v5329_v36  ;;  %v5332_v51 = vpop.f32.mrb[106].mxu1 }
 0x2c2   : > { %v5459_v12 = vpop.f32.mrb[32].mxu0  ;;  %v5333_v40 = vpop.f32.mrb[107].mxu1 }
 0x2c3   : > { %v5460_v25 = vpop.f32.mrb[33].mxu0  ;;  %v5775_v28 = vadd.f32 %v5331_v62, %v8243_v6  ;;  %v5334_v61 = vadd.f32 %v5333_v40, %v5332_v51 }
 0x2c4   : > { %v5461_v1 = vadd.f32 %v5460_v25, %v5459_v12  ;;  %v5462_v3 = vpop.f32.mrb[34].mxu0 }
 0x2c5   : > { %v5463_v15 = vpop.f32.mrb[35].mxu0  ;;  %v5781_v55 = vadd.f32 %v5334_v61, %v8246_v18 }
 0x2c6   : > { %v5464_v17 = vadd.f32 %v5463_v15, %v5462_v3  ;;  %v8396_v58 = vadd.f32 %v5778_v37, %v5461_v1 }
 0x2c7   : > { %v5335_v63 = vpop.f32.mrb[108].mxu1 }
 0x2c8   : > { %v8398_v10 = vadd.f32 %v5784_v11, %v5464_v17  ;;  %v5336_v34 = vpop.f32.mrb[109].mxu1 }
 0x2c9   : > { %v5337_v21 = vadd.f32 %v5336_v34, %v5335_v63  ;;  %v5338_v59 = vpop.f32.mrb[110].mxu1 }
 0x2ca   : > { %v5465_v49 = vpop.f32.mrb[36].mxu0  ;;  %v5339_v20 = vpop.f32.mrb[111].mxu1 }
 0x2cb   : > { %v5466_v30 = vpop.f32.mrb[37].mxu0  ;;  %v5790_v6 = vadd.f32 %v5337_v21, %v8256_v42  ;;  %v5340_v35 = vadd.f32 %v5339_v20, %v5338_v59 }
 0x2cc   : > { %v5467_v57 = vadd.f32 %v5466_v30, %v5465_v49  ;;  %v5468_v50 = vpop.f32.mrb[38].mxu0 }
 0x2cd   : > { %v5469_v24 = vpop.f32.mrb[39].mxu0  ;;  %v5796_v18 = vadd.f32 %v5340_v35, %v8258_v54 }
 0x2ce   : > { %v5470_v48 = vadd.f32 %v5469_v24, %v5468_v50  ;;  %v8402_v52 = vadd.f32 %v5775_v28, %v5467_v57 }
 0x2cf   : > { %v5341_v43 = vpop.f32.mrb[112].mxu1 }
 0x2d0   : > { %v8404_v2 = vadd.f32 %v5781_v55, %v5470_v48  ;;  %v5342_v37 = vpop.f32.mrb[113].mxu1 }
 0x2d1   : > { %v5343_v11 = vadd.f32 %v5342_v37, %v5341_v43  ;;  %v5344_v36 = vpop.f32.mrb[114].mxu1 }
 0x2d2   : > { %v5471_v5 = vpop.f32.mrb[40].mxu0  ;;  %v5345_v12 = vpop.f32.mrb[115].mxu1 }
 0x2d3   : > { %v5472_v14 = vpop.f32.mrb[41].mxu0  ;;  %v5787_v42 = vadd.f32 %v5343_v11, %v8268_v33  ;;  %v5346_v25 = vadd.f32 %v5345_v12, %v5344_v36 }
 0x2d4   : > { %v5473_v62 = vadd.f32 %v5472_v14, %v5471_v5  ;;  %v5474_v51 = vpop.f32.mrb[42].mxu0 }
 0x2d5   : > { %v5475_v40 = vpop.f32.mrb[43].mxu0  ;;  %v5793_v54 = vadd.f32 %v5346_v25, %v8270_v26 }
 0x2d6   : > { %v5476_v1 = vadd.f32 %v5475_v40, %v5474_v51  ;;  %v8408_v28 = vadd.f32 %v5790_v6, %v5473_v62 }
 0x2d7   : > { %v5347_v3 = vpop.f32.mrb[116].mxu1 }
 0x2d8   : > { %v8410_v61 = vadd.f32 %v5796_v18, %v5476_v1  ;;  %v5348_v15 = vpop.f32.mrb[117].mxu1 }
 0x2d9   : > { %v5349_v17 = vadd.f32 %v5348_v15, %v5347_v3  ;;  %v5350_v63 = vpop.f32.mrb[118].mxu1 }
 0x2da   : > { %v5477_v55 = vpop.f32.mrb[44].mxu0  ;;  %v5351_v49 = vpop.f32.mrb[119].mxu1 }
 0x2db   : > { %v5478_v34 = vpop.f32.mrb[45].mxu0  ;;  %v5802_v33 = vadd.f32 %v5349_v17, %v8281_v60  ;;  %v5352_v30 = vadd.f32 %v5351_v49, %v5350_v63 }
 0x2dc   : > { %v5479_v21 = vadd.f32 %v5478_v34, %v5477_v55  ;;  %v5480_v59 = vpop.f32.mrb[46].mxu0 }
 0x2dd   : > { %v5481_v20 = vpop.f32.mrb[47].mxu0  ;;  %v5808_v26 = vadd.f32 %v5352_v30, %v8283_v23 }
 0x2de   : > { %v5482_v57 = vadd.f32 %v5481_v20, %v5480_v59  ;;  %v8414_v6 = vadd.f32 %v5787_v42, %v5479_v21 }
 0x2df   : > { %v5353_v50 = vpop.f32.mrb[120].mxu1 }
 0x2e0   : > { %v8416_v35 = vadd.f32 %v5793_v54, %v5482_v57  ;;  %v5354_v24 = vpop.f32.mrb[121].mxu1 }
 0x2e1   : > { %v5355_v48 = vadd.f32 %v5354_v24, %v5353_v50  ;;  %v5356_v43 = vpop.f32.mrb[122].mxu1 }
 0x2e2   : > { %v5483_v18 = vpop.f32.mrb[48].mxu0  ;;  %v5357_v5 = vpop.f32.mrb[123].mxu1 }
 0x2e3   : > { %v5484_v37 = vpop.f32.mrb[49].mxu0  ;;  %v5799_v60 = vadd.f32 %v5355_v48, %v8292_v29  ;;  %v5358_v14 = vadd.f32 %v5357_v5, %v5356_v43 }
 0x2e4   : > { %v5485_v11 = vadd.f32 %v5484_v37, %v5483_v18  ;;  %v5486_v36 = vpop.f32.mrb[50].mxu0 }
 0x2e5   : > { %v5487_v12 = vpop.f32.mrb[51].mxu0  ;;  %v5805_v23 = vadd.f32 %v5358_v14, %v8299_v9 }
 0x2e6   : > { %v5488_v62 = vadd.f32 %v5487_v12, %v5486_v36  ;;  %v8420_v42 = vadd.f32 %v5802_v33, %v5485_v11 }
 0x2e7   : > { %v5359_v51 = vpop.f32.mrb[124].mxu1 }
 0x2e8   : > { %v8422_v25 = vadd.f32 %v5808_v26, %v5488_v62  ;;  %v5360_v40 = vpop.f32.mrb[125].mxu1 }
 0x2e9   : > { %v5361_v1 = vadd.f32 %v5360_v40, %v5359_v51  ;;  %v5362_v3 = vpop.f32.mrb[126].mxu1 }
 0x2ea   : > { %v5489_v54 = vpop.f32.mrb[52].mxu0  ;;  %v5363_v55 = vpop.f32.mrb[127].mxu1 }
 0x2eb   : > { %v5490_v15 = vpop.f32.mrb[53].mxu0  ;;  %v5814_v29 = vadd.f32 %v5361_v1, %v8306_v0  ;;  %v5364_v34 = vadd.f32 %v5363_v55, %v5362_v3 }
 0x2ec   : > { %v5491_v17 = vadd.f32 %v5490_v15, %v5489_v54  ;;  %v5492_v63 = vpop.f32.mrb[54].mxu0 }
 0x2ed   : > { %v5493_v49 = vpop.f32.mrb[55].mxu0  ;;  %v5820_v9 = vadd.f32 %v5364_v34, %v8308_v56 }
 0x2ee   : > { %v5494_v21 = vadd.f32 %v5493_v49, %v5492_v63  ;;  %v8426_v33 = vadd.f32 %v5799_v60, %v5491_v17 }
 0x2ef   : > { %v5365_v59 = vpop.f32.mrb[128].mxu1 }
 0x2f0   : > { %v8428_v30 = vadd.f32 %v5805_v23, %v5494_v21  ;;  %v5366_v20 = vpop.f32.mrb[129].mxu1 }
 0x2f1   : > { %v5367_v57 = vadd.f32 %v5366_v20, %v5365_v59  ;;  %v5368_v50 = vpop.f32.mrb[130].mxu1 }
 0x2f2   : > { %v5495_v26 = vpop.f32.mrb[56].mxu0  ;;  %v5369_v18 = vpop.f32.mrb[131].mxu1 }
 0x2f3   : > { %v5496_v24 = vpop.f32.mrb[57].mxu0  ;;  %v5811_v0 = vadd.f32 %v5367_v57, %v8316_v32  ;;  %v5370_v37 = vadd.f32 %v5369_v18, %v5368_v50 }
 0x2f4   : > { %v5497_v48 = vadd.f32 %v5496_v24, %v5495_v26  ;;  %v5498_v43 = vpop.f32.mrb[58].mxu0 }
 0x2f5   : > { %v5499_v5 = vpop.f32.mrb[59].mxu0  ;;  %v5817_v56 = vadd.f32 %v5370_v37, %v8318_v44 }
 0x2f6   : > { %v5500_v11 = vadd.f32 %v5499_v5, %v5498_v43  ;;  %v8432_v60 = vadd.f32 %v5814_v29, %v5497_v48 }
 0x2f7   : > { %v5371_v36 = vpop.f32.mrb[132].mxu1 }
 0x2f8   : > { %v8434_v14 = vadd.f32 %v5820_v9, %v5500_v11  ;;  %v5372_v12 = vpop.f32.mrb[133].mxu1 }
 0x2f9   : > { %v5373_v62 = vadd.f32 %v5372_v12, %v5371_v36  ;;  %v5374_v51 = vpop.f32.mrb[134].mxu1 }
 0x2fa   : > { %v5501_v23 = vpop.f32.mrb[60].mxu0  ;;  %v5375_v54 = vpop.f32.mrb[135].mxu1 }
 0x2fb   : > { %v5502_v40 = vpop.f32.mrb[61].mxu0  ;;  %v5826_v32 = vadd.f32 %v5373_v62, %v8326_v27  ;;  %v5376_v15 = vadd.f32 %v5375_v54, %v5374_v51 }
 0x2fc   : > { %v5503_v1 = vadd.f32 %v5502_v40, %v5501_v23  ;;  %v5504_v3 = vpop.f32.mrb[62].mxu0 }
 0x2fd   : > { %v5505_v55 = vpop.f32.mrb[63].mxu0  ;;  %v5832_v44 = vadd.f32 %v5376_v15, %v8328_v39 }
 0x2fe   : > { %v5506_v17 = vadd.f32 %v5505_v55, %v5504_v3  ;;  %v8438_v29 = vadd.f32 %v5811_v0, %v5503_v1 }
 0x2ff   : > { %v5377_v63 = vpop.f32.mrb[136].mxu1 }
 0x300   : > { %v8440_v34 = vadd.f32 %v5817_v56, %v5506_v17  ;;  %v5378_v49 = vpop.f32.mrb[137].mxu1 }
 0x301   : > { %v5379_v21 = vadd.f32 %v5378_v49, %v5377_v63  ;;  %v5380_v59 = vpop.f32.mrb[138].mxu1 }
 0x302   : > { %v5507_v9 = vpop.f32.mrb[64].mxu0  ;;  %v5381_v26 = vpop.f32.mrb[139].mxu1 }
 0x303   : > { %v5508_v20 = vpop.f32.mrb[65].mxu0  ;;  %v5823_v27 = vadd.f32 %v5379_v21, %v8336_v16  ;;  %v5382_v24 = vadd.f32 %v5381_v26, %v5380_v59 }
 0x304   : > { %v5509_v57 = vadd.f32 %v5508_v20, %v5507_v9  ;;  %v5510_v50 = vpop.f32.mrb[66].mxu0 }
 0x305   : > { %v5511_v18 = vpop.f32.mrb[67].mxu0  ;;  %v5829_v39 = vadd.f32 %v5382_v24, %v8338_v4 }
 0x306   : > { %v5512_v48 = vadd.f32 %v5511_v18, %v5510_v50  ;;  %v8444_v0 = vadd.f32 %v5826_v32, %v5509_v57 }
 0x307   : > { %v5383_v43 = vpop.f32.mrb[140].mxu1 }
 0x308   : > { %v8446_v37 = vadd.f32 %v5832_v44, %v5512_v48  ;;  %v5384_v5 = vpop.f32.mrb[141].mxu1 }
 0x309   : > { %v5385_v11 = vadd.f32 %v5384_v5, %v5383_v43  ;;  %v5386_v36 = vpop.f32.mrb[142].mxu1 }
 0x30a   : > { %v5513_v56 = vpop.f32.mrb[68].mxu0  ;;  %v5387_v23 = vpop.f32.mrb[143].mxu1 }
 0x30b   : > { %v5514_v12 = vpop.f32.mrb[69].mxu0  ;;  %v5838_v16 = vadd.f32 %v5385_v11, %v8346_v19  ;;  %v5388_v40 = vadd.f32 %v5387_v23, %v5386_v36 }
 0x30c   : > { %v5515_v62 = vadd.f32 %v5514_v12, %v5513_v56  ;;  %v5516_v51 = vpop.f32.mrb[70].mxu0 }
 0x30d   : > { %v5517_v54 = vpop.f32.mrb[71].mxu0  ;;  %v5844_v4 = vadd.f32 %v5388_v40, %v8348_v8 }
 0x30e   : > { %v5518_v1 = vadd.f32 %v5517_v54, %v5516_v51  ;;  %v8450_v32 = vadd.f32 %v5823_v27, %v5515_v62 }
 0x30f   : > { %v5389_v3 = vpop.f32.mrb[144].mxu1 }
 0x310   : > { %v8452_v15 = vadd.f32 %v5829_v39, %v5518_v1  ;;  %v5390_v55 = vpop.f32.mrb[145].mxu1 }
 0x311   : > { %v5391_v17 = vadd.f32 %v5390_v55, %v5389_v3  ;;  %v5392_v63 = vpop.f32.mrb[146].mxu1 }
 0x312   : > { %v5519_v44 = vpop.f32.mrb[72].mxu0  ;;  %v5393_v9 = vpop.f32.mrb[147].mxu1 }
 0x313   : > { %v5520_v49 = vpop.f32.mrb[73].mxu0  ;;  %v5835_v19 = vadd.f32 %v5391_v17, %v8356_v22  ;;  %v5394_v20 = vadd.f32 %v5393_v9, %v5392_v63 }
 0x314   : > { %v5521_v21 = vadd.f32 %v5520_v49, %v5519_v44  ;;  %v5522_v59 = vpop.f32.mrb[74].mxu0 }
 0x315   : > { %v5523_v26 = vpop.f32.mrb[75].mxu0  ;;  %v5841_v8 = vadd.f32 %v5394_v20, %v8358_v46 }
 0x316   : > { %v5524_v57 = vadd.f32 %v5523_v26, %v5522_v59  ;;  %v8456_v27 = vadd.f32 %v5838_v16, %v5521_v21 }
 0x317   : > { %v5395_v50 = vpop.f32.mrb[148].mxu1 }
 0x318   : > { %v8458_v24 = vadd.f32 %v5844_v4, %v5524_v57  ;;  %v5396_v18 = vpop.f32.mrb[149].mxu1 }
 0x319   : > { %v5397_v48 = vadd.f32 %v5396_v18, %v5395_v50  ;;  %v5398_v43 = vpop.f32.mrb[150].mxu1 }
 0x31a   : > { %v5525_v39 = vpop.f32.mrb[76].mxu0  ;;  %v5399_v56 = vpop.f32.mrb[151].mxu1 }
 0x31b   : > { %v5526_v5 = vpop.f32.mrb[77].mxu0  ;;  %v5850_v22 = vadd.f32 %v5397_v48, %v8367_v13  ;;  %v5400_v12 = vadd.f32 %v5399_v56, %v5398_v43 }
 0x31c   : > { %v5527_v11 = vadd.f32 %v5526_v5, %v5525_v39  ;;  %v5528_v36 = vpop.f32.mrb[78].mxu0 }
 0x31d   : > { %v5529_v23 = vpop.f32.mrb[79].mxu0  ;;  %v5856_v46 = vadd.f32 %v5400_v12, %v8369_v41 }
 0x31e   : > { %v5530_v62 = vadd.f32 %v5529_v23, %v5528_v36  ;;  %v8462_v16 = vadd.f32 %v5835_v19, %v5527_v11 }
 0x31f   : > { %v5401_v51 = vpop.f32.mrb[152].mxu1 }
 0x320   : > { %v8464_v40 = vadd.f32 %v5841_v8, %v5530_v62  ;;  %v5402_v54 = vpop.f32.mrb[153].mxu1 }
 0x321   : > { %v5403_v1 = vadd.f32 %v5402_v54, %v5401_v51  ;;  %v5404_v3 = vpop.f32.mrb[154].mxu1 }
 0x322   : > { %v5531_v4 = vpop.f32.mrb[80].mxu0  ;;  %v5405_v44 = vpop.f32.mrb[155].mxu1 }
 0x323   : > { %v5532_v55 = vpop.f32.mrb[81].mxu0  ;;  %v5847_v13 = vadd.f32 %v5403_v1, %v8377_v45  ;;  %v5406_v49 = vadd.f32 %v5405_v44, %v5404_v3 }
 0x324   : > { %v5533_v17 = vadd.f32 %v5532_v55, %v5531_v4  ;;  %v5534_v63 = vpop.f32.mrb[82].mxu0 }
 0x325   : > { %v5535_v9 = vpop.f32.mrb[83].mxu0  ;;  %v5853_v41 = vadd.f32 %v5406_v49, %v8381_v31 }
 0x326   : > { %v5536_v21 = vadd.f32 %v5535_v9, %v5534_v63  ;;  %v8468_v19 = vadd.f32 %v5850_v22, %v5533_v17 }
 0x327   : > { %v5407_v59 = vpop.f32.mrb[156].mxu1 }
 0x328   : > { %v8470_v20 = vadd.f32 %v5856_v46, %v5536_v21  ;;  %v5408_v26 = vpop.f32.mrb[157].mxu1 }
 0x329   : > { %v5409_v57 = vadd.f32 %v5408_v26, %v5407_v59  ;;  %v5410_v50 = vpop.f32.mrb[158].mxu1 }
 0x32a   : > { %v5537_v8 = vpop.f32.mrb[84].mxu0  ;;  %v5411_v39 = vpop.f32.mrb[159].mxu1 }
 0x32b   : > { %v5538_v18 = vpop.f32.mrb[85].mxu0  ;;  %v5862_v45 = vadd.f32 %v5409_v57, %v8384_v38  ;;  %v5412_v5 = vadd.f32 %v5411_v39, %v5410_v50 }
 0x32c   : > { %v5539_v48 = vadd.f32 %v5538_v18, %v5537_v8  ;;  %v5540_v43 = vpop.f32.mrb[86].mxu0 }
 0x32d   : > { %v5541_v56 = vpop.f32.mrb[87].mxu0  ;;  %v5868_v31 = vadd.f32 %v5412_v5, %v8386_v53 }
 0x32e   : > { %v5542_v11 = vadd.f32 %v5541_v56, %v5540_v43  ;;  %v8474_v22 = vadd.f32 %v5847_v13, %v5539_v48 }
 0x32f   : > { %v5413_v36 = vpop.f32.mrb[160].mxu1 }
 0x330   : > { %v8476_v12 = vadd.f32 %v5853_v41, %v5542_v11  ;;  %v5414_v23 = vpop.f32.mrb[161].mxu1 }
 0x331   : > { %v5415_v62 = vadd.f32 %v5414_v23, %v5413_v36  ;;  %v5416_v51 = vpop.f32.mrb[162].mxu1 }
 0x332   : > { %v5543_v46 = vpop.f32.mrb[88].mxu0  ;;  %v5417_v4 = vpop.f32.mrb[163].mxu1 }
 0x333   : > { %v5544_v54 = vpop.f32.mrb[89].mxu0  ;;  %v5859_v38 = vadd.f32 %v5415_v62, %v8388_v47  ;;  %v5418_v55 = vadd.f32 %v5417_v4, %v5416_v51 }
 0x334   : > { %v5545_v1 = vadd.f32 %v5544_v54, %v5543_v46  ;;  %v5546_v3 = vpop.f32.mrb[90].mxu0 }
 0x335   : > { %v5547_v44 = vpop.f32.mrb[91].mxu0  ;;  %v5865_v53 = vadd.f32 %v5418_v55, %v8390_v7  ;;  %v8491_v7 = vld [vmem:[%s8850_s4] ss:$0 sm:$0xff] }
 0x336   : > { %v5548_v17 = vadd.f32 %v5547_v44, %v5546_v3  ;;  %v8480_v13 = vadd.f32 %v5862_v45, %v5545_v1  ;;  %v8519_v44 = vld [vmem:[%s6535_s17 + $0x8] sm:$0xff]  }
 0x338   : > { %v8482_v63 = vadd.f32 %v5868_v31, %v5548_v17 }
 0x33a   : > { %v5549_v49 = vpop.f32.mrb[92].mxu0 }
 0x33b   : > { %v5550_v9 = vpop.f32.mrb[93].mxu0 }
 0x33c   : > { %v5551_v41 = vadd.f32 %v5550_v9, %v5549_v49  ;;  %v5552_v21 = vpop.f32.mrb[94].mxu0 }
 0x33d   : > { %v5553_v59 = vpop.f32.mrb[95].mxu0 }
 0x33e   : > { %v5554_v26 = vadd.f32 %v5553_v59, %v5552_v21  ;;  %v8484_v8 = vadd.f32 %v5859_v38, %v5551_v41  ;;  %v8515_v38 = vld [vmem:[%s6535_s17 + $0x10] sm:$0xff]   ;;  %v8535_v59 = vld [vmem:[%s6535_s17 + $0x18] sm:$0xff]  }
 0x340   : > { %v8486_v47 = vadd.f32 %v5865_v53, %v5554_v26 }
 0x342   : > { %v5745_v57 = vpop.f32.mrb[0].mxu0 }
 0x343   : > { %v5777_v50 = vadd.f32 %v8402_v52, %v5745_v57  ;;  %v3633_v18 = vpop.f32.mrb[1].mxu0  ;;  %v4689_v57 = vunpack.c.h.bf16 %v8515_v38 }
 0x344   : > { %v5780_v39 = vadd.f32 %v8396_v58, %v3633_v18  ;;  %v5746_v45 = vpop.f32.mrb[2].mxu0 }
 0x345   : > { %v8496_v48 = vadd.f32 %v5777_v50, %v8491_v7  ;;  %v5783_v43 = vadd.f32 %v8404_v2, %v5746_v45  ;;  %v3636_v5 = vpop.f32.mrb[3].mxu0 }
 0x346   : > { %v8500_v56 = vadd.f32 %v5780_v39, %v8491_v7  ;;  %v5786_v31 = vadd.f32 %v8398_v10, %v3636_v5  ;;  %v8550_v5 = vld [vmem:[%s6535_s17 + $0x30] sm:$0xff]  }
 0x347   : > { %v3833_v11 = vsub.f32 0.0, %v8496_v48  ;;  %v8505_v52 = vadd.f32 %v5783_v43, %v8491_v7 }
 0x348   : > { %v3831_v58 = vsub.f32 0.0, %v8500_v56  ;;  %v8509_v36 = vadd.f32 %v5786_v31, %v8491_v7 }
 0x349   : > { %v3867_v23 = vmul.f32 1.442695, %v3833_v11  ;;  %v3834_v2 = vsub.f32 0.0, %v8505_v52 }
 0x34a   : > { %v3863_v46 = vmul.f32 1.442695, %v3831_v58  ;;  %v3832_v62 = vsub.f32 0.0, %v8509_v36  ;;  %v5749_v51 = vpop.f32.mrb[4].mxu0 }
 0x34b   : > { %6222 = vpow2.f32 %v3867_v23  ;;  %v3869_v10 = vmul.f32 1.442695, %v3834_v2  ;;  %v5789_v54 = vadd.f32 %v8414_v6, %v5749_v51  ;;  %v3649_v4 = vpop.f32.mrb[5].mxu0  ;;  %v8526_v6 = vld [vmem:[%s6535_s17 + $0x20] sm:$0xff]  }
 0x34c   : > { %6224 = vpow2.f32 %v3863_v46  ;;  %v3865_v1 = vmul.f32 1.442695, %v3832_v62  ;;  %v5792_v3 = vadd.f32 %v8408_v28, %v3649_v4  ;;  %v5750_v55 = vpop.f32.mrb[6].mxu0  ;;  %v4688_v28 = vunpack.c.l.bf16 %v8515_v38  ;;  %v8556_v46 = vld [vmem:[%s6535_s17 + $0x28] sm:$0xff]  }
 0x34d   : > { %6226 = vpow2.f32 %v3869_v10  ;;  %v8522_v53 = vadd.f32 %v5789_v54, %v8491_v7  ;;  %v5795_v17 = vadd.f32 %v8416_v35, %v5750_v55  ;;  %v3652_v49 = vpop.f32.mrb[7].mxu0  ;;  %v4684_v35 = vunpack.c.l.bf16 %v8519_v44 }
 0x34e   : > { %6228 = vpow2.f32 %v3865_v1  ;;  %v8529_v9 = vadd.f32 %v5792_v3, %v8491_v7  ;;  %v5798_v41 = vadd.f32 %v8410_v61, %v3652_v49  ;;  %v4685_v61 = vunpack.c.h.bf16 %v8519_v44 }
 0x34f   : > { %v3837_v21 = vsub.f32 0.0, %v8522_v53  ;;  %v8538_v26 = vadd.f32 %v5795_v17, %v8491_v7 }
 0x350   : > { %v3835_v50 = vsub.f32 0.0, %v8529_v9  ;;  %v8544_v18 = vadd.f32 %v5798_v41, %v8491_v7 }
 0x351   : > { %v3875_v39 = vmul.f32 1.442695, %v3837_v21  ;;  %v3838_v43 = vsub.f32 0.0, %v8538_v26 }
 0x352   : > { %v3871_v31 = vmul.f32 1.442695, %v3835_v50  ;;  %v3836_v23 = vsub.f32 0.0, %v8544_v18  ;;  %v5753_v2 = vpop.f32.mrb[8].mxu0 }
 0x353   : > { %6230 = vpow2.f32 %v3875_v39  ;;  %v3877_v62 = vmul.f32 1.442695, %v3838_v43  ;;  %v5801_v10 = vadd.f32 %v8426_v33, %v5753_v2  ;;  %v3665_v54 = vpop.f32.mrb[9].mxu0 }
 0x354   : > { %6232 = vpow2.f32 %v3871_v31  ;;  %v3873_v4 = vmul.f32 1.442695, %v3836_v23  ;;  %v5804_v3 = vadd.f32 %v8420_v42, %v3665_v54  ;;  %v5754_v55 = vpop.f32.mrb[10].mxu0 }
 0x355   : > { %v6223_v17 = vpop.eup %6222  ;;  %6234 = vpow2.f32 %v3877_v62  ;;  %v8563_v49 = vadd.f32 %v5801_v10, %v8491_v7  ;;  %v5807_v21 = vadd.f32 %v8428_v30, %v5754_v55  ;;  %v3668_v50 = vpop.f32.mrb[11].mxu0  ;;  %v8581_v55 = vld [vmem:[%s6535_s17 + $0x40] sm:$0xff]  }
 0x356   : > { %v6225_v33 = vpop.eup %6224  ;;  %v3929_v39 = vadd.f32 1.0, %v6223_v17  ;;  %6236 = vpow2.f32 %v3873_v4  ;;  %v8568_v43 = vadd.f32 %v5804_v3, %v8491_v7  ;;  %v5810_v42 = vadd.f32 %v8422_v25, %v3668_v50 }
 0x357   : > { %v6227_v31 = vpop.eup %6226  ;;  %v3927_v23 = vadd.f32 1.0, %v6225_v33  ;;  %v3841_v2 = vsub.f32 0.0, %v8563_v49  ;;  %v8573_v62 = vadd.f32 %v5807_v21, %v8491_v7  ;;  %v8585_v33 = vld [vmem:[%s6535_s17 + $0x38] sm:$0xff]  }
 0x358   : > { %v6229_v10 = vpop.eup %6228  ;;  %6238 = vrcp.f32 %v3929_v39  ;;  %v3930_v54 = vadd.f32 1.0, %v6227_v31  ;;  %v3839_v4 = vsub.f32 0.0, %v8568_v43  ;;  %v8578_v3 = vadd.f32 %v5810_v42, %v8491_v7 }
 0x359   : > { %6240 = vrcp.f32 %v3927_v23  ;;  %v3928_v25 = vadd.f32 1.0, %v6229_v10  ;;  %v3883_v17 = vmul.f32 1.442695, %v3841_v2  ;;  %v3842_v50 = vsub.f32 0.0, %v8573_v62 }
 0x35a   : > { %6242 = vrcp.f32 %v3930_v54  ;;  %v3879_v21 = vmul.f32 1.442695, %v3839_v4  ;;  %v3840_v30 = vsub.f32 0.0, %v8578_v3  ;;  %v5757_v31 = vpop.f32.mrb[12].mxu0 }
 0x35b   : > { %6244 = vrcp.f32 %v3928_v25  ;;  %v3885_v41 = vmul.f32 1.442695, %v3842_v50  ;;  %v5813_v42 = vadd.f32 %v8438_v29, %v5757_v31  ;;  %v3681_v23 = vpop.f32.mrb[13].mxu0 }
 0x35c   : > { %6246 = vpow2.f32 %v3883_v17  ;;  %v3881_v2 = vmul.f32 1.442695, %v3840_v30  ;;  %v5816_v10 = vadd.f32 %v8432_v60, %v3681_v23  ;;  %v5758_v54 = vpop.f32.mrb[14].mxu0 }
 0x35d   : > { %v6231_v4 = vpop.eup %6230  ;;  %6248 = vpow2.f32 %v3879_v21  ;;  %v8594_v58 = vadd.f32 %v5813_v42, %v8491_v7  ;;  %v5819_v25 = vadd.f32 %v8440_v34, %v5758_v54  ;;  %v3684_v29 = vpop.f32.mrb[15].mxu0 }
 0x35e   : > { %v6233_v31 = vpop.eup %6232  ;;  %v3933_v1 = vadd.f32 1.0, %v6231_v4  ;;  %6250 = vpow2.f32 %v3885_v41  ;;  %v8599_v30 = vadd.f32 %v5816_v10, %v8491_v7  ;;  %v5822_v60 = vadd.f32 %v8434_v14, %v3684_v29 }
 0x35f   : > { %v6235_v17 = vpop.eup %6234  ;;  %v3931_v23 = vadd.f32 1.0, %v6233_v31  ;;  %6252 = vpow2.f32 %v3881_v2  ;;  %v3845_v21 = vsub.f32 0.0, %v8594_v58  ;;  %v8604_v42 = vadd.f32 %v5819_v25, %v8491_v7 }
 0x360   : > { %v6237_v34 = vpop.eup %6236  ;;  %6254 = vrcp.f32 %v3933_v1  ;;  %v3934_v54 = vadd.f32 1.0, %v6235_v17  ;;  %v3843_v4 = vsub.f32 0.0, %v8599_v30  ;;  %v8608_v41 = vadd.f32 %v5822_v60, %v8491_v7 }
 0x361   : > { %6256 = vrcp.f32 %v3931_v23  ;;  %v3932_v10 = vadd.f32 1.0, %v6237_v34  ;;  %v3891_v14 = vmul.f32 1.442695, %v3845_v21  ;;  %v3846_v29 = vsub.f32 0.0, %v8604_v42 }
 0x362   : > { %v6239_v31 = vpop.eup %6238  ;;  %6258 = vrcp.f32 %v3934_v54  ;;  %v3887_v2 = vmul.f32 1.442695, %v3843_v4  ;;  %v3844_v25 = vsub.f32 0.0, %v8608_v41  ;;  %v5761_v1 = vpop.f32.mrb[16].mxu0 }
 0x363   : > { %v6241_v17 = vpop.eup %6240  ;;  %v3993_v51 = vmul.f32 %v6239_v31, %v8496_v48  ;;  %6260 = vrcp.f32 %v3932_v10  ;;  %v3893_v60 = vmul.f32 1.442695, %v3846_v29  ;;  %v5825_v23 = vadd.f32 %v8450_v32, %v5761_v1  ;;  %v3697_v21 = vpop.f32.mrb[17].mxu0 }
 0x364   : > { %v6243_v34 = vpop.eup %6242  ;;  %v3991_v39 = vmul.f32 %v6241_v17, %v8500_v56  ;;  %6262 = vpow2.f32 %v3891_v14  ;;  %v3889_v54 = vmul.f32 1.442695, %v3844_v25  ;;  %v5828_v4 = vadd.f32 %v8444_v0, %v3697_v21  ;;  %v5762_v11 = vpop.f32.mrb[18].mxu0 }
 0x365   : > { %v6245_v45 = vpop.eup %6244  ;;  %v4094_v50 = vadd.f32 %v4688_v28, %v3993_v51  ;;  %v3994_v48 = vmul.f32 %v6243_v34, %v8505_v52  ;;  %6264 = vpow2.f32 %v3887_v2  ;;  %v8626_v32 = vadd.f32 %v5825_v23, %v8491_v7  ;;  %v3700_v10 = vpop.f32.mrb[19].mxu0 }
 0x366   : > { %v6247_v56 = vpop.eup %6246  ;;  %v4092_v14 = vadd.f32 %v4684_v35, %v3991_v39  ;;  %v3992_v0 = vmul.f32 %v6245_v45, %v8509_v36  ;;  %6266 = vpow2.f32 %v3893_v60  ;;  %v8632_v29 = vadd.f32 %v5828_v4, %v8491_v7 }
 0x367   : > { %v6249_v28 = vpop.eup %6248  ;;  %v4095_v51 = vadd.f32 %v4689_v57, %v3994_v48  ;;  %v3937_v52 = vadd.f32 1.0, %v6247_v56  ;;  %6268 = vpow2.f32 %v3889_v54  ;;  %v3849_v31 = vsub.f32 0.0, %v8626_v32 }
 0x368   : > { %v6251_v2 = vpop.eup %6250  ;;  %v4093_v25 = vadd.f32 %v4685_v61, %v3992_v0  ;;  %v3935_v35 = vadd.f32 1.0, %v6249_v28  ;;  %v3847_v36 = vsub.f32 0.0, %v8632_v29  ;;  %v5831_v45 = vadd.f32 %v8452_v15, %v5762_v11 }
 0x369   : > { %v6253_v39 = vpop.eup %6252  ;;  %v4754_v1 = vpack.c.bf16 %v4095_v51, %v4094_v50  ;;  %6270 = vrcp.f32 %v3937_v52  ;;  %v3938_v17 = vadd.f32 1.0, %v6251_v2  ;;  %v3899_v38 = vmul.f32 1.442695, %v3849_v31 }
 0x36a   : > { %v6255_v57 = vpop.eup %6254  ;;  %v4749_v60 = vpack.c.bf16 %v4093_v25, %v4092_v14  ;;  %6272 = vrcp.f32 %v3935_v35  ;;  %v3936_v23 = vadd.f32 1.0, %v6253_v39  ;;  %v3895_v21 = vmul.f32 1.442695, %v3847_v36  ;;  %v5765_v34 = vpop.f32.mrb[20].mxu0 }
 0x36b   : > { %v6257_v54 = vpop.eup %6256  ;;  %4842 = vst [vmem:[%s8642_s9 + $0x8] sm:$0xff] %v4754_v1   ;;  %v3997_v44 = vmul.f32 %v6255_v57, %v8522_v53  ;;  %6274 = vrcp.f32 %v3938_v17  ;;  %v8647_v15 = vadd.f32 %v5831_v45, %v8491_v7  ;;  %v5834_v61 = vadd.f32 %v8446_v37, %v3700_v10  ;;  %v3713_v11 = vpop.f32.mrb[21].mxu0 }
 0x36c   : > { %v6259_v50 = vpop.eup %6258  ;;  %4750 = vst [vmem:[%s8642_s9] sm:$0xff] %v4749_v60   ;;  %v3995_v4 = vmul.f32 %v6257_v54, %v8529_v9  ;;  %6276 = vrcp.f32 %v3936_v23  ;;  %v5837_v48 = vadd.f32 %v8462_v16, %v5765_v34  ;;  %v5840_v56 = vadd.f32 %v8456_v27, %v3713_v11  ;;  %v5766_v14 = vpop.f32.mrb[22].mxu0 }
 0x36d   : > { %v6261_v0 = vpop.eup %6260  ;;  %v9325_v53 = vunpack.c.l.bf16 %v8526_v6  ;;  %v3998_v51 = vmul.f32 %v6259_v50, %v8538_v26  ;;  %6278 = vpow2.f32 %v3899_v38  ;;  %v3850_v37 = vsub.f32 0.0, %v8647_v15  ;;  %v3716_v10 = vpop.f32.mrb[23].mxu0 }
 0x36e   : > { %v6263_v52 = vpop.eup %6262  ;;  %v9326_v31 = vunpack.c.l.bf16 %v8535_v59  ;;  %v3996_v2 = vmul.f32 %v6261_v0, %v8544_v18  ;;  %6280 = vpow2.f32 %v3895_v21  ;;  %v8662_v27 = vadd.f32 %v5834_v61, %v8491_v7 }
 0x36f   : > { %v4098_v28 = vadd.f32 %v9325_v53, %v3997_v44  ;;  %v6265_v16 = vpop.eup %6264  ;;  %v9327_v25 = vunpack.c.h.bf16 %v8526_v6  ;;  %v3941_v36 = vadd.f32 1.0, %v6263_v52  ;;  %v3901_v26 = vmul.f32 1.442695, %v3850_v37 }
 0x370   : > { %v4096_v9 = vadd.f32 %v9326_v31, %v3995_v4  ;;  %v8667_v45 = vadd.f32 %v5837_v48, %v8491_v7  ;;  %v6267_v39 = vpop.eup %6266  ;;  %v9328_v1 = vunpack.c.h.bf16 %v8535_v59  ;;  %v3939_v38 = vadd.f32 1.0, %v6265_v16 }
 0x371   : > { %v4099_v35 = vadd.f32 %v9327_v25, %v3998_v51  ;;  %v3848_v18 = vsub.f32 0.0, %v8662_v27  ;;  %v8673_v57 = vadd.f32 %v5840_v56, %v8491_v7  ;;  %v6269_v60 = vpop.eup %6268  ;;  %6282 = vrcp.f32 %v3941_v36 }
 0x372   : > { %v4097_v17 = vadd.f32 %v9328_v1, %v3996_v2  ;;  %v3942_v6 = vadd.f32 1.0, %v6267_v39  ;;  %v3853_v21 = vsub.f32 0.0, %v8667_v45  ;;  %6284 = vrcp.f32 %v3939_v38  ;;  %v5769_v59 = vpop.f32.mrb[24].mxu0 }
 0x373   : > { %v4764_v23 = vpack.c.bf16 %v4099_v35, %v4098_v28  ;;  %v3940_v54 = vadd.f32 1.0, %v6269_v60  ;;  %v3897_v44 = vmul.f32 1.442695, %v3848_v18  ;;  %v6271_v61 = vpop.eup %6270  ;;  %v3851_v50 = vsub.f32 0.0, %v8673_v57  ;;  %v3729_v48 = vpop.f32.mrb[25].mxu0 }
 0x374   : > { %v4759_v34 = vpack.c.bf16 %v4097_v17, %v4096_v9  ;;  %6286 = vrcp.f32 %v3942_v6  ;;  %v3907_v11 = vmul.f32 1.442695, %v3853_v21  ;;  %v5843_v4 = vadd.f32 %v8464_v40, %v5766_v14  ;;  %v6273_v56 = vpop.eup %6272  ;;  %v5770_v51 = vpop.f32.mrb[26].mxu0 }
 0x375   : > { %4844 = vst [vmem:[%s8642_s9 + $0x18] sm:$0xff] %v4764_v23   ;;  %v4001_v0 = vmul.f32 %v6271_v61, %v8563_v49  ;;  %6288 = vrcp.f32 %v3940_v54  ;;  %v5846_v53 = vadd.f32 %v8458_v24, %v3716_v10  ;;  %v5849_v28 = vadd.f32 %v8474_v22, %v5769_v59  ;;  %v6275_v37 = vpop.eup %6274  ;;  %v3732_v40 = vpop.f32.mrb[27].mxu0 }
 0x376   : > { %4843 = vst [vmem:[%s8642_s9 + $0x10] sm:$0xff] %v4759_v34   ;;  %v3999_v52 = vmul.f32 %v6273_v56, %v8568_v43  ;;  %6290 = vpow2.f32 %v3901_v26  ;;  %v3903_v31 = vmul.f32 1.442695, %v3851_v50  ;;  %v8685_v9 = vadd.f32 %v5843_v4, %v8491_v7  ;;  %v6277_v14 = vpop.eup %6276 }
 0x377   : > { %v9329_v2 = vunpack.c.l.bf16 %v8550_v5  ;;  %v4002_v49 = vmul.f32 %v6275_v37, %v8573_v62  ;;  %6292 = vpow2.f32 %v3897_v44  ;;  %v8691_v24 = vadd.f32 %v5846_v53, %v8491_v7  ;;  %v6279_v22 = vpop.eup %6278 }
 0x378   : > { %v9330_v10 = vunpack.c.l.bf16 %v8556_v46  ;;  %v4000_v25 = vmul.f32 %v6277_v14, %v8578_v3  ;;  %6294 = vpow2.f32 %v3907_v11  ;;  %v3854_v35 = vsub.f32 0.0, %v8685_v9  ;;  %v6281_v36 = vpop.eup %6280 }
 0x379   : > { %v4102_v16 = vadd.f32 %v9329_v2, %v4001_v0  ;;  %v9331_v26 = vunpack.c.h.bf16 %v8550_v5  ;;  %v3945_v1 = vadd.f32 1.0, %v6279_v22  ;;  %6296 = vpow2.f32 %v3903_v31 }
 0x37a   : > { %v4100_v43 = vadd.f32 %v9330_v10, %v3999_v52  ;;  %v3852_v62 = vsub.f32 0.0, %v8691_v24  ;;  %v9332_v17 = vunpack.c.h.bf16 %v8556_v46  ;;  %v3943_v18 = vadd.f32 1.0, %v6281_v36  ;;  %v5773_v5 = vpop.f32.mrb[28].mxu0 }
 0x37b   : > { %v4103_v39 = vadd.f32 %v9331_v26, %v4002_v49  ;;  %v3909_v60 = vmul.f32 1.442695, %v3854_v35  ;;  %v8703_v23 = vadd.f32 %v5849_v28, %v8491_v7  ;;  %6298 = vrcp.f32 %v3945_v1  ;;  %v6283_v34 = vpop.eup %6282  ;;  %v3745_v59 = vpop.f32.mrb[29].mxu0 }
 0x37c   : > { %v4101_v38 = vadd.f32 %v9332_v17, %v4000_v25  ;;  %v3905_v6 = vmul.f32 1.442695, %v3852_v62  ;;  %v5852_v21 = vadd.f32 %v8468_v19, %v3729_v48  ;;  %6300 = vrcp.f32 %v3943_v18  ;;  %v6285_v61 = vpop.eup %6284  ;;  %v5774_v4 = vpop.f32.mrb[30].mxu0 }
 0x37d   : > { %v4774_v3 = vpack.c.bf16 %v4103_v39, %v4102_v16  ;;  %v3857_v44 = vsub.f32 0.0, %v8703_v23  ;;  %v5855_v46 = vadd.f32 %v8476_v12, %v5770_v51  ;;  %v4005_v11 = vmul.f32 %v6283_v34, %v8594_v58  ;;  %v3748_v53 = vpop.f32.mrb[31].mxu0 }
 0x37e   : > { %v4769_v54 = vpack.c.bf16 %v4101_v38, %v4100_v43  ;;  %6302 = vpow2.f32 %v3909_v60  ;;  %v8711_v50 = vadd.f32 %v5852_v21, %v8491_v7  ;;  %v5858_v19 = vadd.f32 %v8470_v20, %v3732_v40  ;;  %v6287_v48 = vpop.eup %6286 }
 0x37f   : > { %4846 = vst [vmem:[%s8642_s9 + $0x28] sm:$0xff] %v4774_v3   ;;  %v4003_v56 = vmul.f32 %v6285_v61, %v8599_v30  ;;  %6304 = vpow2.f32 %v3905_v6  ;;  %v3915_v0 = vmul.f32 1.442695, %v3857_v44  ;;  %v8717_v12 = vadd.f32 %v5855_v46, %v8491_v7  ;;  %v6289_v28 = vpop.eup %6288 }
 0x380   : > { %4845 = vst [vmem:[%s8642_s9 + $0x20] sm:$0xff] %v4769_v54   ;;  %v9333_v58 = vunpack.c.l.bf16 %v8581_v55  ;;  %v4006_v37 = vmul.f32 %v6287_v48, %v8604_v42  ;;  %v3855_v52 = vsub.f32 0.0, %v8711_v50  ;;  %v8724_v20 = vadd.f32 %v5858_v19, %v8491_v7  ;;  %v6291_v31 = vpop.eup %6290  ;;  %v4834_v19 = vld [vmem:[%s6535_s17 + $0x48] sm:$0xff]  }
 0x381   : > { %v9334_v30 = vunpack.c.l.bf16 %v8585_v33  ;;  %v4004_v14 = vmul.f32 %v6289_v28, %v8608_v41  ;;  %6306 = vpow2.f32 %v3915_v0  ;;  %v3858_v2 = vsub.f32 0.0, %v8717_v12  ;;  %v6293_v16 = vpop.eup %6292 }
 0x382   : > { %v4106_v51 = vadd.f32 %v9333_v58, %v4005_v11  ;;  %v9335_v49 = vunpack.c.h.bf16 %v8581_v55  ;;  %v3946_v10 = vadd.f32 1.0, %v6291_v31  ;;  %v3911_v42 = vmul.f32 1.442695, %v3855_v52  ;;  %v6295_v25 = vpop.eup %6294 }
 0x383   : > { %v4104_v40 = vadd.f32 %v9334_v30, %v4003_v56  ;;  %v3856_v43 = vsub.f32 0.0, %v8724_v20  ;;  %v9336_v35 = vunpack.c.h.bf16 %v8585_v33  ;;  %v3944_v26 = vadd.f32 1.0, %v6293_v16  ;;  %v6297_v1 = vpop.eup %6296 }
 0x384   : > { %v4107_v22 = vadd.f32 %v9335_v49, %v4006_v37  ;;  %v3917_v39 = vmul.f32 1.442695, %v3858_v2  ;;  %v5861_v41 = vadd.f32 %v8484_v8, %v5773_v5  ;;  %6308 = vrcp.f32 %v3946_v10 }
 0x385   : > { %v4105_v36 = vadd.f32 %v9336_v35, %v4004_v14  ;;  %v3949_v17 = vadd.f32 1.0, %v6295_v25  ;;  %v3913_v55 = vmul.f32 1.442695, %v3856_v43  ;;  %6310 = vrcp.f32 %v3944_v26  ;;  %v6299_v3 = vpop.eup %6298 }
 0x386   : > { %v4784_v62 = vpack.c.bf16 %v4107_v22, %v4106_v51  ;;  %v3947_v18 = vadd.f32 1.0, %v6297_v1  ;;  %v8737_v60 = vadd.f32 %v5861_v41, %v8491_v7  ;;  %v5864_v33 = vadd.f32 %v8480_v13, %v3745_v59  ;;  %v6301_v21 = vpop.eup %6300  ;;  %v4835_v13 = vld [vmem:[%s6535_s17 + $0x50] sm:$0xff]   ;;  %v4836_v22 = vld [vmem:[%s6535_s17 + $0x58] sm:$0xff]  }
 0x387   : > { %v4779_v38 = vpack.c.bf16 %v4105_v36, %v4104_v40  ;;  %6312 = vrcp.f32 %v3949_v17  ;;  %v5867_v8 = vadd.f32 %v8486_v47, %v5774_v4  ;;  %v5870_v6 = vadd.f32 %v8482_v63, %v3748_v53 }
 0x388   : > { %4848 = vst [vmem:[%s8642_s9 + $0x38] sm:$0xff] %v4784_v62   ;;  %6314 = vrcp.f32 %v3947_v18  ;;  %v3861_v5 = vsub.f32 0.0, %v8737_v60  ;;  %v6303_v34 = vpop.eup %6302  ;;  %v8746_v54 = vadd.f32 %v5864_v33, %v8491_v7  ;;  %v4720_v56 = vunpack.c.l.bf16 %v4835_v13 }
 0x389   : > { %4847 = vst [vmem:[%s8642_s9 + $0x30] sm:$0xff] %v4779_v38   ;;  %6316 = vpow2.f32 %v3911_v42  ;;  %v8749_v44 = vadd.f32 %v5867_v8, %v8491_v7  ;;  %v6305_v46 = vpop.eup %6304  ;;  %v3950_v59 = vadd.f32 1.0, %v6303_v34  ;;  %v8756_v48 = vadd.f32 %v5870_v6, %v8491_v7 }
 0x38a   : > { %6318 = vpow2.f32 %v3917_v39  ;;  %v3923_v47 = vmul.f32 1.442695, %v3861_v5  ;;  %v3948_v63 = vadd.f32 1.0, %v6305_v46  ;;  %v3859_v61 = vsub.f32 0.0, %v8746_v54 }
 0x38b   : > { %6320 = vpow2.f32 %v3913_v55  ;;  %v6307_v11 = vpop.eup %6306  ;;  %v3862_v4 = vsub.f32 0.0, %v8749_v44  ;;  %v4721_v0 = vunpack.c.h.bf16 %v4835_v13  ;;  %v4009_v28 = vmul.f32 %v6299_v3, %v8626_v32  ;;  %v4837_v32 = vld [vmem:[%s6535_s17 + $0x60] sm:$0xff]  }
 0x38c   : > { %6322 = vrcp.f32 %v3950_v59  ;;  %v3919_v53 = vmul.f32 1.442695, %v3859_v61  ;;  %v3860_v51 = vsub.f32 0.0, %v8756_v48  ;;  %v4007_v52 = vmul.f32 %v6301_v21, %v8632_v29 }
 0x38d   : > { %6324 = vrcp.f32 %v3948_v63  ;;  %v3925_v58 = vmul.f32 1.442695, %v3862_v4  ;;  %v4716_v31 = vunpack.c.l.bf16 %v4834_v19  ;;  %v4717_v30 = vunpack.c.h.bf16 %v4834_v19 }
 0x38e   : > { %6326 = vpow2.f32 %v3923_v47  ;;  %v6309_v37 = vpop.eup %6308  ;;  %v3953_v40 = vadd.f32 1.0, %v6307_v11  ;;  %v3921_v2 = vmul.f32 1.442695, %v3860_v51  ;;  %v4110_v42 = vadd.f32 %v4720_v56, %v4009_v28 }
 0x38f   : > { %v6311_v7 = vpop.eup %6310  ;;  %v4010_v14 = vmul.f32 %v6309_v37, %v8647_v15  ;;  %6328 = vpow2.f32 %v3919_v53  ;;  %v4108_v25 = vadd.f32 %v4716_v31, %v4007_v52  ;;  %v4728_v15 = vunpack.c.l.bf16 %v4837_v32 }
 0x390   : > { %v4008_v49 = vmul.f32 %v6311_v7, %v8662_v27  ;;  %6330 = vpow2.f32 %v3925_v58  ;;  %v4724_v39 = vunpack.c.l.bf16 %v4836_v22  ;;  %v4729_v17 = vunpack.c.h.bf16 %v4837_v32 }
 0x391   : > { %v6313_v16 = vpop.eup %6312  ;;  %v4111_v43 = vadd.f32 %v4721_v0, %v4010_v14  ;;  %6332 = vpow2.f32 %v3921_v2  ;;  %v4725_v3 = vunpack.c.h.bf16 %v4836_v22  ;;  %v4838_v0 = vld [vmem:[%s6535_s17 + $0x68] sm:$0xff]  }
 0x392   : > { %v6315_v10 = vpop.eup %6314  ;;  %v4109_v35 = vadd.f32 %v4717_v30, %v4008_v49  ;;  %6334 = vrcp.f32 %v3953_v40  ;;  %v4013_v62 = vmul.f32 %v6313_v16, %v8667_v45  ;;  %v4732_v31 = vunpack.c.l.bf16 %v4838_v0  ;;  %v4841_v49 = vld [vmem:[%s6535_s17 + $0x80] sm:$0xff]  }
 0x393   : > { %v6317_v29 = vpop.eup %6316  ;;  %v4794_v26 = vpack.c.bf16 %v4111_v43, %v4110_v42  ;;  %v4011_v18 = vmul.f32 %v6315_v10, %v8673_v57  ;;  %v4733_v30 = vunpack.c.h.bf16 %v4838_v0  ;;  %v4840_v10 = vld [vmem:[%s6535_s17 + $0x78] sm:$0xff]  }
 0x394   : > { %v6319_v36 = vpop.eup %6318  ;;  %v3951_v41 = vadd.f32 1.0, %v6317_v29  ;;  %v4789_v27 = vpack.c.bf16 %v4109_v35, %v4108_v25  ;;  %v4114_v45 = vadd.f32 %v4728_v15, %v4013_v62  ;;  %v4744_v25 = vunpack.c.l.bf16 %v4841_v49 }
 0x395   : > { %v6321_v1 = vpop.eup %6320  ;;  %v3954_v55 = vadd.f32 1.0, %v6319_v36  ;;  %4850 = vst [vmem:[%s8642_s9 + $0x48] sm:$0xff] %v4794_v26   ;;  %v4112_v57 = vadd.f32 %v4724_v39, %v4011_v18  ;;  %v4740_v36 = vunpack.c.l.bf16 %v4840_v10  ;;  %v4741_v26 = vunpack.c.h.bf16 %v4840_v10 }
 0x396   : > { %v6323_v38 = vpop.eup %6322  ;;  %6336 = vrcp.f32 %v3951_v41  ;;  %v3952_v33 = vadd.f32 1.0, %v6321_v1  ;;  %4849 = vst [vmem:[%s8642_s9 + $0x40] sm:$0xff] %v4789_v27  }
 0x397   : > { %v6325_v8 = vpop.eup %6324  ;;  %v4014_v6 = vmul.f32 %v6323_v38, %v8685_v9  ;;  %6338 = vrcp.f32 %v3954_v55 }
 0x398   : > { %v6327_v21 = vpop.eup %6326  ;;  %v4012_v5 = vmul.f32 %v6325_v8, %v8691_v24  ;;  %6340 = vrcp.f32 %v3952_v33  ;;  %v4839_v24 = vld [vmem:[%s6535_s17 + $0x70] sm:$0xff]   ;;  %s4681_s17 = sshll.u32 %s6420_s21, 11  ;;  %s8800_s21 = scalar_lea.sflag [#allocation4], %s229_s7 }
 0x399   : > { %v4115_v34 = vadd.f32 %v4729_v17, %v4014_v6  ;;  %v3957_v46 = vadd.f32 1.0, %v6327_v21  ;;  %v6329_v13 = vpop.eup %6328  ;;  %v4736_v58 = vunpack.c.l.bf16 %v4839_v24  ;;  %v4737_v51 = vunpack.c.h.bf16 %v4839_v24  ;;  %s8792_s13 = scalar_lea.hbm %s8851_s5, %s4681_s17 }
 0x39a   : > { %v4113_v59 = vadd.f32 %v4725_v3, %v4012_v5  ;;  %v6331_v47 = vpop.eup %6330  ;;  %v3955_v61 = vadd.f32 1.0, %v6329_v13 }
 0x39b   : > { %v4804_v63 = vpack.c.bf16 %v4115_v34, %v4114_v45  ;;  %6342 = vrcp.f32 %v3957_v46  ;;  %v6333_v9 = vpop.eup %6332  ;;  %v3958_v19 = vadd.f32 1.0, %v6331_v47 }
 0x39c   : > { %v4799_v11 = vpack.c.bf16 %v4113_v59, %v4112_v57  ;;  %v6335_v4 = vpop.eup %6334  ;;  %6344 = vrcp.f32 %v3955_v61  ;;  %v3956_v56 = vadd.f32 1.0, %v6333_v9 }
 0x39d   : > { %4852 = vst [vmem:[%s8642_s9 + $0x58] sm:$0xff] %v4804_v63   ;;  %6346 = vrcp.f32 %v3958_v19  ;;  %v4017_v28 = vmul.f32 %v6335_v4, %v8703_v23 }
 0x39e   : > { %4851 = vst [vmem:[%s8642_s9 + $0x50] sm:$0xff] %v4799_v11   ;;  %6348 = vrcp.f32 %v3956_v56 }
 0x39f   : > { %v4118_v2 = vadd.f32 %v4736_v58, %v4017_v28 }
 0x3a0   : > { %v6337_v53 = vpop.eup %6336 }
 0x3a1   : > { %v6339_v37 = vpop.eup %6338  ;;  %v4015_v52 = vmul.f32 %v6337_v53, %v8711_v50 }
 0x3a2   : > { %v6341_v40 = vpop.eup %6340  ;;  %v4018_v7 = vmul.f32 %v6339_v37, %v8717_v12  ;;  %v4745_v12 = vunpack.c.h.bf16 %v4841_v49 }
 0x3a3   : > { %v4016_v14 = vmul.f32 %v6341_v40, %v8724_v20  ;;  %v4116_v23 = vadd.f32 %v4732_v31, %v4015_v52 }
 0x3a4   : > { %v4119_v16 = vadd.f32 %v4737_v51, %v4018_v7 }
 0x3a5   : > { %v6343_v32 = vpop.eup %6342  ;;  %v4117_v22 = vadd.f32 %v4733_v30, %v4016_v14 }
 0x3a6   : > { %v4814_v42 = vpack.c.bf16 %v4119_v16, %v4118_v2  ;;  %v6345_v50 = vpop.eup %6344  ;;  %v4021_v29 = vmul.f32 %v6343_v32, %v8737_v60 }
 0x3a7   : > { %v4809_v43 = vpack.c.bf16 %v4117_v22, %v4116_v23  ;;  %v6347_v35 = vpop.eup %6346  ;;  %v4019_v20 = vmul.f32 %v6345_v50, %v8746_v54 }
 0x3a8   : > { %4854 = vst [vmem:[%s8642_s9 + $0x68] sm:$0xff] %v4814_v42   ;;  %v6349_v15 = vpop.eup %6348  ;;  %v4022_v39 = vmul.f32 %v6347_v35, %v8749_v44  ;;  %v4122_v60 = vadd.f32 %v4744_v25, %v4021_v29 }
 0x3a9   : > { %4853 = vst [vmem:[%s8642_s9 + $0x60] sm:$0xff] %v4809_v43   ;;  %v4020_v41 = vmul.f32 %v6349_v15, %v8756_v48  ;;  %v4120_v27 = vadd.f32 %v4740_v36, %v4019_v20 }
 0x3aa   : > { %v4123_v1 = vadd.f32 %v4745_v12, %v4022_v39 }
 0x3ab   : > { %v4121_v62 = vadd.f32 %v4741_v26, %v4020_v41 }
 0x3ac   : > { %v4824_v17 = vpack.c.bf16 %v4123_v1, %v4122_v60 }
 0x3ad   : > { %v4819_v54 = vpack.c.bf16 %v4121_v62, %v4120_v27 }
 0x3ae   : > { %4856 = vst [vmem:[%s8642_s9 + $0x78] sm:$0xff] %v4824_v17  }
 0x3af   : > { %4855 = vst [vmem:[%s8642_s9 + $0x70] sm:$0xff] %v4819_v54  }
 0x3b0   : > { %6363 = shalt.err (!%p6360_p5)
}
 0x3b1   : > { %s6364_s25 = scalar_lea.hbm %s8792_s13, 2048  ;;  %s6368_s7 = scalar_lea.hbm %s8851_s5, 4096 }
 0x3b2   : > { %p6365_p6 = scmp.ne.s32.totalorder %s8792_s13, %s6364_s25  ;;  %p6369_p10 = scmp.lt.u32.totalorder %s8792_s13, %s8851_s5 }
 0x3b3   : > { %p6370_p11 = scmp.lt.u32.totalorder %s6368_s7, %s6364_s25  ;;  %p6372_p13 = scmp.lt.u32.totalorder %s6364_s25, %s8792_s13 }
 0x3b4   : > { %p6366_p7 = pnand %p6365_p6, %p6506_p4 }
 0x3b5   : > { %p6371_p12 = por %p6370_p11, %p6369_p10 }
 0x3b6   : > { %p6367_p9 = pneg %p6366_p7 }
 0x3b7   : > { %p6373_p0 = por %p6372_p13, %p6371_p12 }
 0x3b9   : > { %p6374_p1 = pnand %p6373_p0, %p6367_p9 }
 0x3bb   : > { %6377 = shalt.err (!%p6374_p1)
}
 0x3bc   : > { %s6434_s17 = smov 64   ;;  %s6435_s11 = smov 4  }
 0x3bd   : > { %5936 = dma.vmem_to_hbm [thread:$0]  (%p6506_p4), %s8794_s10, 2048, %s8792_s13, %s8800_s21, %s6434_s17, %s6434_s17, %s6435_s11  }
 0x3be PF: > { %p5942_p2 = scmp.ge.s32.totalorder %s6428_s23, 2  ;;  %s4315_s12 = sand.u32 1, %s6408_s18  }
 0x3bf   : > { %s4316_s14 = scalar_lea.sflag [#allocation4], %s4315_s12 }
 0x3c0   : > { %p5939_p3 = pnand %p5942_p2, %p6513_p8 }
 0x3c2   : > { %6403 = dma.done.wait (!%p5939_p3), %s4316_s14, 2048  }
 0x3c3   : > { %6405 = vsyncadd (!%p5939_p3), %s4316_s14, 4294965248  ;;  %s18_s23 = sadd.s32 1, %s6428_s23   ;;  %s9337_s18 = smov %s6412_s19 }
 0x3c4   : > { %p15_p5 = scmp.ge.s32.totalorder %s18_s23, 4   ;;  %s9338_s19 = smov %s6416_s20 }
 0x3c5   : > { %s9339_s20 = smov %s6519_s6  ;;  %s9340_s21 = smov %s6424_s22 }
 0x3c6   : > { %s9341_s22 = smov %s9343_s26  ;;  %17 = sbr.rel (!%p15_p5) target bundleno = 4 (0x4), region = 79 }
 0x3cd   :  { %4321 = vsyncpa [#allocation4], 1 }
 0x3ce   :  { %4323 = vsyncpa [#allocation4 + $0x1], 1 }

</bundles_post_ra>
